<compile_context>
chip_gen: v7x
topology: tpu7x:2x2x1
jax: 0.10.0
libtpu: 0.0.40
codegen_flags: <defaults>
</compile_context>

<pallas_src>
import functools

import jax
import jax.numpy as jnp
from jax.experimental import pallas as pl
from jax.experimental.pallas import tpu as pltpu


# ----------------------------------------------------------------------------
# Fused kernel: add + 3x3 "same" conv (im2col, single matmul) + batch-stat BN
# ----------------------------------------------------------------------------
def fused_add_conv_bn_kernel(xa_ref, xb_ref, w_ref, gamma_ref, beta_ref,
                             o_ref, *, eps):
    # xa_ref, xb_ref : (N, H+2, W+2, Cin)  bf16, already zero-padded by 1 in H/W
    # w_ref          : (9*Cin, Cout)       bf16, (kh, kw, cin) folded row-major
    # gamma_ref/beta : (1, Cout)           f32
    # o_ref          : (N*H*W, Cout)       f32, lane-dense slab
    N, Hp, Wp, Cin = xa_ref.shape
    M, Cout = o_ref.shape
    H, W = Hp - 2, Wp - 2

    # ---- fused elementwise add (pad region is zeros + zeros) ---------------
    x = xa_ref[...] + xb_ref[...]                        # (N, H+2, W+2, Cin) bf16

    # ---- im2col: 9 static-slice taps folded into the contraction axis ------
    # K = 9*Cin = 432 -> pads to 512 on the MXU (vs 144 -> 256 before).
    taps = [x[:, kh:kh + H, kw:kw + W, :]
            for kh in range(3) for kw in range(3)]
    col = jnp.concatenate(taps, axis=-1)                 # (N, H, W, 9*Cin)
    col = col.reshape(M, 9 * Cin)                        # tile-exact collapse (W%8==0)

    # ---- conv: single MXU matmul, f32 accumulation --------------------------
    y = jnp.dot(col, w_ref[...],
                preferred_element_type=jnp.float32)      # (M, Cout) f32

    # ---- BatchNorm (batch statistics) in scale/shift form -------------------
    inv_cnt = 1.0 / float(M)
    mean = jnp.sum(y, axis=0, keepdims=True) * inv_cnt          # (1, Cout)
    ex2 = jnp.sum(y * y, axis=0, keepdims=True) * inv_cnt       # (1, Cout)
    var = ex2 - mean * mean
    scale = gamma_ref[...] * jax.lax.rsqrt(var + eps)           # (1, Cout)
    shift = beta_ref[...] - mean * scale
    o_ref[...] = y * scale + shift                              # single FMA sweep


# ----------------------------------------------------------------------------
# Wrapper (NCHW <-> NHWC plumbing + zero padding live here, outside the kernel)
# ----------------------------------------------------------------------------
def model_forward(x36_nchw, x30_nchw, w_hwio, gamma, beta, *, eps=1e-3):
    def prep(x):
        # NCHW -> NHWC, bf16, and zero-pad H/W by 1 so the kernel's 9 conv taps
        # are pure static slices (no roll / edge masks in-kernel).
        x = jnp.transpose(x, (0, 2, 3, 1)).astype(jnp.bfloat16)
        return jnp.pad(x, ((0, 0), (1, 1), (1, 1), (0, 0)))

    xa = prep(x36_nchw)
    xb = prep(x30_nchw)
    N, Hp, Wp, Cin = xa.shape
    H, W = Hp - 2, Wp - 2
    Cout = w_hwio.shape[-1]

    # (3, 3, Cin, Cout) -> (9*Cin, Cout): kh and kw both folded into K.
    wmat = w_hwio.reshape(9 * Cin, Cout).astype(jnp.bfloat16)
    gamma2 = gamma.reshape(1, Cout).astype(jnp.float32)
    beta2 = beta.reshape(1, Cout).astype(jnp.float32)

    vmem = pl.BlockSpec(memory_space=pltpu.MemorySpace.VMEM)
    out = pl.pallas_call(
        functools.partial(fused_add_conv_bn_kernel, eps=eps),
        out_shape=jax.ShapeDtypeStruct((N * H * W, Cout), jnp.float32),
        # No grid: the whole problem (~1.5 MB at test shapes) fits VMEM, so the
        # batch is folded into the matmul M dimension in a single invocation.
        in_specs=[vmem, vmem, vmem, vmem, vmem],
        out_specs=vmem,
    )(xa, xb, wmat, gamma2, beta2)

    out = out.reshape(N, H, W, Cout)          # lane-dense slab -> NHWC
    return jnp.transpose(out, (0, 3, 1, 2))   # NHWC -> NCHW


# ----------------------------------------------------------------------------
# Reference (plain JAX, f32) for validation
# ----------------------------------------------------------------------------
def reference_forward(x36_nchw, x30_nchw, w_hwio, gamma, beta, *, eps=1e-3):
    x = (x36_nchw + x30_nchw).astype(jnp.float32)
    y = jax.lax.conv_general_dilated(
        x, w_hwio.astype(jnp.float32),
        window_strides=(1, 1), padding=((1, 1), (1, 1)),
        dimension_numbers=("NCHW", "HWIO", "NCHW"),
        precision=jax.lax.Precision.HIGHEST,
    )
    mean = jnp.mean(y, axis=(0, 2, 3), keepdims=True)
    var = jnp.mean((y - mean) ** 2, axis=(0, 2, 3), keepdims=True)
    yhat = (y - mean) * jax.lax.rsqrt(var + eps)
    return yhat * gamma.reshape(1, -1, 1, 1) + beta.reshape(1, -1, 1, 1)


if __name__ == "__main__":
    # Small shapes consistent with the module: Cin=48 / Cout=192 are fixed by
    # the conv weights; batch and spatial kept small.
    N, Cin, H, W = 2, 48, 16, 16
    Cout = 192
    eps = 1e-3

    key = jax.random.PRNGKey(0)
    k1, k2, k3, k4, k5 = jax.random.split(key, 5)

    x36 = jax.random.normal(k1, (N, Cin, H, W), jnp.float32)
    x30 = jax.random.normal(k2, (N, Cin, H, W), jnp.float32)
    w_hwio = 0.05 * jax.random.normal(k3, (3, 3, Cin, Cout), jnp.float32)
    gamma = 1.0 + 0.1 * jax.random.normal(k4, (Cout,), jnp.float32)
    beta = 0.1 * jax.random.normal(k5, (Cout,), jnp.float32)

    out = jax.jit(functools.partial(model_forward, eps=eps))(
        x36, x30, w_hwio, gamma, beta
    )
    out = jax.block_until_ready(out)

    ref = reference_forward(x36, x30, w_hwio, gamma, beta, eps=eps)
    # Kernel contract: bf16 inputs + single-pass bf16 MXU matmul (f32
    # accumulation) vs the f32 HIGHEST reference -> bf16-level error on the
    # normalized (~unit-variance) output, amplified slightly by rsqrt(var).
    max_err = float(jnp.max(jnp.abs(out - ref)))
    mean_err = float(jnp.mean(jnp.abs(out - ref)))
    if max_err > 4e-2 or mean_err > 8e-3:
        raise AssertionError(
            f"Pallas kernel mismatch vs reference: max={max_err} mean={mean_err}")

    print("KERNEL_OK")
</pallas_src>

<mosaic_0001>
module attributes {stable_mosaic.version = 11 : i64} {
  func.func @fused_add_conv_bn_kernel(%arg0: memref<2x18x18x48xbf16, #tpu.memory_space<vmem>>, %arg1: memref<2x18x18x48xbf16, #tpu.memory_space<vmem>>, %arg2: memref<432x192xbf16, #tpu.memory_space<vmem>>, %arg3: memref<1x192xf32, #tpu.memory_space<vmem>>, %arg4: memref<1x192xf32, #tpu.memory_space<vmem>>, %arg5: memref<512x192xf32, #tpu.memory_space<vmem>>) attributes {dimension_semantics = [], scalar_prefetch = 0 : i64, scratch_operands = 0 : i64, tpu.core_type = #tpu.core_type<tc>} {
    %c0 = arith.constant 0 : index
    %c0_0 = arith.constant 0 : index
    %c0_1 = arith.constant 0 : index
    %c0_2 = arith.constant 0 : index
    %0 = vector.load %arg0[%c0, %c0_0, %c0_1, %c0_2] : memref<2x18x18x48xbf16, #tpu.memory_space<vmem>>, vector<2x18x18x48xbf16>
    %c0_3 = arith.constant 0 : index
    %c0_4 = arith.constant 0 : index
    %c0_5 = arith.constant 0 : index
    %c0_6 = arith.constant 0 : index
    %1 = vector.load %arg1[%c0_3, %c0_4, %c0_5, %c0_6] : memref<2x18x18x48xbf16, #tpu.memory_space<vmem>>, vector<2x18x18x48xbf16>
    %2 = arith.addf %0, %1 : vector<2x18x18x48xbf16>
    %3 = vector.extract_strided_slice %2 {offsets = [0, 0, 0, 0], sizes = [2, 16, 16, 48], strides = [1, 1, 1, 1]} : vector<2x18x18x48xbf16> to vector<2x16x16x48xbf16>
    %4 = vector.extract_strided_slice %2 {offsets = [0, 0, 1, 0], sizes = [2, 16, 16, 48], strides = [1, 1, 1, 1]} : vector<2x18x18x48xbf16> to vector<2x16x16x48xbf16>
    %5 = vector.extract_strided_slice %2 {offsets = [0, 0, 2, 0], sizes = [2, 16, 16, 48], strides = [1, 1, 1, 1]} : vector<2x18x18x48xbf16> to vector<2x16x16x48xbf16>
    %6 = vector.extract_strided_slice %2 {offsets = [0, 1, 0, 0], sizes = [2, 16, 16, 48], strides = [1, 1, 1, 1]} : vector<2x18x18x48xbf16> to vector<2x16x16x48xbf16>
    %7 = vector.extract_strided_slice %2 {offsets = [0, 1, 1, 0], sizes = [2, 16, 16, 48], strides = [1, 1, 1, 1]} : vector<2x18x18x48xbf16> to vector<2x16x16x48xbf16>
    %8 = vector.extract_strided_slice %2 {offsets = [0, 1, 2, 0], sizes = [2, 16, 16, 48], strides = [1, 1, 1, 1]} : vector<2x18x18x48xbf16> to vector<2x16x16x48xbf16>
    %9 = vector.extract_strided_slice %2 {offsets = [0, 2, 0, 0], sizes = [2, 16, 16, 48], strides = [1, 1, 1, 1]} : vector<2x18x18x48xbf16> to vector<2x16x16x48xbf16>
    %10 = vector.extract_strided_slice %2 {offsets = [0, 2, 1, 0], sizes = [2, 16, 16, 48], strides = [1, 1, 1, 1]} : vector<2x18x18x48xbf16> to vector<2x16x16x48xbf16>
    %11 = vector.extract_strided_slice %2 {offsets = [0, 2, 2, 0], sizes = [2, 16, 16, 48], strides = [1, 1, 1, 1]} : vector<2x18x18x48xbf16> to vector<2x16x16x48xbf16>
    %12 = tpu.concatenate %3, %4, %5, %6, %7, %8, %9, %10, %11 in 3 : vector<2x16x16x48xbf16>, vector<2x16x16x48xbf16>, vector<2x16x16x48xbf16>, vector<2x16x16x48xbf16>, vector<2x16x16x48xbf16>, vector<2x16x16x48xbf16>, vector<2x16x16x48xbf16>, vector<2x16x16x48xbf16>, vector<2x16x16x48xbf16> -> vector<2x16x16x432xbf16>
    %13 = vector.shape_cast %12 : vector<2x16x16x432xbf16> to vector<512x432xbf16>
    %c0_7 = arith.constant 0 : index
    %c0_8 = arith.constant 0 : index
    %14 = vector.load %arg2[%c0_7, %c0_8] : memref<432x192xbf16, #tpu.memory_space<vmem>>, vector<432x192xbf16>
    %cst = arith.constant dense<0.000000e+00> : vector<512x192xf32>
    %15 = tpu.matmul %13, %14, %cst {dimension_numbers = #tpu.dot_dimension_numbers<[1], [0], [0], [1], [0, 0, 1, 1], [], []>} : vector<512x432xbf16>, vector<432x192xbf16>, vector<512x192xf32> -> vector<512x192xf32>
    %cst_9 = arith.constant dense<0.000000e+00> : vector<192xf32>
    %16 = vector.multi_reduction <add>, %15, %cst_9 [0] : vector<512x192xf32> to vector<192xf32>
    %17 = vector.shape_cast %16 : vector<192xf32> to vector<1x192xf32>
    %cst_10 = arith.constant 0.001953125 : f32
    %18 = vector.broadcast %cst_10 : f32 to vector<1x192xf32>
    %19 = arith.mulf %17, %18 : vector<1x192xf32>
    %20 = arith.mulf %15, %15 : vector<512x192xf32>
    %cst_11 = arith.constant dense<0.000000e+00> : vector<192xf32>
    %21 = vector.multi_reduction <add>, %20, %cst_11 [0] : vector<512x192xf32> to vector<192xf32>
    %22 = vector.shape_cast %21 : vector<192xf32> to vector<1x192xf32>
    %cst_12 = arith.constant 0.001953125 : f32
    %23 = vector.broadcast %cst_12 : f32 to vector<1x192xf32>
    %24 = arith.mulf %22, %23 : vector<1x192xf32>
    %25 = arith.mulf %19, %19 : vector<1x192xf32>
    %26 = arith.subf %24, %25 : vector<1x192xf32>
    %c0_13 = arith.constant 0 : index
    %c0_14 = arith.constant 0 : index
    %27 = vector.load %arg3[%c0_13, %c0_14] : memref<1x192xf32, #tpu.memory_space<vmem>>, vector<1x192xf32>
    %cst_15 = arith.constant 1.000000e-03 : f32
    %28 = vector.broadcast %cst_15 : f32 to vector<1x192xf32>
    %29 = arith.addf %26, %28 : vector<1x192xf32>
    %30 = math.rsqrt %29 : vector<1x192xf32>
    %31 = arith.mulf %27, %30 : vector<1x192xf32>
    %c0_16 = arith.constant 0 : index
    %c0_17 = arith.constant 0 : index
    %32 = vector.load %arg4[%c0_16, %c0_17] : memref<1x192xf32, #tpu.memory_space<vmem>>, vector<1x192xf32>
    %33 = arith.mulf %19, %31 : vector<1x192xf32>
    %34 = arith.subf %32, %33 : vector<1x192xf32>
    %35 = vector.broadcast %31 : vector<1x192xf32> to vector<512x192xf32>
    %36 = arith.mulf %15, %35 : vector<512x192xf32>
    %37 = vector.broadcast %34 : vector<1x192xf32> to vector<512x192xf32>
    %38 = arith.addf %36, %37 : vector<512x192xf32>
    %c0_18 = arith.constant 0 : index
    %c0_19 = arith.constant 0 : index
    %39 = vector.load %arg5[%c0_18, %c0_19] : memref<512x192xf32, #tpu.memory_space<vmem>>, vector<512x192xf32>
    tpu.vector_store %arg5[%c0_18, %c0_19], %38 {strides = array<i32>} : memref<512x192xf32, #tpu.memory_space<vmem>>, vector<512x192xf32>,
    return
  }
}

</mosaic_0001>

<bundles_post_ra>
// kernel: model_forward.1
= control target key start
LH: loop header
LB: loop body
LE: loop exit
PB: predicated region body
PF: predicated region fallthrough
CT: control target
= control target key end

     0   :  { %vm1051_vm0 = vcmask 1046528   ;;  %s4714_s25 = smov 32   ;;  %s4715_s30 = smov 16   ;;  %vm602_vm1 = vsmask.f32 7424  ;;  %vm1624_vm2 = vcmask 392192   ;;  %s8395_s0 = inlined_call_operand.vmem [shape: bf16[2,18,18,48], index: 0, kind: input, shape index: {}]   ;;  %s8396_s1 = inlined_call_operand.vmem [shape: bf16[2,18,18,48], index: 1, kind: input, shape index: {}]   ;;  %s8397_s2 = inlined_call_operand.vmem [shape: bf16[432,192], index: 2, kind: input, shape index: {}]   ;;  %s8398_s3 = inlined_call_operand.vmem [shape: f32[1,192], index: 3, kind: input, shape index: {}]   ;;  %s8399_s4 = inlined_call_operand.vmem [shape: f32[1,192], index: 4, kind: input, shape index: {}]   ;;  %s8400_s5 = inlined_call_operand.hbm [shape: f32[512,192], index: 5, kind: output, shape index: {}]  }
   0x1   :  { %v28_v0 = vld [vmem:[%s8395_s0 + $0x18] sm:$0xf]  ;;  %v29_v1 = vld [vmem:[%s8395_s0 + $0x1c] sm:$0xf]  ;;  %v25_v5 = vld [vmem:[%s8395_s0 + $0xc] sm:$0xf] }
   0x2   :  { %v136_v2 = vld [vmem:[%s8396_s1 + $0x18] sm:$0xf]  ;;  %v137_v3 = vld [vmem:[%s8396_s1 + $0x1c] sm:$0xf]  ;;  %v26_v7 = vld [vmem:[%s8395_s0 + $0x10] sm:$0xf] }
   0x3   :  { %v244_v4 = vadd.bf16 %v136_v2, %v28_v0  ;;  %v245_v6 = vadd.bf16 %v137_v3, %v29_v1  ;;  %v133_v8 = vld [vmem:[%s8396_s1 + $0xc] sm:$0xf]  ;;  %v134_v9 = vld [vmem:[%s8396_s1 + $0x10] sm:$0xf]  ;;  %v27_v12 = vld [vmem:[%s8395_s0 + $0x14] sm:$0x1] }
   0x4   :  { %v241_v10 = vadd.bf16 %v133_v8, %v25_v5  ;;  %v242_v11 = vadd.bf16 %v134_v9, %v26_v7  ;;  %v135_v13 = vld [vmem:[%s8396_s1 + $0x14] sm:$0x1]  ;;  %v22_v16 = vld [vmem:[%s8395_s0] sm:$0xf]  ;;  %v23_v17 = vld [vmem:[%s8395_s0 + $0x4] sm:$0xf] }
   0x5   :  { %v4784_v14 = vcombine.low %v244_v4, %v245_v6  ;;  %v243_v15 = vadd.bf16 %v135_v13, %v27_v12  ;;  %v24_v18 = vld [vmem:[%s8395_s0 + $0x8] sm:$0x1]  ;;  %v130_v20 = vld [vmem:[%s8396_s1] sm:$0xf]  ;;  %v131_v21 = vld [vmem:[%s8396_s1 + $0x4] sm:$0xf] }
   0x6   :  { %v4795_v19 = vcombine.low %v241_v10, %v242_v11  ;;  %v132_v22 = vld [vmem:[%s8396_s1 + $0x8] sm:$0x1]  ;;  %v238_v24 = vadd.bf16 %v130_v20, %v22_v16  ;;  %v239_v25 = vadd.bf16 %v131_v21, %v23_v17  ;;  %v30_v27 = vld [vmem:[%s8395_s0 + $0x20] sm:$0x1]  ;;  %v31_v40 = vld [vmem:[%s8395_s0 + $0x24] sm:$0xf] }
   0x7   :  { %1460 = vrot.lane.b32.xlu1 %v4784_v14, %s4714_s25  ;;  %v4342_v23 = vcombine.low %v243_v15, %v243_v15  ;;  %v240_v26 = vadd.bf16 %v132_v22, %v24_v18  ;;  %v138_v28 = vld [vmem:[%s8396_s1 + $0x20] sm:$0x1]  ;;  %v628_v38 = vshrl.u32 %v4784_v14, 16  ;;  %v630_v39 = vshll.u32 %v4784_v14, 16  ;;  %v32_v41 = vld [vmem:[%s8395_s0 + $0x28] sm:$0xf] }
   0x8   :  { %1222 = vrot.lane.b32.xlu0 %v4795_v19, %s4715_s30  ;;  %v1055_v29 = vrot.slane %v4795_v19, 1  ;;  %v616_v30 = vshrl.u32 %v4795_v19, 16  ;;  %v618_v31 = vshll.u32 %v4795_v19, 16  ;;  %v4819_v33 = vcombine.low %v238_v24, %v239_v25  ;;  %v139_v46 = vld [vmem:[%s8396_s1 + $0x24] sm:$0xf]  ;;  %s4716_s12 = smov 96  }
   0x9   :  { %v1056_v32 = vrot.slane %v4342_v23, 1  ;;  %v4341_v34 = vcombine.low %v240_v26, %v240_v26  ;;  %v623_v35 = vshll.u32 %v4342_v23, 16  ;;  %v246_v37 = vadd.bf16 %v138_v28, %v30_v27  ;;  %v140_v50 = vld [vmem:[%s8396_s1 + $0x28] sm:$0xf]  ;;  %v33_v51 = vld [vmem:[%s8395_s0 + $0x2c] sm:$0x1] }
   0xa   :  { %v620_v36 = vrot.slane %v618_v31, 1  ;;  %v1052_v43 = vrot.slane %v4819_v33, 1  ;;  %v632_v49 = vrot.slane %v630_v39, 1  ;;  %v604_v53 = vshrl.u32 %v4819_v33, 16  ;;  %v141_v56 = vld [vmem:[%s8396_s1 + $0x2c] sm:$0x1] }
   0xb   :  { %v1057_v42 = vsel %vm1051_vm0, %v1055_v29, %v1056_v32  ;;  %v1053_v44 = vrot.slane %v4341_v34, 1  ;;  %v625_v45 = vrot.slane %v623_v35, 1  ;;  %v4343_v48 = vcombine.low %v246_v37, %v246_v37  ;;  %s4717_s19 = smov 64   ;;  %s4718_s20 = smov 112   ;;  %v4605_v13 = vld [vmem:[%s8397_s2 + $0x4] ss:$8 sps:$4 sm:$0xff]  }
   0xc   :  { %1150 = vrot.lane.b32.xlu1 %v1057_v42, %s4716_s12  ;;  %v621_v47 = vor.u32 %v620_v36, %v616_v30  ;;  %v606_v54 = vshll.u32 %v4819_v33, 16  ;;  %v611_v55 = vshll.u32 %v4341_v34, 16  ;;  %v633_v58 = vor.u32 %v632_v49, %v628_v38  ;;  %s4719_s21 = smov 48   ;;  %s4720_s24 = smov 80   ;;  %v34_v15 = vld [vmem:[%s8395_s0 + $0x30] sm:$0xf]  ;;  %2595 = vmatprep.subr.bf16.mxu1 %v4605_v13 }
   0xd   :  { %v1054_v52 = vsel %vm1051_vm0, %v1052_v43, %v1053_v44  ;;  %v635_v59 = vshll.u32 %v4343_v48, 16  ;;  %v247_v62 = vadd.bf16 %v139_v46, %v31_v40  ;;  %v248_v63 = vadd.bf16 %v140_v50, %v32_v41  ;;  %v4607_v16 = vld [vmem:[%s8397_s2] ss:$8 sps:$4 sm:$0xff]   ;;  %v35_v17 = vld [vmem:[%s8395_s0 + $0x34] sm:$0xf] }
   0xe   :  { %1148 = vrot.lane.b32.xlu0 %v1054_v52, %s4716_s12  ;;  %v626_v57 = vsel %vm602_vm1, %v621_v47, %v625_v45  ;;  %v608_v60 = vrot.slane %v606_v54, 1  ;;  %v613_v61 = vrot.slane %v611_v55, 1  ;;  %v249_v1 = vadd.bf16 %v141_v56, %v33_v51  ;;  %v142_v18 = vld [vmem:[%s8396_s1 + $0x30] sm:$0xf]  ;;  %v143_v20 = vld [vmem:[%s8396_s1 + $0x34] sm:$0xf]  ;;  %2596 = vmatpush1.bf16.msra.mxu1 %v4607_v16 }
   0xf   :  { %v637_v0 = vrot.slane %v635_v59, 1  ;;  %v4850_v3 = vcombine.low %v247_v62, %v248_v63  ;;  %v1058_v8 = vrot.slane %v4784_v14, 1  ;;  %v1059_v9 = vrot.slane %v4343_v48, 1  ;;  %v4608_v21 = vld [vmem:[%s8397_s2 + $0x14] ss:$8 sps:$4 sm:$0xff]  }
  0x10   :  { %1316 = vrot.lane.b32.xlu1 %v626_v57, %s4717_s19  ;;  %v609_v2 = vor.u32 %v608_v60, %v604_v53  ;;  %v4853_v4 = vcombine.low %v249_v1, %v249_v1  ;;  %v4610_v25 = vld [vmem:[%s8397_s2 + $0x10] ss:$8 sps:$4 sm:$0xff]   ;;  %v4611_v26 = vld [vmem:[%s8397_s2 + $0x24] ss:$8 sps:$4 sm:$0xff]   ;;  %2597 = vmatprep.subr.bf16.mxu1 %v4608_v21  ;;  %v250_v27 = vadd.bf16 %v142_v18, %v34_v15  ;;  %v4613_v31 = vld [vmem:[%s8397_s2 + $0x20] ss:$8 sps:$4 sm:$0xff]  }
  0x11   :  { %v4856_v5 = vsel %vm602_vm1, %v633_v58, %v637_v0  ;;  %v642_v7 = vshll.u32 %v4850_v3, 16  ;;  %v640_v10 = vshrl.u32 %v4850_v3, 16  ;;  %v4890_v22 = vsel %vm1051_vm0, %v1058_v8, %v1059_v9  ;;  %v36_v29 = vld [vmem:[%s8395_s0 + $0x38] sm:$0x1]  ;;  %v4614_v34 = vld [vmem:[%s8397_s2 + $0x34] ss:$8 sps:$4 sm:$0xff]  }
  0x12   :  { %1386 = vrot.lane.b32.xlu0 %v1057_v42, %s4718_s20  ;;  %v614_v6 = vsel %vm602_vm1, %v609_v2, %v613_v61  ;;  %v647_v12 = vshll.u32 %v4853_v4, 16  ;;  %v251_v28 = vadd.bf16 %v143_v20, %v35_v17  ;;  %v144_v30 = vld [vmem:[%s8396_s1 + $0x38] sm:$0x1]  ;;  %2598 = vmatpush1.bf16.msra.mxu1 %v4610_v25  ;;  %v37_v37 = vld [vmem:[%s8395_s0 + $0x3c] sm:$0xf]  ;;  %v1061_v56 = vrot.slane %v4850_v3, 1 }
  0x13   :  { %v644_v11 = vrot.slane %v642_v7, 1  ;;  %2599 = vmatprep.subr.bf16.mxu1 %v4611_v26  ;;  %v252_v36 = vadd.bf16 %v144_v30, %v36_v29  ;;  %v38_v38 = vld [vmem:[%s8395_s0 + $0x40] sm:$0xf]  ;;  %v145_v39 = vld [vmem:[%s8396_s1 + $0x3c] sm:$0xf]  ;;  %4435 = vmatprep.mubr.msk.bf16.mxu0 %vm1624_vm2, %v4890_v22 }
  0x14   :  { %987 = vrot.lane.b32.xlu1 %v614_v6, %s4719_s21  ;;  %v649_v24 = vrot.slane %v647_v12, 1  ;;  %v4918_v35 = vcombine.low %v250_v27, %v251_v28  ;;  %v4616_v40 = vld [vmem:[%s8397_s2 + $0x30] ss:$8 sps:$4 sm:$0xff]   ;;  %v4620_v41 = vld [vmem:[%s8397_s2 + $0x104] ss:$8 sps:$4 sm:$0xff]   ;;  %v253_v52 = vadd.bf16 %v145_v39, %v37_v37 }
  0x15   :  { %v645_v23 = vor.u32 %v644_v11, %v640_v10  ;;  %v146_v42 = vld [vmem:[%s8396_s1 + $0x40] sm:$0xf]  ;;  %v4617_v43 = vld [vmem:[%s8397_s2 + $0x44] ss:$8 sps:$4 sm:$0xff]   ;;  %2948 = vmatprep.subr.bf16.mxu0 %v4620_v41  ;;  %v4626_v45 = vld [vmem:[%s8397_s2 + $0x114] ss:$8 sps:$4 sm:$0xff]   ;;  %v4951_v46 = vcombine.low %v252_v36, %v252_v36 }
  0x16   :  { %1554 = vrot.lane.b32.xlu0 %v4856_v5, %s4720_s24  ;;  %2600 = vmatpush1.bf16.msra.mxu1 %v4613_v31  ;;  %v4624_v44 = vld [vmem:[%s8397_s2 + $0x100] ss:$8 sps:$4 sm:$0xff]   ;;  %v654_v47 = vshll.u32 %v4918_v35, 16  ;;  %v39_v48 = vld [vmem:[%s8395_s0 + $0x44] sm:$0x1]  ;;  %v254_v53 = vadd.bf16 %v146_v42, %v38_v38  ;;  %v652_v58 = vshrl.u32 %v4918_v35, 16 }
  0x17   :  { %v4912_v32 = vsel %vm602_vm1, %v645_v23, %v649_v24  ;;  %2601 = vmatprep.subr.bf16.mxu1 %v4614_v34  ;;  %v147_v49 = vld [vmem:[%s8396_s1 + $0x44] sm:$0x1]  ;;  %2949 = vmatpush1.bf16.msra.mxu0 %v4624_v44  ;;  %v4619_v50 = vld [vmem:[%s8397_s2 + $0x40] ss:$8 sps:$4 sm:$0xff]   ;;  %v4630_v51 = vld [vmem:[%s8397_s2 + $0x110] ss:$8 sps:$4 sm:$0xff]  }
  0x18   :  { %1318 = vrot.lane.b32.xlu1 %v4856_v5, %s4717_s19  ;;  %v4622_v54 = vld [vmem:[%s8397_s2 + $0x54] ss:$8 sps:$4 sm:$0xff]   ;;  %2950 = vmatprep.subr.bf16.mxu0 %v4626_v45  ;;  %v4632_v55 = vld [vmem:[%s8397_s2 + $0x124] ss:$8 sps:$4 sm:$0xff]   ;;  %v656_v59 = vrot.slane %v654_v47, 1  ;;  %v659_v60 = vshll.u32 %v4951_v46, 16  ;;  %v255_v61 = vadd.bf16 %v147_v49, %v39_v48  ;;  %v4991_v1 = vcombine.low %v253_v52, %v254_v53 }
  0x19   :  { %v4625_v62 = vld [vmem:[%s8397_s2 + $0x50] ss:$8 sps:$4 sm:$0xff]   ;;  %v4628_v63 = vld [vmem:[%s8397_s2 + $0x64] ss:$8 sps:$4 sm:$0xff]   ;;  %v4636_v0 = vld [vmem:[%s8397_s2 + $0x120] ss:$8 sps:$4 sm:$0xff]  }
  0x1a   :  { %1224 = vrot.lane.b32.xlu0 %v4784_v14, %s4715_s30  ;;  %2602 = vmatpush1.bf16.msra.mxu1 %v4616_v40  ;;  %v4638_v2 = vld [vmem:[%s8397_s2 + $0x134] ss:$8 sps:$4 sm:$0xff]   ;;  %v661_v6 = vrot.slane %v659_v60, 1  ;;  %v4631_v7 = vld [vmem:[%s8397_s2 + $0x60] ss:$8 sps:$4 sm:$0xff]   ;;  %v5011_v9 = vcombine.low %v255_v61, %v255_v61  ;;  %v666_v11 = vshll.u32 %v4991_v1, 16 }
  0x1b   :  { %2603 = vmatprep.subr.bf16.mxu1 %v4617_v43  ;;  %2951 = vmatpush1.bf16.msra.mxu0 %v4630_v51  ;;  %v4642_v8 = vld [vmem:[%s8397_s2 + $0x130] ss:$8 sps:$4 sm:$0xff]   ;;  %v4634_v10 = vld [vmem:[%s8397_s2 + $0x74] ss:$8 sps:$4 sm:$0xff]   ;;  %v4644_v12 = vld [vmem:[%s8397_s2 + $0x144] ss:$8 sps:$4 sm:$0xff]  }
  0x1c   :  { %1388 = vrot.lane.b32.xlu1 %v4890_v22, %s4718_s20  ;;  %2952 = vmatprep.subr.bf16.mxu0 %v4632_v55  ;;  %v1064_v15 = vrot.slane %v4918_v35, 1  ;;  %v1065_v16 = vrot.slane %v4951_v46, 1  ;;  %v4648_v17 = vld [vmem:[%s8397_s2 + $0x140] ss:$8 sps:$4 sm:$0xff]   ;;  %v664_v18 = vshrl.u32 %v4991_v1, 16  ;;  %v671_v20 = vshll.u32 %v5011_v9, 16 }
  0x1d   :  { %v4637_v21 = vld [vmem:[%s8397_s2 + $0x70] ss:$8 sps:$4 sm:$0xff]   ;;  %v4640_v23 = vld [vmem:[%s8397_s2 + $0x84] ss:$8 sps:$4 sm:$0xff]   ;;  %v4650_v24 = vld [vmem:[%s8397_s2 + $0x154] ss:$8 sps:$4 sm:$0xff]  }
  0x1e   :  { %989 = vrot.lane.b32.xlu0 %v626_v57, %s4719_s21  ;;  %v1062_v57 = vrot.slane %v4853_v4, 1  ;;  %2604 = vmatpush1.bf16.msra.mxu1 %v4619_v50  ;;  %v40_v25 = vld [vmem:[%s8395_s0 + $0x48] sm:$0xf]  ;;  %v41_v26 = vld [vmem:[%s8395_s0 + $0x4c] sm:$0xf]  ;;  %v5066_v31 = vsel %vm1051_vm0, %v1064_v15, %v1065_v16  ;;  %v673_v36 = vrot.slane %v671_v20, 1 }
  0x1f   :  { %2605 = vmatprep.subr.bf16.mxu1 %v4622_v54  ;;  %2953 = vmatpush1.bf16.msra.mxu0 %v4636_v0  ;;  %v148_v27 = vld [vmem:[%s8396_s1 + $0x48] sm:$0xf]  ;;  %v4654_v28 = vld [vmem:[%s8397_s2 + $0x150] ss:$8 sps:$4 sm:$0xff]   ;;  %v149_v29 = vld [vmem:[%s8396_s1 + $0x4c] sm:$0xf] }
  0x20   :  { %1556 = vrot.lane.b32.xlu1 %v4912_v32, %s4720_s24  ;;  %v5001_v4 = vsel %vm1051_vm0, %v1061_v56, %v1062_v57  ;;  %2954 = vmatprep.subr.bf16.mxu0 %v4638_v2  ;;  %v4643_v30 = vld [vmem:[%s8397_s2 + $0x80] ss:$8 sps:$4 sm:$0xff]   ;;  %v4646_v37 = vld [vmem:[%s8397_s2 + $0x94] ss:$8 sps:$4 sm:$0xff]   ;;  %v4656_v38 = vld [vmem:[%s8397_s2 + $0x164] ss:$8 sps:$4 sm:$0xff]   ;;  %v256_v40 = vadd.bf16 %v148_v27, %v40_v25  ;;  %v257_v41 = vadd.bf16 %v149_v29, %v41_v26 }
  0x21   :  { %v42_v39 = vld [vmem:[%s8395_s0 + $0x50] sm:$0x1]  ;;  %v4660_v42 = vld [vmem:[%s8397_s2 + $0x160] ss:$8 sps:$4 sm:$0xff]   ;;  %v4652_v45 = vld [vmem:[%s8397_s2 + $0xa4] ss:$8 sps:$4 sm:$0xff]  }
  0x22   :  { %1462 = vrot.lane.b32.xlu0 %v4850_v3, %s4714_s25  ;;  %2606 = vmatpush1.bf16.msra.mxu1 %v4625_v62  ;;  %v150_v43 = vld [vmem:[%s8396_s1 + $0x50] sm:$0x1]  ;;  %v4662_v47 = vld [vmem:[%s8397_s2 + $0x174] ss:$8 sps:$4 sm:$0xff]   ;;  %v5101_v48 = vcombine.low %v256_v40, %v257_v41  ;;  %v44_v52 = vld [vmem:[%s8395_s0 + $0x58] sm:$0xf] }
  0x23   :  { %2607 = vmatprep.subr.bf16.mxu1 %v4628_v63  ;;  %2955 = vmatpush1.bf16.msra.mxu0 %v4642_v8  ;;  %v4649_v44 = vld [vmem:[%s8397_s2 + $0x90] ss:$8 sps:$4 sm:$0xff]   ;;  %v258_v49 = vadd.bf16 %v150_v43, %v42_v39  ;;  %v43_v51 = vld [vmem:[%s8395_s0 + $0x54] sm:$0xf]  ;;  %v4668_v55 = vld [vmem:[%s8397_s2 + $0x184] ss:$8 sps:$4 sm:$0xff]  }
  0x24   :  { %1226 = vrot.lane.b32.xlu1 %v4850_v3, %s4715_s30  ;;  %2956 = vmatprep.subr.bf16.mxu0 %v4644_v12  ;;  %v4666_v50 = vld [vmem:[%s8397_s2 + $0x170] ss:$8 sps:$4 sm:$0xff]   ;;  %v151_v53 = vld [vmem:[%s8396_s1 + $0x54] sm:$0xf]  ;;  %v4664_v63 = vld [vmem:[%s8397_s2 + $0xc4] ss:$8 sps:$4 sm:$0xff]  }
  0x25   :  { %v4658_v54 = vld [vmem:[%s8397_s2 + $0xb4] ss:$8 sps:$4 sm:$0xff]   ;;  %v152_v56 = vld [vmem:[%s8396_s1 + $0x58] sm:$0xf]  ;;  %v5131_v57 = vcombine.low %v258_v49, %v258_v49  ;;  %v259_v61 = vadd.bf16 %v151_v53, %v43_v51  ;;  %v1067_v2 = vrot.slane %v4991_v1, 1  ;;  %v676_v8 = vshrl.u32 %v5101_v48, 16 }
  0x26   :  { %1152 = vrot.lane.b32.xlu0 %v4890_v22, %s4716_s12  ;;  %2608 = vmatpush1.bf16.msra.mxu1 %v4631_v7  ;;  %v668_v22 = vrot.slane %v666_v11, 1  ;;  %v4661_v60 = vld [vmem:[%s8397_s2 + $0xb0] ss:$8 sps:$4 sm:$0xff]   ;;  %v260_v62 = vadd.bf16 %v152_v56, %v44_v52  ;;  %v4674_v0 = vld [vmem:[%s8397_s2 + $0x194] ss:$8 sps:$4 sm:$0xff]   ;;  %v1068_v7 = vrot.slane %v5011_v9, 1 }
  0x27   :  { %2609 = vmatprep.subr.bf16.mxu1 %v4634_v10  ;;  %2957 = vmatpush1.bf16.msra.mxu0 %v4648_v17  ;;  %v683_v11 = vshll.u32 %v5131_v57, 16  ;;  %v4678_v12 = vld [vmem:[%s8397_s2 + $0x190] ss:$8 sps:$4 sm:$0xff]   ;;  %v4667_v15 = vld [vmem:[%s8397_s2 + $0xc0] ss:$8 sps:$4 sm:$0xff]  }
  0x28   :  { %991 = vrot.lane.b32.xlu1 %v4856_v5, %s4719_s21  ;;  %v657_v5 = vor.u32 %v656_v59, %v652_v58  ;;  %v669_v34 = vor.u32 %v668_v22, %v664_v18  ;;  %2958 = vmatprep.subr.bf16.mxu0 %v4650_v24  ;;  %v678_v58 = vshll.u32 %v5101_v48, 16  ;;  %v4672_v59 = vld [vmem:[%s8397_s2 + $0x180] ss:$8 sps:$4 sm:$0xff]   ;;  %v5168_v16 = vcombine.low %v259_v61, %v260_v62  ;;  %v4670_v17 = vld [vmem:[%s8397_s2 + $0xd4] ss:$8 sps:$4 sm:$0xff]  }
  0x29   :  { %v4680_v18 = vld [vmem:[%s8397_s2 + $0x1a4] ss:$8 sps:$4 sm:$0xff]   ;;  %v4684_v22 = vld [vmem:[%s8397_s2 + $0x1a0] ss:$8 sps:$4 sm:$0xff]   ;;  %v4685_v43 = vld [vmem:[%s8397_s2 + $0xf0] ss:$8 sps:$4 sm:$0xff]  }
  0x2a   :  { %1320 = vrot.lane.b32.xlu0 %v4912_v32, %s4717_s19  ;;  %v5023_v13 = vsel %vm602_vm1, %v657_v5, %v661_v6  ;;  %2610 = vmatpush1.bf16.msra.mxu1 %v4637_v21  ;;  %v5094_v46 = vsel %vm602_vm1, %v669_v34, %v673_v36  ;;  %v45_v5 = vld [vmem:[%s8395_s0 + $0x5c] sm:$0x1]  ;;  %v680_v10 = vrot.slane %v678_v58, 1  ;;  %v685_v21 = vrot.slane %v683_v11, 1  ;;  %v4676_v26 = vld [vmem:[%s8397_s2 + $0xe4] ss:$8 sps:$4 sm:$0xff]  }
  0x2b   :  { %2611 = vmatprep.subr.bf16.mxu1 %v4640_v23  ;;  %2959 = vmatpush1.bf16.msra.mxu0 %v4654_v28  ;;  %v153_v6 = vld [vmem:[%s8396_s1 + $0x5c] sm:$0x1]  ;;  %v4673_v23 = vld [vmem:[%s8397_s2 + $0xd0] ss:$8 sps:$4 sm:$0xff]   ;;  %v690_v25 = vshll.u32 %v5168_v16, 16  ;;  %v1070_v28 = vrot.slane %v5101_v48, 1 }
  0x2c   :  { %1464 = vrot.lane.b32.xlu1 %v4918_v35, %s4714_s25  ;;  %2960 = vmatprep.subr.bf16.mxu0 %v4656_v38  ;;  %v261_v9 = vadd.bf16 %v153_v6, %v45_v5  ;;  %v681_v20 = vor.u32 %v680_v10, %v676_v8  ;;  %v4679_v29 = vld [vmem:[%s8397_s2 + $0xe0] ss:$8 sps:$4 sm:$0xff]   ;;  %v688_v34 = vshrl.u32 %v5168_v16, 16  ;;  %v4682_v38 = vld [vmem:[%s8397_s2 + $0xf4] ss:$8 sps:$4 sm:$0xff]  }
  0x2d   :  { %v692_v36 = vrot.slane %v690_v25, 1  ;;  %v46_v39 = vld [vmem:[%s8395_s0 + $0x60] sm:$0xf]  ;;  %v47_v40 = vld [vmem:[%s8395_s0 + $0x64] sm:$0xf] }
  0x2e   :  { %1390 = vrot.lane.b32.xlu0 %v5001_v4, %s4718_s20  ;;  %2612 = vmatpush1.bf16.msra.mxu1 %v4643_v30  ;;  %v5189_v24 = vcombine.low %v261_v9, %v261_v9  ;;  %v686_v27 = vsel %vm602_vm1, %v681_v20, %v685_v21  ;;  %v1071_v30 = vrot.slane %v5131_v57, 1  ;;  %v154_v41 = vld [vmem:[%s8396_s1 + $0x60] sm:$0xf]  ;;  %v48_v51 = vld [vmem:[%s8395_s0 + $0x68] sm:$0x1] }
  0x2f   :  { %2613 = vmatprep.subr.bf16.mxu1 %v4646_v37  ;;  %2961 = vmatpush1.bf16.msra.mxu0 %v4660_v42  ;;  %v155_v42 = vld [vmem:[%s8396_s1 + $0x64] sm:$0xf]  ;;  %v262_v49 = vadd.bf16 %v154_v41, %v46_v39  ;;  %v156_v52 = vld [vmem:[%s8396_s1 + $0x68] sm:$0x1] }
  0x30   :  { %1154 = vrot.lane.b32.xlu1 %v5001_v4, %s4716_s12  ;;  %2962 = vmatprep.subr.bf16.mxu0 %v4662_v47  ;;  %v695_v37 = vshll.u32 %v5189_v24, 16 }
  0x32   :  { %1558 = vrot.lane.b32.xlu0 %v5023_v13, %s4720_s24  ;;  %2614 = vmatpush1.bf16.msra.mxu1 %v4649_v44  ;;  %v5228_v44 = vsel %vm1051_vm0, %v1070_v28, %v1071_v30  ;;  %v697_v47 = vrot.slane %v695_v37, 1 }
  0x33   :  { %2615 = vmatprep.subr.bf16.mxu1 %v4652_v45  ;;  %2963 = vmatpush1.bf16.msra.mxu0 %v4666_v50  ;;  %v693_v45 = vor.u32 %v692_v36, %v688_v34  ;;  %v263_v50 = vadd.bf16 %v155_v42, %v47_v40 }
  0x34   :  { %1322 = vrot.lane.b32.xlu1 %v5023_v13, %s4717_s19  ;;  %2964 = vmatprep.subr.bf16.mxu0 %v4668_v55 }
  0x35   :  { %v5243_v53 = vcombine.low %v262_v49, %v263_v50 }
  0x36   :  { %1228 = vrot.lane.b32.xlu0 %v4918_v35, %s4715_s30 }
  0x37   :  { %2965 = vmatpush1.bf16.msra.mxu0 %v4672_v59 }
  0x38   :  { %1392 = vrot.lane.b32.xlu1 %v5066_v31, %s4718_s20  ;;  %2966 = vmatprep.subr.bf16.mxu0 %v4674_v0 }
  0x3a   :  { %993 = vrot.lane.b32.xlu0 %v4912_v32, %s4719_s21  ;;  %v4655_v32 = vld [vmem:[%s8397_s2 + $0xa0] ss:$8 sps:$4 sm:$0xff]  }
  0x3b   :  { %2616 = vmatpush1.bf16.msra.mxu1 %v4655_v32  ;;  %2967 = vmatpush1.bf16.msra.mxu0 %v4678_v12  ;;  %v698_v32 = vsel %vm602_vm1, %v693_v45, %v697_v47 }
  0x3c   :  { %1560 = vrot.lane.b32.xlu1 %v5094_v46, %s4720_s24  ;;  %2617 = vmatprep.subr.bf16.mxu1 %v4658_v54  ;;  %v264_v54 = vadd.bf16 %v156_v52, %v48_v51 }
  0x3d   :  { %2968 = vmatprep.subr.bf16.mxu0 %v4680_v18 }
  0x3e   :  { %1466 = vrot.lane.b32.xlu0 %v4991_v1, %s4714_s25 }
  0x3f   :  { %2618 = vmatpush1.bf16.msra.mxu1 %v4661_v60  ;;  %2969 = vmatpush1.bf16.msra.mxu0 %v4684_v22 }
  0x40   :  { %1230 = vrot.lane.b32.xlu1 %v4991_v1, %s4715_s30  ;;  %2619 = vmatprep.subr.bf16.mxu1 %v4664_v63 }
  0x42   :  { %1156 = vrot.lane.b32.xlu0 %v5066_v31, %s4716_s12 }
  0x43   :  { %2620 = vmatpush1.bf16.msra.mxu1 %v4667_v15 }
  0x44   :  { %995 = vrot.lane.b32.xlu1 %v5023_v13, %s4719_s21  ;;  %v5179_v13 = vsel %vm1051_vm0, %v1067_v2, %v1068_v7  ;;  %2621 = vmatprep.subr.bf16.mxu1 %v4670_v17 }
  0x46   :  { %1324 = vrot.lane.b32.xlu0 %v5094_v46, %s4717_s19 }
  0x47   :  { %2622 = vmatpush1.bf16.msra.mxu1 %v4673_v23 }
  0x48   :  { %1468 = vrot.lane.b32.xlu1 %v5101_v48, %s4714_s25  ;;  %2623 = vmatprep.subr.bf16.mxu1 %v4676_v26 }
  0x4a   :  { %1394 = vrot.lane.b32.xlu0 %v5179_v13, %s4718_s20 }
  0x4b   :  { %2624 = vmatpush1.bf16.msra.mxu1 %v4679_v29 }
  0x4c   :  { %1158 = vrot.lane.b32.xlu1 %v5179_v13, %s4716_s12  ;;  %2625 = vmatprep.subr.bf16.mxu1 %v4682_v38 }
  0x4e   :  { %1562 = vrot.lane.b32.xlu0 %v686_v27, %s4720_s24 }
  0x4f   :  { %2626 = vmatpush1.bf16.msra.mxu1 %v4685_v43 }
  0x50   :  { %1326 = vrot.lane.b32.xlu1 %v686_v27, %s4717_s19 }
  0x52   :  { %1232 = vrot.lane.b32.xlu0 %v5101_v48, %s4715_s30 }
  0x54   :  { %1396 = vrot.lane.b32.xlu1 %v5228_v44, %s4718_s20 }
  0x56   :  { %997 = vrot.lane.b32.xlu0 %v5094_v46, %s4719_s21 }
  0x57   :  { %10 = vsyncpa [#allocation3], 0  ;;  %v49_v55 = vld [vmem:[%s8395_s0 + $0x6c] sm:$0xf]  ;;  %v50_v56 = vld [vmem:[%s8395_s0 + $0x70] sm:$0xf]  ;;  %v4349_v58 = vcombine.low %v264_v54, %v264_v54 }
  0x58   :  { %1564 = vrot.lane.b32.xlu1 %v698_v32, %s4720_s24  ;;  %v157_v46 = vld [vmem:[%s8396_s1 + $0x6c] sm:$0xf]  ;;  %v158_v57 = vld [vmem:[%s8396_s1 + $0x70] sm:$0xf]  ;;  %v702_v59 = vshll.u32 %v5243_v53, 16  ;;  %v1073_v62 = vrot.slane %v5168_v16, 1 }
  0x59   :  { %v265_v60 = vadd.bf16 %v157_v46, %v49_v55  ;;  %v266_v61 = vadd.bf16 %v158_v57, %v50_v56  ;;  %v51_v63 = vld [vmem:[%s8395_s0 + $0x74] sm:$0x1]  ;;  %v1074_v2 = vrot.slane %v5189_v24, 1  ;;  %v700_v5 = vshrl.u32 %v5243_v53, 16  ;;  %v52_v25 = vld [vmem:[%s8395_s0 + $0x78] sm:$0xf] }
  0x5a   :  { %1470 = vrot.lane.b32.xlu0 %v5168_v16, %s4714_s25  ;;  %v159_v0 = vld [vmem:[%s8396_s1 + $0x74] sm:$0x1]  ;;  %v704_v6 = vrot.slane %v702_v59, 1  ;;  %v707_v7 = vshll.u32 %v4349_v58, 16  ;;  %v1076_v20 = vrot.slane %v5243_v53, 1  ;;  %v1077_v21 = vrot.slane %v4349_v58, 1 }
  0x5b   :  { %v5275_v8 = vcombine.low %v265_v60, %v266_v61  ;;  %v267_v10 = vadd.bf16 %v159_v0, %v51_v63  ;;  %v5279_v11 = vsel %vm1051_vm0, %v1073_v62, %v1074_v2  ;;  %v53_v26 = vld [vmem:[%s8395_s0 + $0x7c] sm:$0xf]  ;;  %v54_v38 = vld [vmem:[%s8395_s0 + $0x80] sm:$0x1]  ;;  %v55_v43 = vld [vmem:[%s8395_s0 + $0x84] sm:$0xf] }
  0x5c   :  { %1234 = vrot.lane.b32.xlu1 %v5168_v16, %s4715_s30  ;;  %v705_v12 = vor.u32 %v704_v6, %v700_v5  ;;  %v709_v15 = vrot.slane %v707_v7, 1  ;;  %v161_v28 = vld [vmem:[%s8396_s1 + $0x7c] sm:$0xf]  ;;  %v5306_v29 = vsel %vm1051_vm0, %v1076_v20, %v1077_v21  ;;  %v162_v39 = vld [vmem:[%s8396_s1 + $0x80] sm:$0x1]  ;;  %vm1786_vm3 = vcmask 130048  }
  0x5d   :  { %v4350_v9 = vcombine.low %v267_v10, %v267_v10  ;;  %v714_v17 = vshll.u32 %v5275_v8, 16  ;;  %v712_v22 = vshrl.u32 %v5275_v8, 16  ;;  %v269_v37 = vadd.bf16 %v161_v28, %v53_v26  ;;  %v56_v45 = vld [vmem:[%s8395_s0 + $0x88] sm:$0xf]  ;;  %v163_v47 = vld [vmem:[%s8396_s1 + $0x84] sm:$0xf] }
  0x5e   :  { %1160 = vrot.lane.b32.xlu0 %v5228_v44, %s4716_s12  ;;  %v710_v18 = vsel %vm602_vm1, %v705_v12, %v709_v15  ;;  %v270_v42 = vadd.bf16 %v162_v39, %v54_v38  ;;  %v164_v49 = vld [vmem:[%s8396_s1 + $0x88] sm:$0xf]  ;;  %v1079_v56 = vrot.slane %v5275_v8, 1  ;;  %v57_v46 = vld [vmem:[%s8395_s0 + $0x8c] sm:$0x1]  ;;  %vm1851_vm4 = vcmask 523264  }
  0x5f   :  { %v716_v23 = vrot.slane %v714_v17, 1  ;;  %v719_v24 = vshll.u32 %v4350_v9, 16  ;;  %v272_v54 = vadd.bf16 %v164_v49, %v56_v45  ;;  %v165_v57 = vld [vmem:[%s8396_s1 + $0x8c] sm:$0x1]  ;;  %v1080_v58 = vrot.slane %v4350_v9, 1 }
  0x60   :  { %999 = vrot.lane.b32.xlu1 %v686_v27, %s4719_s21  ;;  %v160_v27 = vld [vmem:[%s8396_s1 + $0x78] sm:$0xf]  ;;  %v4351_v50 = vcombine.low %v270_v42, %v270_v42  ;;  %v273_v63 = vadd.bf16 %v165_v57, %v57_v46  ;;  %vm1916_vm5 = vcmask 916480   ;;  %vm2013_vm6 = vcmask 261120   ;;  %v59_v38 = vld [vmem:[%s8395_s0 + $0x94] sm:$0xf] }
  0x61   :  { %v717_v30 = vor.u32 %v716_v23, %v712_v22  ;;  %v721_v34 = vrot.slane %v719_v24, 1  ;;  %v268_v36 = vadd.bf16 %v160_v27, %v52_v25  ;;  %v5361_v2 = vsel %vm1051_vm0, %v1079_v56, %v1080_v58  ;;  %v167_v39 = vld [vmem:[%s8396_s1 + $0x94] sm:$0xf] }
  0x62   :  { %1328 = vrot.lane.b32.xlu0 %v698_v32, %s4717_s19  ;;  %v731_v61 = vshll.u32 %v4351_v50, 16  ;;  %v5365_v10 = vcombine.low %v273_v63, %v273_v63  ;;  %vm1689_vm7 = vcmask 785408   ;;  %v1083_v22 = vrot.slane %v4351_v50, 1  ;;  %v61_v63 = vld [vmem:[%s8395_s0 + $0x9c] sm:$0xf] }
  0x63   :  { %v5319_v40 = vsel %vm602_vm1, %v717_v30, %v721_v34  ;;  %v5322_v41 = vcombine.low %v268_v36, %v269_v37  ;;  %vm2078_vm8 = vcmask 654336   ;;  %v58_v30 = vld [vmem:[%s8395_s0 + $0x90] sm:$0xf] }
  0x64   :  { %1472 = vrot.lane.b32.xlu1 %v5243_v53, %s4714_s25  ;;  %v733_v6 = vrot.slane %v731_v61, 1  ;;  %v743_v26 = vshll.u32 %v5365_v10, 16 }
  0x65   :  { %v726_v51 = vshll.u32 %v5322_v41, 16  ;;  %v724_v59 = vshrl.u32 %v5322_v41, 16  ;;  %v1082_v21 = vrot.slane %v5322_v41, 1 }
  0x66   :  { %1398 = vrot.lane.b32.xlu0 %v5279_v11, %s4718_s20 }
  0x67   :  { %v728_v60 = vrot.slane %v726_v51, 1  ;;  %v275_v51 = vadd.bf16 %v167_v39, %v59_v38 }
  0x68   :  { %1162 = vrot.lane.b32.xlu1 %v5279_v11, %s4716_s12 }
  0x69   :  { %v729_v5 = vor.u32 %v728_v60, %v724_v59 }
  0x6a   :  { %1566 = vrot.lane.b32.xlu0 %v710_v18, %s4720_s24 }
  0x6c   :  { %1330 = vrot.lane.b32.xlu1 %v710_v18, %s4717_s19 }
  0x6e   :  { %1236 = vrot.lane.b32.xlu0 %v5243_v53, %s4715_s30 }
  0x70   :  { %1400 = vrot.lane.b32.xlu1 %v5306_v29, %s4718_s20 }
  0x72   :  { %1001 = vrot.lane.b32.xlu0 %v698_v32, %s4719_s21  ;;  %v271_v32 = vadd.bf16 %v163_v47, %v55_v43  ;;  %v5403_v43 = vsel %vm1051_vm0, %v1082_v21, %v1083_v22  ;;  %v745_v47 = vrot.slane %v743_v26, 1  ;;  %v1086_v26 = vrot.slane %v5365_v10, 1 }
  0x74   :  { %1568 = vrot.lane.b32.xlu1 %v5319_v40, %s4720_s24  ;;  %v5354_v62 = vcombine.low %v271_v32, %v272_v54  ;;  %v60_v32 = vld [vmem:[%s8395_s0 + $0x98] sm:$0x1] }
  0x75   :  { %v168_v54 = vld [vmem:[%s8396_s1 + $0x98] sm:$0x1] }
  0x76   :  { %1474 = vrot.lane.b32.xlu0 %v5275_v8, %s4714_s25  ;;  %v738_v12 = vshll.u32 %v5354_v62, 16  ;;  %v736_v24 = vshrl.u32 %v5354_v62, 16  ;;  %v276_v59 = vadd.bf16 %v168_v54, %v60_v32 }
  0x78   :  { %1238 = vrot.lane.b32.xlu1 %v5275_v8, %s4715_s30  ;;  %v740_v25 = vrot.slane %v738_v12, 1  ;;  %v4353_v12 = vcombine.low %v276_v59, %v276_v59 }
  0x79   :  { %v1461_v52 = vpop.permute.xlu1 %1460 }
  0x7a   :  { %1164 = vrot.lane.b32.xlu0 %v5306_v29, %s4716_s12  ;;  %v1223_v55 = vpop.permute.xlu0 %1222  ;;  %v741_v45 = vor.u32 %v740_v25, %v736_v24  ;;  %v63_v24 = vld [vmem:[%s8395_s0 + $0xa4] sm:$0x1]  ;;  %v1089_v54 = vrot.slane %v4353_v12, 1 }
  0x7b   :  { %v171_v25 = vld [vmem:[%s8396_s1 + $0xa4] sm:$0x1] }
  0x7c   :  { %1003 = vrot.lane.b32.xlu1 %v710_v18, %s4719_s21  ;;  %v5373_v18 = vsel %vm602_vm1, %v729_v5, %v733_v6  ;;  %v5420_v56 = vsel %vm602_vm1, %v741_v45, %v745_v47  ;;  %v62_v6 = vld [vmem:[%s8395_s0 + $0xa0] sm:$0xf] }
  0x7e   :  { %1332 = vrot.lane.b32.xlu0 %v5319_v40, %s4717_s19  ;;  %v5358_v0 = vpop.permute.xlu1 %1150 }
  0x80   :  { %v1149_v7 = vpop.permute.xlu0 %1148  ;;  %1476 = vrot.lane.b32.xlu1 %v5322_v41, %s4714_s25 }
  0x81   :  { %v1788_v15 = vsel %vm1786_vm3, %v1149_v7, %v1223_v55 }
  0x82   :  { %1402 = vrot.lane.b32.xlu0 %v5361_v2, %s4718_s20  ;;  %v1317_v9 = vpop.permute.xlu1 %1316 }
  0x83   :  { %v1853_v17 = vsel %vm1851_vm4, %v1788_v15, %v1317_v9 }
  0x84   :  { %v1387_v20 = vpop.permute.xlu0 %1386  ;;  %1166 = vrot.lane.b32.xlu1 %v5361_v2, %s4716_s12 }
  0x85   :  { %v1918_v23 = vsel %vm1916_vm5, %v1853_v17, %v1387_v20  ;;  %v2015_v34 = vsel %vm2013_vm6, %v1387_v20, %v1461_v52 }
  0x86   :  { %1570 = vrot.lane.b32.xlu0 %v5373_v18, %s4720_s24  ;;  %2627 = vmatprep.mubr.bf16.mxu1 %v1918_v23  ;;  %v988_v27 = vpop.permute.xlu1 %987  ;;  %v1085_v23 = vrot.slane %v5354_v62, 1 }
  0x87   :  { %v1626_v28 = vsel %vm1624_vm2, %v4819_v33, %v988_v27  ;;  %v166_v33 = vld [vmem:[%s8396_s1 + $0x90] sm:$0xf] }
  0x88   :  { %v1555_v36 = vpop.permute.xlu0 %1554  ;;  %1334 = vrot.lane.b32.xlu1 %v5373_v18, %s4717_s19  ;;  %v1691_v37 = vsel %vm1689_vm7, %v1626_v28, %v1149_v7  ;;  %v274_v50 = vadd.bf16 %v166_v33, %v58_v30  ;;  %v169_v7 = vld [vmem:[%s8396_s1 + $0x9c] sm:$0xf]  ;;  %v755_v30 = vshll.u32 %v4353_v12, 16  ;;  %v5473_v10 = vsel %vm1051_vm0, %v1085_v23, %v1086_v26 }
  0x89   :  { %v2080_v42 = vsel %vm2078_vm8, %v2015_v34, %v1555_v36  ;;  %2628 = vmatmul.mubr.bf16.vlgmr.msra.gmra.mrb[0].mxu1 %v1691_v37  ;;  %v277_v17 = vadd.bf16 %v169_v7, %v61_v63  ;;  %v279_v37 = vadd.bf16 %v171_v25, %v63_v24 }
  0x8a   :  { %1240 = vrot.lane.b32.xlu0 %v5322_v41, %s4715_s30  ;;  %2981 = vmatmul.mubr.bf16.vlgmr.msra.gmra.mrb[0].mxu0 %v2080_v42  ;;  %v1319_v49 = vpop.permute.xlu1 %1318  ;;  %v5426_v58 = vcombine.low %v274_v50, %v275_v51  ;;  %v757_v39 = vrot.slane %v755_v30, 1 }
  0x8b   :  { %4436 = vmatprep.mubr.msk.bf16.mxu0 %vm1624_vm2, %v5001_v4 }
  0x8c   :  { %v1225_v52 = vpop.permute.xlu0 %1224  ;;  %1404 = vrot.lane.b32.xlu1 %v5403_v43, %s4718_s20  ;;  %v750_v15 = vshll.u32 %v5426_v58, 16  ;;  %v748_v27 = vshrl.u32 %v5426_v58, 16  ;;  %v1088_v32 = vrot.slane %v5426_v58, 1 }
  0x8d   :  { %v1790_v55 = vsel %vm1786_vm3, %v5358_v0, %v1225_v52 }
  0x8e   :  { %v1855_v4 = vsel %vm1851_vm4, %v1790_v55, %v1319_v49  ;;  %1005 = vrot.lane.b32.xlu0 %v5319_v40, %s4719_s21  ;;  %v1389_v46 = vpop.permute.xlu1 %1388  ;;  %v752_v28 = vrot.slane %v750_v15, 1 }
  0x8f   :  { %v1921_v57 = vsel %vm1916_vm5, %v1855_v4, %v1389_v46 }
  0x90   :  { %v990_v60 = vpop.permute.xlu0 %989  ;;  %1572 = vrot.lane.b32.xlu1 %v5420_v56, %s4720_s24  ;;  %2637 = vmatprep.mubr.bf16.mxu1 %v1921_v57  ;;  %v753_v33 = vor.u32 %v752_v28, %v748_v27 }
  0x91   :  { %v1628_v61 = vsel %vm1624_vm2, %v4795_v19, %v990_v60  ;;  %v170_v19 = vld [vmem:[%s8396_s1 + $0xa0] sm:$0xf]  ;;  %v64_v60 = vld [vmem:[%s8395_s0 + $0xa8] sm:$0xf] }
  0x92   :  { %1478 = vrot.lane.b32.xlu0 %v5354_v62, %s4714_s25  ;;  %v1694_v40 = vsel %vm1689_vm7, %v1628_v61, %v5358_v0  ;;  %v1557_v5 = vpop.permute.xlu1 %1556  ;;  %v278_v20 = vadd.bf16 %v170_v19, %v62_v6  ;;  %v5486_v50 = vsel %vm602_vm1, %v753_v33, %v757_v39  ;;  %v173_v6 = vld [vmem:[%s8396_s1 + $0xac] sm:$0xf]  ;;  %v5515_v19 = vsel %vm1051_vm0, %v1088_v32, %v1089_v54  ;;  %v68_v33 = vld [vmem:[%s8395_s0 + $0xb8] sm:$0xf]  ;;  %v175_v39 = vld [vmem:[%s8396_s1 + $0xb4] sm:$0xf] }
  0x93   :  { %2638 = vmatmul.mubr.bf16.gmra.mrb[4].mxu1 %v1694_v40  ;;  %v65_v40 = vld [vmem:[%s8395_s0 + $0xac] sm:$0xf] }
  0x94   :  { %v1463_v9 = vpop.permute.xlu0 %1462  ;;  %1242 = vrot.lane.b32.xlu1 %v5354_v62, %s4715_s30  ;;  %v5468_v36 = vcombine.low %v277_v17, %v278_v20  ;;  %v281_v17 = vadd.bf16 %v173_v6, %v65_v40 }
  0x95   :  { %v2017_v0 = vsel %vm2013_vm6, %v1389_v46, %v1463_v9 }
  0x96   :  { %1168 = vrot.lane.b32.xlu0 %v5403_v43, %s4716_s12  ;;  %v2083_v21 = vsel %vm2078_vm8, %v2017_v0, %v1557_v5  ;;  %v1227_v22 = vpop.permute.xlu1 %1226  ;;  %v760_v4 = vshrl.u32 %v5468_v36, 16  ;;  %v172_v5 = vld [vmem:[%s8396_s1 + $0xa8] sm:$0xf]  ;;  %v1091_v54 = vrot.slane %v5468_v36, 1 }
  0x97   :  { %2991 = vmatmul.mubr.bf16.gmra.mrb[4].mxu0 %v2083_v21  ;;  %v280_v0 = vadd.bf16 %v172_v5, %v64_v60  ;;  %v66_v21 = vld [vmem:[%s8395_s0 + $0xb0] sm:$0x1] }
  0x98   :  { %v1153_v34 = vpop.permute.xlu0 %1152  ;;  %1007 = vrot.lane.b32.xlu1 %v5373_v18, %s4719_s21  ;;  %4437 = vmatprep.mubr.msk.bf16.mxu0 %vm1624_vm2, %v5066_v31  ;;  %v5477_v18 = vcombine.low %v279_v37, %v279_v37  ;;  %v762_v31 = vshll.u32 %v5468_v36, 16  ;;  %v67_v37 = vld [vmem:[%s8395_s0 + $0xb4] sm:$0xf] }
  0x99   :  { %v1792_v47 = vsel %vm1786_vm3, %v1153_v34, %v1227_v22  ;;  %v174_v22 = vld [vmem:[%s8396_s1 + $0xb0] sm:$0x1]  ;;  %v5537_v27 = vcombine.low %v280_v0, %v281_v17 }
  0x9a   :  { %1336 = vrot.lane.b32.xlu0 %v5420_v56, %s4717_s19  ;;  %v992_v38 = vpop.permute.xlu1 %991  ;;  %v764_v46 = vrot.slane %v762_v31, 1  ;;  %v767_v57 = vshll.u32 %v5477_v18, 16  ;;  %v282_v28 = vadd.bf16 %v174_v22, %v66_v21 }
  0x9b   :  { %v1630_v49 = vsel %vm1624_vm2, %v4784_v14, %v992_v38  ;;  %v774_v31 = vshll.u32 %v5537_v27, 16  ;;  %v1094_v21 = vrot.slane %v5537_v27, 1 }
  0x9c   :  { %v1321_v42 = vpop.permute.xlu0 %1320  ;;  %1480 = vrot.lane.b32.xlu1 %v5426_v58, %s4714_s25  ;;  %v1697_v14 = vsel %vm1689_vm7, %v1630_v49, %v1153_v34  ;;  %v765_v12 = vor.u32 %v764_v46, %v760_v4  ;;  %v769_v15 = vrot.slane %v767_v57, 1  ;;  %v283_v49 = vadd.bf16 %v175_v39, %v67_v37  ;;  %v177_v4 = vld [vmem:[%s8396_s1 + $0xbc] sm:$0x1]  ;;  %v178_v37 = vld [vmem:[%s8396_s1 + $0xc0] sm:$0xf] }
  0x9d   :  { %v1857_v51 = vsel %vm1851_vm4, %v1792_v47, %v1321_v42  ;;  %v4355_v42 = vcombine.low %v282_v28, %v282_v28  ;;  %v1092_v46 = vrot.slane %v5477_v18, 1  ;;  %v772_v57 = vshrl.u32 %v5537_v27, 16 }
  0x9e   :  { %1406 = vrot.lane.b32.xlu0 %v5473_v10, %s4718_s20  ;;  %v1465_v45 = vpop.permute.xlu1 %1464  ;;  %v5531_v24 = vsel %vm602_vm1, %v765_v12, %v769_v15 }
  0x9f   :  { %v5583_v18 = vsel %vm1051_vm0, %v1091_v54, %v1092_v46  ;;  %v1095_v22 = vrot.slane %v4355_v42, 1 }
  0xa0   :  { %v1391_v52 = vpop.permute.xlu0 %1390  ;;  %1170 = vrot.lane.b32.xlu1 %v5473_v10, %s4716_s12 }
  0xa1   :  { %v1924_v55 = vsel %vm1916_vm5, %v1857_v51, %v1391_v52  ;;  %v2019_v61 = vsel %vm2013_vm6, %v1391_v52, %v1465_v45 }
  0xa2   :  { %1574 = vrot.lane.b32.xlu0 %v5486_v50, %s4720_s24  ;;  %2647 = vmatprep.mubr.bf16.mxu1 %v1924_v55  ;;  %v1155_v59 = vpop.permute.xlu1 %1154  ;;  %v69_v55 = vld [vmem:[%s8395_s0 + $0xbc] sm:$0x1] }
  0xa3   :  { %2648 = vmatmul.mubr.bf16.gmra.mrb[8].mxu1 %v1697_v14  ;;  %v776_v14 = vrot.slane %v774_v31, 1 }
  0xa4   :  { %v1559_v63 = vpop.permute.xlu0 %1558  ;;  %1338 = vrot.lane.b32.xlu1 %v5486_v50, %s4717_s19 }
  0xa5   :  { %v2086_v7 = vsel %vm2078_vm8, %v2019_v61, %v1559_v63  ;;  %v285_v63 = vadd.bf16 %v177_v4, %v69_v55  ;;  %v777_v5 = vor.u32 %v776_v14, %v772_v57 }
  0xa6   :  { %1244 = vrot.lane.b32.xlu0 %v5426_v58, %s4715_s30  ;;  %3001 = vmatmul.mubr.bf16.gmra.mrb[8].mxu0 %v2086_v7  ;;  %v1323_v9 = vpop.permute.xlu1 %1322 }
  0xa7   :  { %4438 = vmatprep.mubr.msk.bf16.mxu0 %vm1624_vm2, %v5179_v13 }
  0xa8   :  { %v1229_v20 = vpop.permute.xlu0 %1228  ;;  %1408 = vrot.lane.b32.xlu1 %v5515_v19, %s4718_s20 }
  0xa9   :  { %v1794_v23 = vsel %vm1786_vm3, %v1155_v59, %v1229_v20 }
  0xaa   :  { %v1859_v13 = vsel %vm1851_vm4, %v1794_v23, %v1323_v9  ;;  %1009 = vrot.lane.b32.xlu0 %v5420_v56, %s4719_s21  ;;  %v1393_v25 = vpop.permute.xlu1 %1392 }
  0xab   :  { %v1927_v26 = vsel %vm1916_vm5, %v1859_v13, %v1393_v25 }
  0xac   :  { %v994_v30 = vpop.permute.xlu0 %993  ;;  %1576 = vrot.lane.b32.xlu1 %v5531_v24, %s4720_s24  ;;  %2657 = vmatprep.mubr.bf16.mxu1 %v1927_v26 }
  0xad   :  { %v1632_v34 = vsel %vm1624_vm2, %v4850_v3, %v994_v30  ;;  %v176_v3 = vld [vmem:[%s8396_s1 + $0xb8] sm:$0xf]  ;;  %v70_v30 = vld [vmem:[%s8395_s0 + $0xc0] sm:$0xf] }
  0xae   :  { %1482 = vrot.lane.b32.xlu0 %v5468_v36, %s4714_s25  ;;  %v1700_v56 = vsel %vm1689_vm7, %v1632_v34, %v1155_v59  ;;  %v1561_v38 = vpop.permute.xlu1 %1560  ;;  %v284_v51 = vadd.bf16 %v176_v3, %v68_v33  ;;  %v779_v59 = vshll.u32 %v4355_v42, 16  ;;  %v71_v34 = vld [vmem:[%s8395_s0 + $0xc4] sm:$0xf]  ;;  %v5625_v3 = vsel %vm1051_vm0, %v1094_v21, %v1095_v22 }
  0xaf   :  { %2658 = vmatmul.mubr.bf16.gmra.mrb[12].mxu1 %v1700_v56  ;;  %v179_v56 = vld [vmem:[%s8396_s1 + $0xc4] sm:$0xf] }
  0xb0   :  { %v1467_v45 = vpop.permute.xlu0 %1466  ;;  %1246 = vrot.lane.b32.xlu1 %v5468_v36, %s4715_s30  ;;  %v5578_v61 = vcombine.low %v283_v49, %v284_v51  ;;  %v781_v6 = vrot.slane %v779_v59, 1  ;;  %v287_v49 = vadd.bf16 %v179_v56, %v71_v34  ;;  %v72_v51 = vld [vmem:[%s8395_s0 + $0xc8] sm:$0x1]  ;;  %v73_v59 = vld [vmem:[%s8395_s0 + $0xcc] sm:$0xf] }
  0xb1   :  { %v2021_v47 = vsel %vm2013_vm6, %v1393_v25, %v1467_v45 }
  0xb2   :  { %1172 = vrot.lane.b32.xlu0 %v5515_v19, %s4716_s12  ;;  %v2089_v52 = vsel %vm2078_vm8, %v2021_v47, %v1561_v38  ;;  %v1231_v32 = vpop.permute.xlu1 %1230  ;;  %v5596_v0 = vsel %vm602_vm1, %v777_v5, %v781_v6  ;;  %v784_v13 = vshrl.u32 %v5578_v61, 16  ;;  %v286_v47 = vadd.bf16 %v178_v37, %v70_v30 }
  0xb3   :  { %3011 = vmatmul.mubr.bf16.gmra.mrb[12].mxu0 %v2089_v52  ;;  %v180_v52 = vld [vmem:[%s8396_s1 + $0xc8] sm:$0x1] }
  0xb4   :  { %v1157_v60 = vpop.permute.xlu0 %1156  ;;  %1011 = vrot.lane.b32.xlu1 %v5486_v50, %s4719_s21  ;;  %4439 = vmatprep.mubr.msk.bf16.mxu0 %vm1624_vm2, %v5228_v44  ;;  %v5587_v50 = vcombine.low %v285_v63, %v285_v63  ;;  %v786_v44 = vshll.u32 %v5578_v61, 16  ;;  %v288_v4 = vadd.bf16 %v180_v52, %v72_v51  ;;  %v5646_v14 = vcombine.low %v286_v47, %v287_v49  ;;  %v74_v63 = vld [vmem:[%s8395_s0 + $0xd0] sm:$0xf]  ;;  %v79_v47 = vld [vmem:[%s8395_s0 + $0xe4] sm:$0xf] }
  0xb5   :  { %v1796_v15 = vsel %vm1786_vm3, %v1157_v60, %v1231_v32  ;;  %v80_v51 = vld [vmem:[%s8395_s0 + $0xe8] sm:$0xf]  ;;  %v187_v52 = vld [vmem:[%s8396_s1 + $0xe4] sm:$0xf] }
  0xb6   :  { %1340 = vrot.lane.b32.xlu0 %v5531_v24, %s4717_s19  ;;  %v996_v40 = vpop.permute.xlu1 %995  ;;  %v788_v25 = vrot.slane %v786_v44, 1  ;;  %v791_v26 = vshll.u32 %v5587_v50, 16  ;;  %v5665_v6 = vcombine.low %v288_v4, %v288_v4  ;;  %v1098_v30 = vrot.slane %v5587_v50, 1 }
  0xb7   :  { %v1634_v9 = vsel %vm1624_vm2, %v4918_v35, %v996_v40  ;;  %v182_v40 = vld [vmem:[%s8396_s1 + $0xd0] sm:$0xf] }
  0xb8   :  { %v1325_v7 = vpop.permute.xlu0 %1324  ;;  %1484 = vrot.lane.b32.xlu1 %v5537_v27, %s4714_s25  ;;  %v1703_v35 = vsel %vm1689_vm7, %v1634_v9, %v1157_v60  ;;  %v789_v42 = vor.u32 %v788_v25, %v784_v13  ;;  %v793_v31 = vrot.slane %v791_v26, 1  ;;  %v290_v9 = vadd.bf16 %v182_v40, %v74_v63 }
  0xb9   :  { %v1861_v17 = vsel %vm1851_vm4, %v1796_v15, %v1325_v7  ;;  %v1300_v22 = vshll.u32 %v5665_v6, 16  ;;  %v1293_v25 = vshrl.u32 %v5646_v14, 16  ;;  %v295_v40 = vadd.bf16 %v187_v52, %v79_v47 }
  0xba   :  { %1410 = vrot.lane.b32.xlu0 %v5583_v18, %s4718_s20  ;;  %v1469_v12 = vpop.permute.xlu1 %1468  ;;  %v5641_v55 = vsel %vm602_vm1, %v789_v42, %v793_v31  ;;  %v77_v42 = vld [vmem:[%s8395_s0 + $0xdc] sm:$0xf] }
  0xbb   :  { %v1302_v56 = vrot.slane %v1300_v22, 1 }
  0xbc   :  { %v1395_v20 = vpop.permute.xlu0 %1394  ;;  %1174 = vrot.lane.b32.xlu1 %v5583_v18, %s4716_s12 }
  0xbd   :  { %v1930_v23 = vsel %vm1916_vm5, %v1861_v17, %v1395_v20  ;;  %v2023_v38 = vsel %vm2013_vm6, %v1395_v20, %v1469_v12  ;;  %v1295_v12 = vshll.u32 %v5646_v14, 16  ;;  %v75_v17 = vld [vmem:[%s8395_s0 + $0xd4] sm:$0x1] }
  0xbe   :  { %1578 = vrot.lane.b32.xlu0 %v5596_v0, %s4720_s24  ;;  %2667 = vmatprep.mubr.bf16.mxu1 %v1930_v23  ;;  %v1159_v28 = vpop.permute.xlu1 %1158 }
  0xbf   :  { %2668 = vmatmul.mubr.bf16.gmra.mrb[16].mxu1 %v1703_v35  ;;  %v1297_v26 = vrot.slane %v1295_v12, 1 }
  0xc0   :  { %v1563_v33 = vpop.permute.xlu0 %1562  ;;  %1342 = vrot.lane.b32.xlu1 %v5596_v0, %s4717_s19 }
  0xc1   :  { %v2092_v39 = vsel %vm2078_vm8, %v2023_v38, %v1563_v33  ;;  %v76_v38 = vld [vmem:[%s8395_s0 + $0xd8] sm:$0xf] }
  0xc2   :  { %1248 = vrot.lane.b32.xlu0 %v5537_v27, %s4715_s30  ;;  %3021 = vmatmul.mubr.bf16.gmra.mrb[16].mxu0 %v2092_v39  ;;  %v1327_v45 = vpop.permute.xlu1 %1326  ;;  %v1298_v39 = vor.u32 %v1297_v26, %v1293_v25 }
  0xc3   :  { %4440 = vmatprep.mubr.msk.bf16.mxu0 %vm1624_vm2, %v5279_v11 }
  0xc4   :  { %v1233_v32 = vpop.permute.xlu0 %1232  ;;  %1412 = vrot.lane.b32.xlu1 %v5625_v3, %s4718_s20 }
  0xc5   :  { %v1798_v54 = vsel %vm1786_vm3, %v1159_v28, %v1233_v32  ;;  %v188_v32 = vld [vmem:[%s8396_s1 + $0xe8] sm:$0xf] }
  0xc6   :  { %v1863_v46 = vsel %vm1851_vm4, %v1798_v54, %v1327_v45  ;;  %1013 = vrot.lane.b32.xlu0 %v5531_v24, %s4719_s21  ;;  %v1397_v57 = vpop.permute.xlu1 %1396  ;;  %v181_v24 = vld [vmem:[%s8396_s1 + $0xcc] sm:$0xf] }
  0xc7   :  { %v1933_v11 = vsel %vm1916_vm5, %v1863_v46, %v1397_v57  ;;  %v289_v15 = vadd.bf16 %v181_v24, %v73_v59  ;;  %v78_v59 = vld [vmem:[%s8395_s0 + $0xe0] sm:$0x1] }
  0xc8   :  { %v998_v60 = vpop.permute.xlu0 %997  ;;  %1580 = vrot.lane.b32.xlu1 %v5641_v55, %s4720_s24  ;;  %2677 = vmatprep.mubr.bf16.mxu1 %v1933_v11  ;;  %v186_v24 = vld [vmem:[%s8396_s1 + $0xe0] sm:$0x1] }
  0xc9   :  { %v1636_v5 = vsel %vm1624_vm2, %v4991_v1, %v998_v60  ;;  %v183_v1 = vld [vmem:[%s8396_s1 + $0xd4] sm:$0x1]  ;;  %v5687_v34 = vcombine.low %v289_v15, %v290_v9 }
  0xca   :  { %1486 = vrot.lane.b32.xlu0 %v5578_v61, %s4714_s25  ;;  %v1706_v7 = vsel %vm1689_vm7, %v1636_v5, %v1159_v28  ;;  %v1565_v44 = vpop.permute.xlu1 %1564  ;;  %v291_v35 = vadd.bf16 %v183_v1, %v75_v17  ;;  %v1097_v28 = vrot.slane %v5578_v61, 1  ;;  %v296_v5 = vadd.bf16 %v188_v32, %v80_v51 }
  0xcb   :  { %2678 = vmatmul.mubr.bf16.gmra.mrb[20].mxu1 %v1706_v7  ;;  %v1533_v45 = vshll.u32 %v5687_v34, 16  ;;  %v81_v7 = vld [vmem:[%s8395_s0 + $0xec] sm:$0x1]  ;;  %v1380_v1 = vrot.slane %v5646_v14, 1 }
  0xcc   :  { %v1471_v20 = vpop.permute.xlu0 %1470  ;;  %1250 = vrot.lane.b32.xlu1 %v5578_v61, %s4715_s30  ;;  %v5698_v50 = vcombine.low %v291_v35, %v291_v35  ;;  %v5710_v31 = vsel %vm1051_vm0, %v1097_v28, %v1098_v30  ;;  %v5757_v35 = vcombine.low %v295_v40, %v296_v5  ;;  %v82_v28 = vld [vmem:[%s8395_s0 + $0xf0] sm:$0xf] }
  0xcd   :  { %v2025_v21 = vsel %vm2013_vm6, %v1397_v57, %v1471_v20  ;;  %v1303_v57 = vsel %vm602_vm1, %v1298_v39, %v1302_v56  ;;  %v1535_v9 = vrot.slane %v1533_v45, 1  ;;  %v1381_v20 = vrot.slane %v5665_v6, 1 }
  0xce   :  { %1176 = vrot.lane.b32.xlu0 %v5625_v3, %s4716_s12  ;;  %v2095_v23 = vsel %vm2078_vm8, %v2025_v21, %v1565_v44  ;;  %v1235_v13 = vpop.permute.xlu1 %1234  ;;  %v1538_v11 = vshll.u32 %v5698_v50, 16  ;;  %v189_v44 = vld [vmem:[%s8396_s1 + $0xec] sm:$0x1]  ;;  %v808_v40 = vshrl.u32 %v5757_v35, 16 }
  0xcf   :  { %3031 = vmatmul.mubr.bf16.gmra.mrb[20].mxu0 %v2095_v23  ;;  %v297_v25 = vadd.bf16 %v189_v44, %v81_v7 }
  0xd0   :  { %v1161_v37 = vpop.permute.xlu0 %1160  ;;  %1015 = vrot.lane.b32.xlu1 %v5596_v0, %s4719_s21  ;;  %4441 = vmatprep.mubr.msk.bf16.mxu0 %vm1624_vm2, %v5306_v29  ;;  %v184_v29 = vld [vmem:[%s8396_s1 + $0xd8] sm:$0xf]  ;;  %v185_v0 = vld [vmem:[%s8396_s1 + $0xdc] sm:$0xf]  ;;  %v1540_v26 = vrot.slane %v1538_v11, 1 }
  0xd1   :  { %v292_v54 = vadd.bf16 %v184_v29, %v76_v38  ;;  %v293_v4 = vadd.bf16 %v185_v0, %v77_v42  ;;  %v1800_v60 = vsel %vm1786_vm3, %v1161_v37, %v1235_v13  ;;  %v294_v13 = vadd.bf16 %v186_v24, %v78_v59  ;;  %v190_v38 = vld [vmem:[%s8396_s1 + $0xf0] sm:$0xf] }
  0xd2   :  { %1344 = vrot.lane.b32.xlu0 %v5641_v55, %s4717_s19  ;;  %v1000_v33 = vpop.permute.xlu1 %999  ;;  %v5775_v42 = vsel %vm1051_vm0, %v1380_v1, %v1381_v20  ;;  %v5780_v47 = vcombine.low %v297_v25, %v297_v25  ;;  %v298_v51 = vadd.bf16 %v190_v38, %v82_v28  ;;  %v85_v1 = vld [vmem:[%s8395_s0 + $0xfc] sm:$0xf]  ;;  %v86_v25 = vld [vmem:[%s8395_s0 + $0x100] sm:$0xf] }
  0xd3   :  { %v1638_v63 = vsel %vm1624_vm2, %v5101_v48, %v1000_v33  ;;  %v1531_v48 = vshrl.u32 %v5687_v34, 16  ;;  %v5753_v21 = vcombine.low %v292_v54, %v293_v4  ;;  %v191_v33 = vld [vmem:[%s8396_s1 + $0xf4] sm:$0xf]  ;;  %v4357_v45 = vcombine.low %v294_v13, %v294_v13  ;;  %v84_v4 = vld [vmem:[%s8395_s0 + $0xf8] sm:$0x1] }
  0xd4   :  { %v1329_v49 = vpop.permute.xlu0 %1328  ;;  %1488 = vrot.lane.b32.xlu1 %v5646_v14, %s4714_s25  ;;  %v1709_v22 = vsel %vm1689_vm7, %v1638_v63, %v1161_v37  ;;  %v83_v37 = vld [vmem:[%s8395_s0 + $0xf4] sm:$0xf]  ;;  %v815_v5 = vshll.u32 %v5780_v47, 16 }
  0xd5   :  { %v1865_v12 = vsel %vm1851_vm4, %v1800_v60, %v1329_v49  ;;  %v1536_v56 = vor.u32 %v1535_v9, %v1531_v48  ;;  %v798_v29 = vshll.u32 %v5753_v21, 16  ;;  %v810_v49 = vshll.u32 %v5757_v35, 16 }
  0xd6   :  { %1414 = vrot.lane.b32.xlu0 %v5710_v31, %s4718_s20  ;;  %v1473_v46 = vpop.permute.xlu1 %1472  ;;  %v299_v52 = vadd.bf16 %v191_v33, %v83_v37  ;;  %v803_v59 = vshll.u32 %v4357_v45, 16  ;;  %v1101_v24 = vrot.slane %v4357_v45, 1  ;;  %v1103_v45 = vrot.slane %v5757_v35, 1 }
  0xd7   :  { %v1541_v54 = vsel %vm602_vm1, %v1536_v56, %v1540_v26  ;;  %v800_v11 = vrot.slane %v798_v29, 1  ;;  %v812_v44 = vrot.slane %v810_v49, 1  ;;  %v194_v26 = vld [vmem:[%s8396_s1 + $0x100] sm:$0xf]  ;;  %v1104_v49 = vrot.slane %v5780_v47, 1 }
  0xd8   :  { %v1399_v15 = vpop.permute.xlu0 %1398  ;;  %1178 = vrot.lane.b32.xlu1 %v5710_v31, %s4716_s12 }
  0xd9   :  { %v1936_v17 = vsel %vm1916_vm5, %v1865_v12, %v1399_v15  ;;  %v2027_v6 = vsel %vm2013_vm6, %v1399_v15, %v1473_v46  ;;  %v5803_v12 = vcombine.low %v298_v51, %v299_v52  ;;  %v813_v28 = vor.u32 %v812_v44, %v808_v40  ;;  %v87_v51 = vld [vmem:[%s8395_s0 + $0x104] sm:$0x1] }
  0xda   :  { %1582 = vrot.lane.b32.xlu0 %v1303_v57, %s4720_s24  ;;  %2687 = vmatprep.mubr.bf16.mxu1 %v1936_v17  ;;  %v1163_v23 = vpop.permute.xlu1 %1162  ;;  %v805_v17 = vrot.slane %v803_v59, 1  ;;  %v195_v52 = vld [vmem:[%s8396_s1 + $0x104] sm:$0x1] }
  0xdb   :  { %2688 = vmatmul.mubr.bf16.gmra.mrb[24].mxu1 %v1709_v22 }
  0xdc   :  { %v1567_v30 = vpop.permute.xlu0 %1566  ;;  %1346 = vrot.lane.b32.xlu1 %v1303_v57, %s4717_s19  ;;  %v796_v57 = vshrl.u32 %v5753_v21, 16 }
  0xdd   :  { %v2098_v39 = vsel %vm2078_vm8, %v2027_v6, %v1567_v30  ;;  %v817_v6 = vrot.slane %v815_v5, 1 }
  0xde   :  { %1252 = vrot.lane.b32.xlu0 %v5646_v14, %s4715_s30  ;;  %3041 = vmatmul.mubr.bf16.gmra.mrb[24].mxu0 %v2098_v39  ;;  %v1331_v0 = vpop.permute.xlu1 %1330  ;;  %v1100_v14 = vrot.slane %v5753_v21, 1  ;;  %v302_v39 = vadd.bf16 %v194_v26, %v86_v25  ;;  %v88_v25 = vld [vmem:[%s8395_s0 + $0x108] sm:$0xf] }
  0xdf   :  { %4442 = vmatprep.mubr.msk.bf16.mxu0 %vm1624_vm2, %v5361_v2  ;;  %v192_v2 = vld [vmem:[%s8396_s1 + $0xf8] sm:$0x1] }
  0xe0   :  { %v1237_v32 = vpop.permute.xlu0 %1236  ;;  %1416 = vrot.lane.b32.xlu1 %v5775_v42, %s4718_s20  ;;  %v300_v15 = vadd.bf16 %v192_v2, %v84_v4  ;;  %v1102_v13 = vsel %vm1051_vm0, %v1100_v14, %v1101_v24 }
  0xe1   :  { %v1802_v46 = vsel %vm1786_vm3, %v1163_v23, %v1237_v32  ;;  %v818_v32 = vsel %vm602_vm1, %v813_v28, %v817_v6  ;;  %v89_v28 = vld [vmem:[%s8395_s0 + $0x10c] sm:$0xf]  ;;  %v196_v6 = vld [vmem:[%s8396_s1 + $0x108] sm:$0xf] }
  0xe2   :  { %v1867_v60 = vsel %vm1851_vm4, %v1802_v46, %v1331_v0  ;;  %1017 = vrot.lane.b32.xlu0 %v5641_v55, %s4719_s21  ;;  %v1401_v63 = vpop.permute.xlu1 %1400  ;;  %v801_v55 = vor.u32 %v800_v11, %v796_v57  ;;  %v5824_v30 = vcombine.low %v300_v15, %v300_v15  ;;  %v303_v46 = vadd.bf16 %v195_v52, %v87_v51 }
  0xe3   :  { %v1939_v7 = vsel %vm1916_vm5, %v1867_v60, %v1401_v63  ;;  %v1105_v11 = vsel %vm1051_vm0, %v1103_v45, %v1104_v49  ;;  %v90_v45 = vld [vmem:[%s8395_s0 + $0x110] sm:$0x1] }
  0xe4   :  { %v1002_v48 = vpop.permute.xlu0 %1001  ;;  %1584 = vrot.lane.b32.xlu1 %v1541_v54, %s4720_s24  ;;  %2697 = vmatprep.mubr.bf16.mxu1 %v1939_v7  ;;  %v806_v38 = vsel %vm602_vm1, %v801_v55, %v805_v17  ;;  %v820_v54 = vshrl.u32 %v5803_v12, 16  ;;  %v827_v4 = vshll.u32 %v5824_v30, 16  ;;  %v5853_v24 = vcombine.low %v303_v46, %v303_v46  ;;  %v198_v49 = vld [vmem:[%s8396_s1 + $0x110] sm:$0x1] }
  0xe5   :  { %v1640_v9 = vsel %vm1624_vm2, %v5168_v16, %v1002_v48  ;;  %v193_v16 = vld [vmem:[%s8396_s1 + $0xfc] sm:$0xf]  ;;  %v1107_v55 = vrot.slane %v5824_v30, 1  ;;  %v197_v30 = vld [vmem:[%s8396_s1 + $0x10c] sm:$0xf] }
  0xe6   :  { %1490 = vrot.lane.b32.xlu0 %v5687_v34, %s4714_s25  ;;  %v1712_v20 = vsel %vm1689_vm7, %v1640_v9, %v1163_v23  ;;  %v1569_v22 = vpop.permute.xlu1 %1568  ;;  %v822_v23 = vshll.u32 %v5803_v12, 16  ;;  %v301_v33 = vadd.bf16 %v193_v16, %v85_v1  ;;  %v829_v60 = vrot.slane %v827_v4, 1 }
  0xe7   :  { %2698 = vmatmul.mubr.bf16.gmra.mrb[28].mxu1 %v1712_v20  ;;  %v1106_v9 = vrot.slane %v5803_v12, 1 }
  0xe8   :  { %v1475_v56 = vpop.permute.xlu0 %1474  ;;  %1254 = vrot.lane.b32.xlu1 %v5757_v35, %s4715_s30  ;;  %v824_v14 = vrot.slane %v822_v23, 1  ;;  %v5847_v47 = vcombine.low %v301_v33, %v302_v39  ;;  %v304_v39 = vadd.bf16 %v196_v6, %v88_v25 }
  0xe9   :  { %v2029_v37 = vsel %vm2013_vm6, %v1401_v63, %v1475_v56  ;;  %v5890_v56 = vsel %vm1051_vm0, %v1106_v9, %v1107_v55 }
  0xea   :  { %1180 = vrot.lane.b32.xlu0 %v1102_v13, %s4716_s12  ;;  %v2101_v29 = vsel %vm2078_vm8, %v2029_v37, %v1569_v22  ;;  %v1239_v0 = vpop.permute.xlu1 %1238  ;;  %v825_v59 = vor.u32 %v824_v14, %v820_v54  ;;  %v834_v40 = vshll.u32 %v5847_v47, 16  ;;  %v832_v1 = vshrl.u32 %v5847_v47, 16 }
  0xeb   :  { %3051 = vmatmul.mubr.bf16.gmra.mrb[28].mxu0 %v2101_v29  ;;  %v839_v22 = vshll.u32 %v5853_v24, 16  ;;  %v305_v29 = vadd.bf16 %v197_v30, %v89_v28 }
  0xec   :  { %v1165_v2 = vpop.permute.xlu0 %1164  ;;  %1019 = vrot.lane.b32.xlu1 %v806_v38, %s4719_s21  ;;  %4443 = vmatprep.mubr.msk.bf16.mxu0 %vm1624_vm2, %v5403_v43  ;;  %v5861_v44 = vsel %vm602_vm1, %v825_v59, %v829_v60  ;;  %v836_v20 = vrot.slane %v834_v40, 1  ;;  %v92_v60 = vld [vmem:[%s8395_s0 + $0x118] sm:$0xf] }
  0xed   :  { %v1804_v5 = vsel %vm1786_vm3, %v1165_v2, %v1239_v0  ;;  %v841_v38 = vrot.slane %v839_v22, 1  ;;  %v5911_v4 = vcombine.low %v304_v39, %v305_v29  ;;  %v1110_v22 = vrot.slane %v5853_v24, 1 }
  0xee   :  { %1348 = vrot.lane.b32.xlu0 %v818_v32, %s4717_s19  ;;  %v1004_v57 = vpop.permute.xlu1 %1003  ;;  %v837_v37 = vor.u32 %v836_v20, %v832_v1  ;;  %v93_v1 = vld [vmem:[%s8395_s0 + $0x11c] sm:$0x1] }
  0xef   :  { %v1642_v7 = vsel %vm1624_vm2, %v5243_v53, %v1004_v57  ;;  %v201_v20 = vld [vmem:[%s8396_s1 + $0x11c] sm:$0x1] }
  0xf0   :  { %v1333_v63 = vpop.permute.xlu0 %1332  ;;  %1492 = vrot.lane.b32.xlu1 %v5803_v12, %s4714_s25  ;;  %v1715_v53 = vsel %vm1689_vm7, %v1642_v7, %v1165_v2  ;;  %v5906_v52 = vsel %vm602_vm1, %v837_v37, %v841_v38  ;;  %v306_v2 = vadd.bf16 %v198_v49, %v90_v45  ;;  %v309_v28 = vadd.bf16 %v201_v20, %v93_v1 }
  0xf1   :  { %v1869_v15 = vsel %vm1851_vm4, %v1804_v5, %v1333_v63  ;;  %v199_v63 = vld [vmem:[%s8396_s1 + $0x114] sm:$0xf]  ;;  %v1112_v49 = vrot.slane %v5911_v4, 1 }
  0xf2   :  { %1418 = vrot.lane.b32.xlu0 %v1105_v11, %s4718_s20  ;;  %v1477_v43 = vpop.permute.xlu1 %1476  ;;  %v4361_v40 = vcombine.low %v306_v2, %v306_v2 }
  0xf4   :  { %v1403_v48 = vpop.permute.xlu0 %1402  ;;  %1182 = vrot.lane.b32.xlu1 %v1105_v11, %s4716_s12  ;;  %v91_v11 = vld [vmem:[%s8395_s0 + $0x114] sm:$0xf]  ;;  %v851_v25 = vshll.u32 %v4361_v40, 16 }
  0xf5   :  { %v1942_v17 = vsel %vm1916_vm5, %v1869_v15, %v1403_v48  ;;  %v2031_v16 = vsel %vm2013_vm6, %v1403_v48, %v1477_v43  ;;  %v846_v43 = vshll.u32 %v5911_v4, 16  ;;  %v307_v15 = vadd.bf16 %v199_v63, %v91_v11  ;;  %v203_v63 = vld [vmem:[%s8396_s1 + $0x124] sm:$0xf] }
  0xf6   :  { %1586 = vrot.lane.b32.xlu0 %v5861_v44, %s4720_s24  ;;  %2707 = vmatprep.mubr.bf16.mxu1 %v1942_v17  ;;  %v1167_v13 = vpop.permute.xlu1 %1166  ;;  %v1109_v17 = vrot.slane %v5847_v47, 1 }
  0xf7   :  { %2708 = vmatmul.mubr.bf16.gmra.mrb[32].mxu1 %v1715_v53  ;;  %v844_v53 = vshrl.u32 %v5911_v4, 16 }
  0xf8   :  { %v1571_v26 = vpop.permute.xlu0 %1570  ;;  %1350 = vrot.lane.b32.xlu1 %v5861_v44, %s4717_s19  ;;  %v5957_v24 = vsel %vm1051_vm0, %v1109_v17, %v1110_v22  ;;  %v204_v17 = vld [vmem:[%s8396_s1 + $0x128] sm:$0x1] }
  0xf9   :  { %v2104_v23 = vsel %vm2078_vm8, %v2031_v16, %v1571_v26 }
  0xfa   :  { %1256 = vrot.lane.b32.xlu0 %v5803_v12, %s4715_s30  ;;  %3061 = vmatmul.mubr.bf16.gmra.mrb[32].mxu0 %v2104_v23  ;;  %v1335_v33 = vpop.permute.xlu1 %1334  ;;  %v853_v23 = vrot.slane %v851_v25, 1 }
  0xfb   :  { %4444 = vmatprep.mubr.msk.bf16.mxu0 %vm1624_vm2, %v5473_v10 }
  0xfc   :  { %v1241_v0 = vpop.permute.xlu0 %1240  ;;  %1420 = vrot.lane.b32.xlu1 %v5890_v56, %s4718_s20 }
  0xfd   :  { %v1806_v51 = vsel %vm1786_vm3, %v1167_v13, %v1241_v0 }
  0xfe   :  { %v1871_v10 = vsel %vm1851_vm4, %v1806_v51, %v1335_v33  ;;  %1021 = vrot.lane.b32.xlu0 %v818_v32, %s4719_s21  ;;  %v1405_v54 = vpop.permute.xlu1 %1404  ;;  %v1113_v51 = vrot.slane %v4361_v40, 1 }
  0xff   :  { %v1945_v14 = vsel %vm1916_vm5, %v1871_v10, %v1405_v54 }
 0x100   :  { %v1006_v46 = vpop.permute.xlu0 %1005  ;;  %1588 = vrot.lane.b32.xlu1 %v5906_v52, %s4720_s24  ;;  %2717 = vmatprep.mubr.bf16.mxu1 %v1945_v14  ;;  %v5999_v40 = vsel %vm1051_vm0, %v1112_v49, %v1113_v51 }
 0x101   :  { %v1644_v57 = vsel %vm1624_vm2, %v5275_v8, %v1006_v46  ;;  %v200_v8 = vld [vmem:[%s8396_s1 + $0x118] sm:$0xf] }
 0x102   :  { %1494 = vrot.lane.b32.xlu0 %v5847_v47, %s4714_s25  ;;  %v1718_v32 = vsel %vm1689_vm7, %v1644_v57, %v1167_v13  ;;  %v1573_v59 = vpop.permute.xlu1 %1572  ;;  %v308_v48 = vadd.bf16 %v200_v8, %v92_v60  ;;  %v848_v13 = vrot.slane %v846_v43, 1  ;;  %v94_v57 = vld [vmem:[%s8395_s0 + $0x120] sm:$0xf] }
 0x103   :  { %2718 = vmatmul.mubr.bf16.gmra.mrb[36].mxu1 %v1718_v32  ;;  %v202_v60 = vld [vmem:[%s8396_s1 + $0x120] sm:$0xf] }
 0x104   :  { %v1479_v5 = vpop.permute.xlu0 %1478  ;;  %1258 = vrot.lane.b32.xlu1 %v5847_v47, %s4715_s30  ;;  %v5952_v26 = vcombine.low %v307_v15, %v308_v48  ;;  %v849_v30 = vor.u32 %v848_v13, %v844_v53  ;;  %v310_v15 = vadd.bf16 %v202_v60, %v94_v57 }
 0x105   :  { %v2033_v7 = vsel %vm2013_vm6, %v1405_v54, %v1479_v5 }
 0x106   :  { %1184 = vrot.lane.b32.xlu0 %v5890_v56, %s4716_s12  ;;  %v2107_v9 = vsel %vm2078_vm8, %v2033_v7, %v1573_v59  ;;  %v1243_v55 = vpop.permute.xlu1 %1242  ;;  %v5970_v29 = vsel %vm602_vm1, %v849_v30, %v853_v23  ;;  %v856_v54 = vshrl.u32 %v5952_v26, 16  ;;  %v95_v59 = vld [vmem:[%s8395_s0 + $0x124] sm:$0xf]  ;;  %v98_v23 = vld [vmem:[%s8395_s0 + $0x130] sm:$0xf] }
 0x107   :  { %3071 = vmatmul.mubr.bf16.gmra.mrb[36].mxu0 %v2107_v9  ;;  %v311_v48 = vadd.bf16 %v203_v63, %v95_v59 }
 0x108   :  { %v1169_v16 = vpop.permute.xlu0 %1168  ;;  %1023 = vrot.lane.b32.xlu1 %v5861_v44, %s4719_s21  ;;  %4445 = vmatprep.mubr.msk.bf16.mxu0 %vm1624_vm2, %v5515_v19  ;;  %v5961_v44 = vcombine.low %v309_v28, %v309_v28  ;;  %v858_v19 = vshll.u32 %v5952_v26, 16 }
 0x109   :  { %v1808_v33 = vsel %vm1786_vm3, %v1169_v16, %v1243_v55  ;;  %v96_v55 = vld [vmem:[%s8395_s0 + $0x128] sm:$0x1]  ;;  %v6021_v13 = vcombine.low %v310_v15, %v311_v48 }
 0x10a   :  { %1352 = vrot.lane.b32.xlu0 %v5906_v52, %s4717_s19  ;;  %v1008_v6 = vpop.permute.xlu1 %1007  ;;  %v860_v14 = vrot.slane %v858_v19, 1  ;;  %v863_v2 = vshll.u32 %v5961_v44, 16  ;;  %v312_v25 = vadd.bf16 %v204_v17, %v96_v55 }
 0x10b   :  { %v1646_v39 = vsel %vm1624_vm2, %v5322_v41, %v1008_v6  ;;  %v97_v6 = vld [vmem:[%s8395_s0 + $0x12c] sm:$0xf]  ;;  %v1118_v17 = vrot.slane %v6021_v13, 1 }
 0x10c   :  { %v1337_v37 = vpop.permute.xlu0 %1336  ;;  %1496 = vrot.lane.b32.xlu1 %v5911_v4, %s4714_s25  ;;  %v1721_v41 = vsel %vm1689_vm7, %v1646_v39, %v1169_v16  ;;  %v861_v43 = vor.u32 %v860_v14, %v856_v54  ;;  %v865_v5 = vrot.slane %v863_v2, 1  ;;  %v4363_v19 = vcombine.low %v312_v25, %v312_v25  ;;  %v99_v54 = vld [vmem:[%s8395_s0 + $0x134] sm:$0x1] }
 0x10d   :  { %v1873_v0 = vsel %vm1851_vm4, %v1808_v33, %v1337_v37  ;;  %v205_v37 = vld [vmem:[%s8396_s1 + $0x12c] sm:$0xf]  ;;  %v207_v14 = vld [vmem:[%s8396_s1 + $0x134] sm:$0x1]  ;;  %v1116_v2 = vrot.slane %v5961_v44, 1 }
 0x10e   :  { %1422 = vrot.lane.b32.xlu0 %v5957_v24, %s4718_s20  ;;  %v1481_v38 = vpop.permute.xlu1 %1480  ;;  %v6015_v20 = vsel %vm602_vm1, %v861_v43, %v865_v5  ;;  %v875_v57 = vshll.u32 %v4363_v19, 16  ;;  %v315_v59 = vadd.bf16 %v207_v14, %v99_v54 }
 0x110   :  { %v1407_v45 = vpop.permute.xlu0 %1406  ;;  %1186 = vrot.lane.b32.xlu1 %v5957_v24, %s4716_s12 }
 0x111   :  { %v1948_v10 = vsel %vm1916_vm5, %v1873_v0, %v1407_v45  ;;  %v2035_v11 = vsel %vm2013_vm6, %v1407_v45, %v1481_v38  ;;  %v870_v38 = vshll.u32 %v6021_v13, 16  ;;  %v313_v0 = vadd.bf16 %v205_v37, %v97_v6  ;;  %v209_v37 = vld [vmem:[%s8396_s1 + $0x13c] sm:$0xf] }
 0x112   :  { %1590 = vrot.lane.b32.xlu0 %v5970_v29, %s4720_s24  ;;  %2727 = vmatprep.mubr.bf16.mxu1 %v1948_v10  ;;  %v1171_v46 = vpop.permute.xlu1 %1170  ;;  %v1115_v10 = vrot.slane %v5952_v26, 1 }
 0x113   :  { %2728 = vmatmul.mubr.bf16.gmra.mrb[40].mxu1 %v1721_v41  ;;  %v868_v41 = vshrl.u32 %v6021_v13, 16 }
 0x114   :  { %v1575_v32 = vpop.permute.xlu0 %1574  ;;  %1354 = vrot.lane.b32.xlu1 %v5970_v29, %s4717_s19  ;;  %v6067_v44 = vsel %vm1051_vm0, %v1115_v10, %v1116_v2  ;;  %v210_v10 = vld [vmem:[%s8396_s1 + $0x140] sm:$0x1] }
 0x115   :  { %v2110_v8 = vsel %vm2078_vm8, %v2035_v11, %v1575_v32 }
 0x116   :  { %1260 = vrot.lane.b32.xlu0 %v5911_v4, %s4715_s30  ;;  %3081 = vmatmul.mubr.bf16.gmra.mrb[40].mxu0 %v2110_v8  ;;  %v1339_v7 = vpop.permute.xlu1 %1338  ;;  %v877_v8 = vrot.slane %v875_v57, 1 }
 0x117   :  { %4446 = vmatprep.mubr.msk.bf16.mxu0 %vm1624_vm2, %v5583_v18 }
 0x118   :  { %v1245_v9 = vpop.permute.xlu0 %1244  ;;  %1424 = vrot.lane.b32.xlu1 %v5999_v40, %s4718_s20 }
 0x119   :  { %v1810_v1 = vsel %vm1786_vm3, %v1171_v46, %v1245_v9 }
 0x11a   :  { %v1875_v18 = vsel %vm1851_vm4, %v1810_v1, %v1339_v7  ;;  %1025 = vrot.lane.b32.xlu0 %v5906_v52, %s4719_s21  ;;  %v1409_v22 = vpop.permute.xlu1 %1408  ;;  %v1119_v1 = vrot.slane %v4363_v19, 1 }
 0x11b   :  { %v1951_v53 = vsel %vm1916_vm5, %v1875_v18, %v1409_v22 }
 0x11c   :  { %v1010_v16 = vpop.permute.xlu0 %1009  ;;  %1592 = vrot.lane.b32.xlu1 %v6015_v20, %s4720_s24  ;;  %2737 = vmatprep.mubr.bf16.mxu1 %v1951_v53  ;;  %v6109_v19 = vsel %vm1051_vm0, %v1118_v17, %v1119_v1 }
 0x11d   :  { %v1648_v28 = vsel %vm1624_vm2, %v5354_v62, %v1010_v16  ;;  %v206_v62 = vld [vmem:[%s8396_s1 + $0x130] sm:$0xf] }
 0x11e   :  { %1498 = vrot.lane.b32.xlu0 %v5952_v26, %s4714_s25  ;;  %v1724_v52 = vsel %vm1689_vm7, %v1648_v28, %v1171_v46  ;;  %v1577_v30 = vpop.permute.xlu1 %1576  ;;  %v314_v45 = vadd.bf16 %v206_v62, %v98_v23  ;;  %v872_v46 = vrot.slane %v870_v38, 1  ;;  %v100_v28 = vld [vmem:[%s8395_s0 + $0x138] sm:$0xf] }
 0x11f   :  { %2738 = vmatmul.mubr.bf16.gmra.mrb[44].mxu1 %v1724_v52  ;;  %v208_v23 = vld [vmem:[%s8396_s1 + $0x138] sm:$0xf] }
 0x120   :  { %v1483_v33 = vpop.permute.xlu0 %1482  ;;  %1262 = vrot.lane.b32.xlu1 %v5952_v26, %s4715_s30  ;;  %v6062_v32 = vcombine.low %v313_v0, %v314_v45  ;;  %v873_v63 = vor.u32 %v872_v46, %v868_v41  ;;  %v316_v0 = vadd.bf16 %v208_v23, %v100_v28 }
 0x121   :  { %v2037_v39 = vsel %vm2013_vm6, %v1409_v22, %v1483_v33 }
 0x122   :  { %1188 = vrot.lane.b32.xlu0 %v5999_v40, %s4716_s12  ;;  %v2113_v49 = vsel %vm2078_vm8, %v2037_v39, %v1577_v30  ;;  %v1247_v51 = vpop.permute.xlu1 %1246  ;;  %v6080_v48 = vsel %vm602_vm1, %v873_v63, %v877_v8  ;;  %v880_v22 = vshrl.u32 %v6062_v32, 16  ;;  %v101_v30 = vld [vmem:[%s8395_s0 + $0x13c] sm:$0xf]  ;;  %v104_v8 = vld [vmem:[%s8395_s0 + $0x148] sm:$0xf] }
 0x123   :  { %3091 = vmatmul.mubr.bf16.gmra.mrb[44].mxu0 %v2113_v49  ;;  %v317_v45 = vadd.bf16 %v209_v37, %v101_v30 }
 0x124   :  { %v1173_v11 = vpop.permute.xlu0 %1172  ;;  %1027 = vrot.lane.b32.xlu1 %v5970_v29, %s4719_s21  ;;  %4447 = vmatprep.mubr.msk.bf16.mxu0 %vm1624_vm2, %v5625_v3  ;;  %v6071_v29 = vcombine.low %v315_v59, %v315_v59  ;;  %v882_v3 = vshll.u32 %v6062_v32, 16 }
 0x125   :  { %v1812_v7 = vsel %vm1786_vm3, %v1173_v11, %v1247_v51  ;;  %v102_v51 = vld [vmem:[%s8395_s0 + $0x140] sm:$0x1]  ;;  %v6131_v46 = vcombine.low %v316_v0, %v317_v45 }
 0x126   :  { %1356 = vrot.lane.b32.xlu0 %v6015_v20, %s4717_s19  ;;  %v1012_v60 = vpop.permute.xlu1 %1011  ;;  %v884_v53 = vrot.slane %v882_v3, 1  ;;  %v887_v25 = vshll.u32 %v6071_v29, 16  ;;  %v318_v57 = vadd.bf16 %v210_v10, %v102_v51 }
 0x127   :  { %v1650_v15 = vsel %vm1624_vm2, %v5426_v58, %v1012_v60  ;;  %v103_v60 = vld [vmem:[%s8395_s0 + $0x144] sm:$0xf] }
 0x128   :  { %v1341_v43 = vpop.permute.xlu0 %1340  ;;  %1500 = vrot.lane.b32.xlu1 %v6021_v13, %s4714_s25  ;;  %v1727_v58 = vsel %vm1689_vm7, %v1650_v15, %v1173_v11  ;;  %v885_v38 = vor.u32 %v884_v53, %v880_v22  ;;  %v889_v33 = vrot.slane %v887_v25, 1  ;;  %v6152_v3 = vcombine.low %v318_v57, %v318_v57  ;;  %v105_v22 = vld [vmem:[%s8395_s0 + $0x14c] sm:$0x1] }
 0x129   :  { %v1877_v9 = vsel %vm1851_vm4, %v1812_v7, %v1341_v43  ;;  %v211_v43 = vld [vmem:[%s8396_s1 + $0x144] sm:$0xf]  ;;  %v213_v53 = vld [vmem:[%s8396_s1 + $0x14c] sm:$0x1]  ;;  %v1122_v25 = vrot.slane %v6071_v29, 1 }
 0x12a   :  { %1426 = vrot.lane.b32.xlu0 %v6067_v44, %s4718_s20  ;;  %v1485_v5 = vpop.permute.xlu1 %1484  ;;  %v6125_v14 = vsel %vm602_vm1, %v885_v38, %v889_v33  ;;  %v899_v28 = vshll.u32 %v6152_v3, 16  ;;  %v321_v30 = vadd.bf16 %v213_v53, %v105_v22  ;;  %v216_v22 = vld [vmem:[%s8396_s1 + $0x158] sm:$0x1] }
 0x12c   :  { %v1411_v55 = vpop.permute.xlu0 %1410  ;;  %1190 = vrot.lane.b32.xlu1 %v6067_v44, %s4716_s12 }
 0x12d   :  { %v1954_v18 = vsel %vm1916_vm5, %v1877_v9, %v1411_v55  ;;  %v2039_v6 = vsel %vm2013_vm6, %v1411_v55, %v1485_v5  ;;  %v894_v5 = vshll.u32 %v6131_v46, 16  ;;  %v319_v9 = vadd.bf16 %v211_v43, %v103_v60  ;;  %v214_v43 = vld [vmem:[%s8396_s1 + $0x150] sm:$0xf] }
 0x12e   :  { %1594 = vrot.lane.b32.xlu0 %v6080_v48, %s4720_s24  ;;  %2747 = vmatprep.mubr.bf16.mxu1 %v1954_v18  ;;  %v1175_v16 = vpop.permute.xlu1 %1174  ;;  %v1121_v18 = vrot.slane %v6062_v32, 1 }
 0x12f   :  { %2748 = vmatmul.mubr.bf16.gmra.mrb[48].mxu1 %v1727_v58  ;;  %v892_v58 = vshrl.u32 %v6131_v46, 16 }
 0x130   :  { %v1579_v52 = vpop.permute.xlu0 %1578  ;;  %1358 = vrot.lane.b32.xlu1 %v6080_v48, %s4717_s19  ;;  %v6180_v29 = vsel %vm1051_vm0, %v1121_v18, %v1122_v25  ;;  %v108_v18 = vld [vmem:[%s8395_s0 + $0x158] sm:$0x1] }
 0x131   :  { %v2116_v62 = vsel %vm2078_vm8, %v2039_v6, %v1579_v52 }
 0x132   :  { %1264 = vrot.lane.b32.xlu0 %v6021_v13, %s4715_s30  ;;  %3101 = vmatmul.mubr.bf16.gmra.mrb[48].mxu0 %v2116_v62  ;;  %v1343_v39 = vpop.permute.xlu1 %1342  ;;  %v901_v62 = vrot.slane %v899_v28, 1 }
 0x133   :  { %4448 = vmatprep.mubr.msk.bf16.mxu0 %vm1624_vm2, %v5710_v31 }
 0x134   :  { %v1249_v49 = vpop.permute.xlu0 %1248  ;;  %1428 = vrot.lane.b32.xlu1 %v6109_v19, %s4718_s20 }
 0x135   :  { %v1814_v54 = vsel %vm1786_vm3, %v1175_v16, %v1249_v49  ;;  %v1124_v49 = vrot.slane %v6131_v46, 1 }
 0x136   :  { %v1879_v31 = vsel %vm1851_vm4, %v1814_v54, %v1343_v39  ;;  %1029 = vrot.lane.b32.xlu0 %v6015_v20, %s4719_s21  ;;  %v1413_v2 = vpop.permute.xlu1 %1412  ;;  %v1125_v54 = vrot.slane %v6152_v3, 1 }
 0x137   :  { %v1957_v41 = vsel %vm1916_vm5, %v1879_v31, %v1413_v2  ;;  %v1618_v31 = vrot.slane %v5687_v34, 1  ;;  %v106_v34 = vld [vmem:[%s8395_s0 + $0x150] sm:$0xf] }
 0x138   :  { %v1014_v11 = vpop.permute.xlu0 %1013  ;;  %1596 = vrot.lane.b32.xlu1 %v6125_v14, %s4720_s24  ;;  %2757 = vmatprep.mubr.bf16.mxu1 %v1957_v41 }
 0x139   :  { %v1652_v59 = vsel %vm1624_vm2, %v5468_v36, %v1014_v11  ;;  %v212_v36 = vld [vmem:[%s8396_s1 + $0x148] sm:$0xf] }
 0x13a   :  { %1502 = vrot.lane.b32.xlu0 %v6062_v32, %s4714_s25  ;;  %v1730_v20 = vsel %vm1689_vm7, %v1652_v59, %v1175_v16  ;;  %v1581_v63 = vpop.permute.xlu1 %1580  ;;  %v320_v55 = vadd.bf16 %v212_v36, %v104_v8  ;;  %v896_v16 = vrot.slane %v894_v5, 1  ;;  %v107_v8 = vld [vmem:[%s8395_s0 + $0x154] sm:$0xf]  ;;  %v6226_v5 = vsel %vm1051_vm0, %v1124_v49, %v1125_v54 }
 0x13b   :  { %2758 = vmatmul.mubr.bf16.gmra.mrb[52].mxu1 %v1730_v20  ;;  %v215_v36 = vld [vmem:[%s8396_s1 + $0x154] sm:$0xf] }
 0x13c   :  { %v1487_v7 = vpop.permute.xlu0 %1486  ;;  %1266 = vrot.lane.b32.xlu1 %v6062_v32, %s4715_s30  ;;  %v6175_v52 = vcombine.low %v319_v9, %v320_v55  ;;  %v897_v37 = vor.u32 %v896_v16, %v892_v58  ;;  %v322_v55 = vadd.bf16 %v214_v43, %v106_v34 }
 0x13d   :  { %v2041_v15 = vsel %vm2013_vm6, %v1413_v2, %v1487_v7  ;;  %v1619_v2 = vrot.slane %v5698_v50, 1 }
 0x13e   :  { %1192 = vrot.lane.b32.xlu0 %v6109_v19, %s4716_s12  ;;  %v2119_v17 = vsel %vm2078_vm8, %v2041_v15, %v1581_v63  ;;  %v1251_v1 = vpop.permute.xlu1 %1250  ;;  %v6193_v45 = vsel %vm602_vm1, %v897_v37, %v901_v62  ;;  %v109_v62 = vld [vmem:[%s8395_s0 + $0x15c] sm:$0xf] }
 0x13f   :  { %3111 = vmatmul.mubr.bf16.gmra.mrb[52].mxu0 %v2119_v17  ;;  %v1620_v63 = vsel %vm1051_vm0, %v1618_v31, %v1619_v2  ;;  %v323_v17 = vadd.bf16 %v215_v36, %v107_v8 }
 0x140   :  { %v1177_v6 = vpop.permute.xlu0 %1176  ;;  %1031 = vrot.lane.b32.xlu1 %v6080_v48, %s4719_s21  ;;  %4449 = vmatprep.mubr.msk.bf16.mxu0 %vm1624_vm2, %v5775_v42  ;;  %v6184_v48 = vcombine.low %v321_v30, %v321_v30  ;;  %v906_v42 = vshll.u32 %v6175_v52, 16  ;;  %v324_v30 = vadd.bf16 %v216_v22, %v108_v18 }
 0x141   :  { %v1816_v39 = vsel %vm1786_vm3, %v1177_v6, %v1251_v1 }
 0x142   :  { %1360 = vrot.lane.b32.xlu0 %v6125_v14, %s4717_s19  ;;  %v1016_v23 = vpop.permute.xlu1 %1015  ;;  %v908_v57 = vrot.slane %v906_v42, 1  ;;  %v911_v11 = vshll.u32 %v6184_v48, 16  ;;  %v110_v42 = vld [vmem:[%s8395_s0 + $0x160] sm:$0xf] }
 0x143   :  { %v1654_v0 = vsel %vm1624_vm2, %v5537_v27, %v1016_v23  ;;  %v904_v27 = vshrl.u32 %v6175_v52, 16 }
 0x144   :  { %v1345_v38 = vpop.permute.xlu0 %1344  ;;  %1504 = vrot.lane.b32.xlu1 %v6131_v46, %s4714_s25  ;;  %v1733_v59 = vsel %vm1689_vm7, %v1654_v0, %v1177_v6  ;;  %v913_v15 = vrot.slane %v911_v11, 1  ;;  %v6247_v6 = vcombine.low %v322_v55, %v323_v17  ;;  %v1128_v11 = vrot.slane %v6184_v48, 1 }
 0x145   :  { %v1881_v51 = vsel %vm1851_vm4, %v1816_v39, %v1345_v38  ;;  %v909_v7 = vor.u32 %v908_v57, %v904_v27  ;;  %v6268_v39 = vcombine.low %v324_v30, %v324_v30  ;;  %v111_v27 = vld [vmem:[%s8395_s0 + $0x164] sm:$0x1] }
 0x146   :  { %1430 = vrot.lane.b32.xlu0 %v6180_v29, %s4718_s20  ;;  %v1489_v33 = vpop.permute.xlu1 %1488  ;;  %v918_v0 = vshll.u32 %v6247_v6, 16  ;;  %v219_v57 = vld [vmem:[%s8396_s1 + $0x164] sm:$0x1] }
 0x147   :  { %v6241_v25 = vsel %vm602_vm1, %v909_v7, %v913_v15  ;;  %v923_v34 = vshll.u32 %v6268_v39, 16  ;;  %v327_v36 = vadd.bf16 %v219_v57, %v111_v27 }
 0x148   :  { %v1415_v10 = vpop.permute.xlu0 %1414  ;;  %1194 = vrot.lane.b32.xlu1 %v6180_v29, %s4716_s12 }
 0x149   :  { %v1960_v41 = vsel %vm1916_vm5, %v1881_v51, %v1415_v10  ;;  %v2043_v50 = vsel %vm2013_vm6, %v1415_v10, %v1489_v33  ;;  %v217_v33 = vld [vmem:[%s8396_s1 + $0x15c] sm:$0xf]  ;;  %v925_v17 = vrot.slane %v923_v34, 1 }
 0x14a   :  { %1598 = vrot.lane.b32.xlu0 %v6193_v45, %s4720_s24  ;;  %2767 = vmatprep.mubr.bf16.mxu1 %v1960_v41  ;;  %v1179_v60 = vpop.permute.xlu1 %1178  ;;  %v325_v10 = vadd.bf16 %v217_v33, %v109_v62  ;;  %v1127_v41 = vrot.slane %v6175_v52, 1  ;;  %v1131_v33 = vrot.slane %v6268_v39, 1  ;;  %v112_v39 = vld [vmem:[%s8395_s0 + $0x168] sm:$0xf] }
 0x14b   :  { %2768 = vmatmul.mubr.bf16.gmra.mrb[56].mxu1 %v1733_v59  ;;  %v916_v59 = vshrl.u32 %v6247_v6, 16 }
 0x14c   :  { %v1583_v20 = vpop.permute.xlu0 %1582  ;;  %1362 = vrot.lane.b32.xlu1 %v6193_v45, %s4717_s19 }
 0x14d   :  { %v2122_v3 = vsel %vm2078_vm8, %v2043_v50, %v1583_v20 }
 0x14e   :  { %1268 = vrot.lane.b32.xlu0 %v6131_v46, %s4715_s30  ;;  %3121 = vmatmul.mubr.bf16.gmra.mrb[56].mxu0 %v2122_v3  ;;  %v1347_v9 = vpop.permute.xlu1 %1346 }
 0x14f   :  { %4450 = vmatprep.mubr.msk.bf16.mxu0 %vm1624_vm2, %v1620_v63 }
 0x150   :  { %v1253_v1 = vpop.permute.xlu0 %1252  ;;  %1432 = vrot.lane.b32.xlu1 %v6226_v5, %s4718_s20 }
 0x151   :  { %v1818_v53 = vsel %vm1786_vm3, %v1179_v60, %v1253_v1 }
 0x152   :  { %v1883_v58 = vsel %vm1851_vm4, %v1818_v53, %v1347_v9  ;;  %1033 = vrot.lane.b32.xlu0 %v6125_v14, %s4719_s21  ;;  %v1417_v16 = vpop.permute.xlu1 %1416 }
 0x153   :  { %v1963_v28 = vsel %vm1916_vm5, %v1883_v58, %v1417_v16  ;;  %v6306_v58 = vcombine.low %v327_v36, %v327_v36 }
 0x154   :  { %v1018_v23 = vpop.permute.xlu0 %1017  ;;  %1600 = vrot.lane.b32.xlu1 %v6241_v25, %s4720_s24  ;;  %2777 = vmatprep.mubr.bf16.mxu1 %v1963_v28 }
 0x155   :  { %v1656_v37 = vsel %vm1624_vm2, %v5578_v61, %v1018_v23  ;;  %v218_v61 = vld [vmem:[%s8396_s1 + $0x160] sm:$0xf] }
 0x156   :  { %1506 = vrot.lane.b32.xlu0 %v6175_v52, %s4714_s25  ;;  %v1736_v14 = vsel %vm1689_vm7, %v1656_v37, %v1179_v60  ;;  %v1585_v38 = vpop.permute.xlu1 %1584  ;;  %v326_v54 = vadd.bf16 %v218_v61, %v110_v42  ;;  %v920_v60 = vrot.slane %v918_v0, 1  ;;  %v1130_v42 = vrot.slane %v6247_v6, 1 }
 0x157   :  { %2778 = vmatmul.mubr.bf16.gmra.mrb[60].mxu1 %v1736_v14 }
 0x158   :  { %v1491_v49 = vpop.permute.xlu0 %1490  ;;  %1270 = vrot.lane.b32.xlu1 %v6175_v52, %s4715_s30  ;;  %v6291_v43 = vcombine.low %v325_v10, %v326_v54 }
 0x159   :  { %v2045_v51 = vsel %vm2013_vm6, %v1417_v16, %v1491_v49 }
 0x15a   :  { %1196 = vrot.lane.b32.xlu0 %v6226_v5, %s4716_s12  ;;  %v2125_v31 = vsel %vm2078_vm8, %v2045_v51, %v1585_v38  ;;  %v1255_v2 = vpop.permute.xlu1 %1254  ;;  %v930_v16 = vshll.u32 %v6291_v43, 16  ;;  %v928_v0 = vshrl.u32 %v6291_v43, 16 }
 0x15b   :  { %3131 = vmatmul.mubr.bf16.gmra.mrb[60].mxu0 %v2125_v31 }
 0x15c   :  { %v1181_v50 = vpop.permute.xlu0 %1180  ;;  %v2629_v20 = vpop.f32.mrb[0].mxu1  ;;  %1035 = vrot.lane.b32.xlu1 %v6193_v45, %s4719_s21  ;;  %4451 = vmatprep.mubr.msk.bf16.mxu0 %vm1624_vm2, %v5890_v56  ;;  %v6300_v45 = vsel %vm1051_vm0, %v1127_v41, %v1128_v11  ;;  %v921_v56 = vor.u32 %v920_v60, %v916_v59  ;;  %v932_v49 = vrot.slane %v930_v16, 1  ;;  %v220_v11 = vld [vmem:[%s8396_s1 + $0x168] sm:$0xf]  ;;  %v221_v59 = vld [vmem:[%s8396_s1 + $0x16c] sm:$0xf] }
 0x15d   :  { %v2982_v63 = vpop.f32.mrb[0].mxu0  ;;  %v2631_v8 = vpop.f32.mrb[1].mxu1  ;;  %v1820_v30 = vsel %vm1786_vm3, %v1181_v50, %v1255_v2  ;;  %v113_v2 = vld [vmem:[%s8395_s0 + $0x16c] sm:$0xf] }
 0x15e   :  { %v2984_v3 = vpop.f32.mrb[1].mxu0  ;;  %1364 = vrot.lane.b32.xlu0 %v6241_v25, %s4717_s19  ;;  %v6295_v48 = vadd.f32 %v2982_v63, %v2629_v20  ;;  %v2633_v7 = vpop.f32.mrb[2].mxu1  ;;  %v6317_v62 = vsel %vm602_vm1, %v921_v56, %v925_v17  ;;  %v933_v20 = vor.u32 %v932_v49, %v928_v0 }
 0x15f   :  { %v6297_v15 = vadd.f32 %v2984_v3, %v2631_v8  ;;  %v2986_v9 = vpop.f32.mrb[2].mxu0  ;;  %v1020_v55 = vpop.permute.xlu1 %1019 }
 0x160   :  { %v2988_v1 = vpop.f32.mrb[3].mxu0  ;;  %v1349_v18 = vpop.permute.xlu0 %1348  ;;  %v6302_v22 = vadd.f32 %v2986_v9, %v2633_v7  ;;  %1508 = vrot.lane.b32.xlu1 %v6247_v6, %s4714_s25  ;;  %v1658_v23 = vsel %vm1624_vm2, %v5753_v21, %v1020_v55  ;;  %v935_v21 = vshll.u32 %v6306_v58, 16  ;;  %v328_v9 = vadd.bf16 %v220_v11, %v112_v39 }
 0x161   :  { %8520 = vst [vmem:[#allocation5_spill] sm:$0xff] %v6297_v15  ;;  %v2635_v53 = vpop.f32.mrb[3].mxu1  ;;  %v1885_v14 = vsel %vm1851_vm4, %v1820_v30, %v1349_v18  ;;  %v1739_v10 = vsel %vm1689_vm7, %v1658_v23, %v1181_v50  ;;  %v6347_v50 = vsel %vm1051_vm0, %v1130_v42, %v1131_v33  ;;  %v329_v55 = vadd.bf16 %v221_v59, %v113_v2  ;;  %v114_v18 = vld [vmem:[%s8395_s0 + $0x170] sm:$0x1] }
 0x162   :  { %8521 = vst [vmem:[#allocation6_spill] sm:$0xff] %v6302_v22  ;;  %v6309_v28 = vadd.f32 %v2988_v1, %v2635_v53  ;;  %1434 = vrot.lane.b32.xlu0 %v6300_v45, %s4718_s20  ;;  %v937_v63 = vrot.slane %v935_v21, 1  ;;  %v222_v53 = vld [vmem:[%s8396_s1 + $0x170] sm:$0x1] }
 0x163   :  { %v1493_v37 = vpop.permute.xlu1 %1492  ;;  %v6376_v42 = vcombine.low %v328_v9, %v329_v55  ;;  %v330_v33 = vadd.bf16 %v222_v53, %v114_v18 }
 0x164   :  { %8522 = vst [vmem:[#allocation7_spill] sm:$0xff] %v6309_v28  ;;  %v1419_v38 = vpop.permute.xlu0 %1418  ;;  %1198 = vrot.lane.b32.xlu1 %v6300_v45, %s4716_s12  ;;  %v6369_v23 = vsel %vm602_vm1, %v933_v20, %v937_v63  ;;  %v225_v20 = vld [vmem:[%s8396_s1 + $0x17c] sm:$0x1] }
 0x165   :  { %v1966_v61 = vsel %vm1916_vm5, %v1885_v14, %v1419_v38  ;;  %v2047_v41 = vsel %vm2013_vm6, %v1419_v38, %v1493_v37  ;;  %v6398_v39 = vcombine.low %v330_v33, %v330_v33  ;;  %v942_v2 = vshll.u32 %v6376_v42, 16 }
 0x166   :  { %1602 = vrot.lane.b32.xlu0 %v6317_v62, %s4720_s24  ;;  %v2639_v51 = vpop.f32.mrb[4].mxu1  ;;  %2787 = vmatprep.mubr.bf16.mxu1 %v1966_v61 }
 0x167   :  { %v2641_v54 = vpop.f32.mrb[5].mxu1  ;;  %2788 = vmatmul.mubr.bf16.gmra.mrb[64].mxu1 %v1739_v10  ;;  %v1183_v31 = vpop.permute.xlu1 %1182  ;;  %v223_v10 = vld [vmem:[%s8396_s1 + $0x174] sm:$0xf]  ;;  %v944_v9 = vrot.slane %v942_v2, 1  ;;  %v947_v55 = vshll.u32 %v6398_v39, 16 }
 0x168   :  { %v1587_v27 = vpop.permute.xlu0 %1586  ;;  %v2643_v57 = vpop.f32.mrb[6].mxu1  ;;  %1366 = vrot.lane.b32.xlu1 %v6317_v62, %s4717_s19 }
 0x169   :  { %v2645_v60 = vpop.f32.mrb[7].mxu1  ;;  %v2128_v34 = vsel %vm2078_vm8, %v2047_v41, %v1587_v27 }
 0x16a   :  { %1272 = vrot.lane.b32.xlu0 %v6247_v6, %s4715_s30  ;;  %v2992_v8 = vpop.f32.mrb[4].mxu0  ;;  %3141 = vmatmul.mubr.bf16.gmra.mrb[64].mxu0 %v2128_v34  ;;  %v117_v34 = vld [vmem:[%s8395_s0 + $0x17c] sm:$0x1] }
 0x16b   :  { %v6351_v36 = vadd.f32 %v2992_v8, %v2639_v51  ;;  %v2994_v3 = vpop.f32.mrb[5].mxu0  ;;  %v1351_v7 = vpop.permute.xlu1 %1350  ;;  %4452 = vmatprep.mubr.msk.bf16.mxu0 %vm1624_vm2, %v5957_v24  ;;  %v116_v51 = vld [vmem:[%s8395_s0 + $0x178] sm:$0xf] }
 0x16c   :  { %v6355_v56 = vadd.f32 %v2994_v3, %v2641_v54  ;;  %v1257_v17 = vpop.permute.xlu0 %1256  ;;  %v2996_v1 = vpop.f32.mrb[6].mxu0  ;;  %1436 = vrot.lane.b32.xlu1 %v6347_v50, %s4718_s20  ;;  %v1134_v3 = vrot.slane %v6306_v58, 1 }
 0x16d   :  { %v1822_v16 = vsel %vm1786_vm3, %v1183_v31, %v1257_v17  ;;  %v6366_v24 = vadd.f32 %v2996_v1, %v2643_v57  ;;  %v2998_v30 = vpop.f32.mrb[7].mxu0 }
 0x16e   :  { %8523 = vst [vmem:[#allocation8_spill] sm:$0xff] %v6355_v56  ;;  %v6371_v37 = vadd.f32 %v2998_v30, %v2645_v60  ;;  %1037 = vrot.lane.b32.xlu0 %v6241_v25, %s4719_s21  ;;  %v1887_v14 = vsel %vm1851_vm4, %v1822_v16, %v1351_v7  ;;  %v115_v25 = vld [vmem:[%s8395_s0 + $0x174] sm:$0xf]  ;;  %v1133_v60 = vrot.slane %v6291_v43, 1  ;;  %v940_v7 = vshrl.u32 %v6376_v42, 16 }
 0x16f   :  { %v1421_v38 = vpop.permute.xlu1 %1420  ;;  %v331_v27 = vadd.bf16 %v223_v10, %v115_v25  ;;  %v333_v30 = vadd.bf16 %v225_v20, %v117_v34 }
 0x170   :  { %8524 = vst [vmem:[#allocation9_spill] sm:$0xff] %v6371_v37  ;;  %v1022_v61 = vpop.permute.xlu0 %1021  ;;  %1604 = vrot.lane.b32.xlu1 %v6369_v23, %s4720_s24  ;;  %v1969_v0 = vsel %vm1916_vm5, %v1887_v14, %v1421_v38 }
 0x171   :  { %v1660_v49 = vsel %vm1624_vm2, %v5757_v35, %v1022_v61  ;;  %2797 = vmatprep.mubr.bf16.mxu1 %v1969_v0  ;;  %v224_v35 = vld [vmem:[%s8396_s1 + $0x178] sm:$0xf]  ;;  %v945_v0 = vor.u32 %v944_v9, %v940_v7  ;;  %v6438_v10 = vcombine.low %v333_v30, %v333_v30  ;;  %v119_v9 = vld [vmem:[%s8395_s0 + $0x184] sm:$0xf] }
 0x172   :  { %1510 = vrot.lane.b32.xlu0 %v6291_v43, %s4714_s25  ;;  %v1742_v21 = vsel %vm1689_vm7, %v1660_v49, %v1183_v31  ;;  %v332_v57 = vadd.bf16 %v224_v35, %v116_v51 }
 0x173   :  { %2798 = vmatmul.mubr.bf16.gmra.mrb[68].mxu1 %v1742_v21  ;;  %v1589_v54 = vpop.permute.xlu1 %1588 }
 0x174   :  { %v1495_v41 = vpop.permute.xlu0 %1494  ;;  %1274 = vrot.lane.b32.xlu1 %v6291_v43, %s4715_s30  ;;  %v6421_v16 = vcombine.low %v331_v27, %v332_v57 }
 0x175   :  { %v2049_v31 = vsel %vm2013_vm6, %v1421_v38, %v1495_v41 }
 0x176   :  { %1200 = vrot.lane.b32.xlu0 %v6347_v50, %s4716_s12  ;;  %v2649_v11 = vpop.f32.mrb[8].mxu1  ;;  %v2131_v59 = vsel %vm2078_vm8, %v2049_v31, %v1589_v54  ;;  %v954_v35 = vshll.u32 %v6421_v16, 16  ;;  %v952_v34 = vshrl.u32 %v6421_v16, 16 }
 0x177   :  { %v2651_v63 = vpop.f32.mrb[9].mxu1  ;;  %3151 = vmatmul.mubr.bf16.gmra.mrb[68].mxu0 %v2131_v59  ;;  %v1259_v8 = vpop.permute.xlu1 %1258  ;;  %v1137_v59 = vrot.slane %v6398_v39, 1  ;;  %v118_v39 = vld [vmem:[%s8395_s0 + $0x180] sm:$0xf] }
 0x178   :  { %v1185_v17 = vpop.permute.xlu0 %1184  ;;  %v2653_v1 = vpop.f32.mrb[10].mxu1  ;;  %1039 = vrot.lane.b32.xlu1 %v6317_v62, %s4719_s21  ;;  %4453 = vmatprep.mubr.msk.bf16.mxu0 %vm1624_vm2, %v5999_v40  ;;  %v6430_v62 = vsel %vm1051_vm0, %v1133_v60, %v1134_v3  ;;  %v949_v40 = vrot.slane %v947_v55, 1  ;;  %v956_v20 = vrot.slane %v954_v35, 1 }
 0x179   :  { %v2655_v18 = vpop.f32.mrb[11].mxu1  ;;  %v3002_v53 = vpop.f32.mrb[8].mxu0  ;;  %v1824_v54 = vsel %vm1786_vm3, %v1185_v17, %v1259_v8 }
 0x17a   :  { %v6423_v14 = vadd.f32 %v3002_v53, %v2649_v11  ;;  %1368 = vrot.lane.b32.xlu0 %v6369_v23, %s4717_s19  ;;  %v3004_v58 = vpop.f32.mrb[9].mxu0  ;;  %v6447_v31 = vsel %vm602_vm1, %v945_v0, %v949_v40  ;;  %v1136_v11 = vrot.slane %v6376_v42, 1  ;;  %v227_v53 = vld [vmem:[%s8396_s1 + $0x184] sm:$0xf] }
 0x17b   :  { %v6427_v38 = vadd.f32 %v3004_v58, %v2651_v63  ;;  %v3006_v33 = vpop.f32.mrb[10].mxu0  ;;  %v1024_v61 = vpop.permute.xlu1 %1023 }
 0x17c   :  { %8525 = vst [vmem:[#allocation10_spill] sm:$0xff] %v6423_v14  ;;  %v6432_v49 = vadd.f32 %v3006_v33, %v2653_v1  ;;  %v1353_v25 = vpop.permute.xlu0 %1352  ;;  %v3008_v21 = vpop.f32.mrb[11].mxu0  ;;  %1512 = vrot.lane.b32.xlu1 %v6376_v42, %s4714_s25  ;;  %v1662_v2 = vsel %vm1624_vm2, %v5803_v12, %v1024_v61  ;;  %v959_v12 = vshll.u32 %v6438_v10, 16  ;;  %v6477_v33 = vsel %vm1051_vm0, %v1136_v11, %v1137_v59  ;;  %v120_v11 = vld [vmem:[%s8395_s0 + $0x188] sm:$0x1] }
 0x17d   :  { %8526 = vst [vmem:[#allocation11_spill] sm:$0xff] %v6427_v38  ;;  %v6436_v51 = vadd.f32 %v3008_v21, %v2655_v18  ;;  %v1889_v27 = vsel %vm1851_vm4, %v1824_v54, %v1353_v25  ;;  %v1745_v8 = vsel %vm1689_vm7, %v1662_v2, %v1185_v17  ;;  %v226_v17 = vld [vmem:[%s8396_s1 + $0x180] sm:$0xf]  ;;  %v957_v61 = vor.u32 %v956_v20, %v952_v34  ;;  %v228_v59 = vld [vmem:[%s8396_s1 + $0x188] sm:$0x1] }
 0x17e   :  { %8527 = vst [vmem:[#allocation12_spill] sm:$0xff] %v6432_v49  ;;  %1438 = vrot.lane.b32.xlu0 %v6430_v62, %s4718_s20  ;;  %v961_v0 = vrot.slane %v959_v12, 1  ;;  %v334_v54 = vadd.bf16 %v226_v17, %v118_v39  ;;  %v335_v2 = vadd.bf16 %v227_v53, %v119_v9  ;;  %v336_v39 = vadd.bf16 %v228_v59, %v120_v11  ;;  %v122_v17 = vld [vmem:[%s8395_s0 + $0x190] sm:$0xf]  ;;  %v229_v53 = vld [vmem:[%s8396_s1 + $0x18c] sm:$0xf] }
 0x17f   :  { %8528 = vst [vmem:[#allocation13_spill] sm:$0xff] %v6436_v51  ;;  %v1497_v41 = vpop.permute.xlu1 %1496 }
 0x180   :  { %v1423_v57 = vpop.permute.xlu0 %1422  ;;  %1202 = vrot.lane.b32.xlu1 %v6430_v62, %s4716_s12  ;;  %v6499_v20 = vsel %vm602_vm1, %v957_v61, %v961_v0 }
 0x181   :  { %v1972_v60 = vsel %vm1916_vm5, %v1889_v27, %v1423_v57  ;;  %v2051_v55 = vsel %vm2013_vm6, %v1423_v57, %v1497_v41 }
 0x182   :  { %1606 = vrot.lane.b32.xlu0 %v6447_v31, %s4720_s24  ;;  %v2659_v63 = vpop.f32.mrb[12].mxu1  ;;  %2807 = vmatprep.mubr.bf16.mxu1 %v1972_v60 }
 0x183   :  { %v2661_v3 = vpop.f32.mrb[13].mxu1  ;;  %2808 = vmatmul.mubr.bf16.gmra.mrb[72].mxu1 %v1745_v8  ;;  %v1187_v7 = vpop.permute.xlu1 %1186 }
 0x184   :  { %v1591_v1 = vpop.permute.xlu0 %1590  ;;  %v2663_v18 = vpop.f32.mrb[14].mxu1  ;;  %1370 = vrot.lane.b32.xlu1 %v6447_v31, %s4717_s19 }
 0x185   :  { %v2665_v30 = vpop.f32.mrb[15].mxu1  ;;  %v2134_v58 = vsel %vm2078_vm8, %v2051_v55, %v1591_v1 }
 0x186   :  { %1276 = vrot.lane.b32.xlu0 %v6376_v42, %s4715_s30  ;;  %v3012_v40 = vpop.f32.mrb[12].mxu0  ;;  %3161 = vmatmul.mubr.bf16.gmra.mrb[72].mxu0 %v2134_v58  ;;  %v6528_v58 = vcombine.low %v336_v39, %v336_v39 }
 0x187   :  { %v6481_v25 = vadd.f32 %v3012_v40, %v2659_v63  ;;  %v3014_v21 = vpop.f32.mrb[13].mxu0  ;;  %v1355_v35 = vpop.permute.xlu1 %1354  ;;  %4454 = vmatprep.mubr.msk.bf16.mxu0 %vm1624_vm2, %v6067_v44 }
 0x188   :  { %v6485_v41 = vadd.f32 %v3014_v21, %v2661_v3  ;;  %v1261_v27 = vpop.permute.xlu0 %1260  ;;  %v3016_v57 = vpop.f32.mrb[14].mxu0  ;;  %1440 = vrot.lane.b32.xlu1 %v6477_v33, %s4718_s20  ;;  %v6506_v3 = vcombine.low %v334_v54, %v335_v2  ;;  %v1139_v2 = vrot.slane %v6421_v16, 1 }
 0x189   :  { %8529 = vst [vmem:[#allocation14_spill] sm:$0xff] %v6481_v25  ;;  %v1826_v60 = vsel %vm1786_vm3, %v1187_v7, %v1261_v27  ;;  %v6496_v44 = vadd.f32 %v3016_v57, %v2663_v18  ;;  %v3018_v34 = vpop.f32.mrb[15].mxu0  ;;  %v123_v27 = vld [vmem:[%s8395_s0 + $0x194] sm:$0x1] }
 0x18a   :  { %8530 = vst [vmem:[#allocation15_spill] sm:$0xff] %v6485_v41  ;;  %v6501_v12 = vadd.f32 %v3018_v34, %v2665_v30  ;;  %1041 = vrot.lane.b32.xlu0 %v6369_v23, %s4719_s21  ;;  %v1891_v63 = vsel %vm1851_vm4, %v1826_v60, %v1355_v35  ;;  %v121_v23 = vld [vmem:[%s8395_s0 + $0x18c] sm:$0xf]  ;;  %v966_v61 = vshll.u32 %v6506_v3, 16  ;;  %v231_v57 = vld [vmem:[%s8396_s1 + $0x194] sm:$0x1] }
 0x18b   :  { %8531 = vst [vmem:[#allocation16_spill] sm:$0xff] %v6496_v44  ;;  %v1425_v8 = vpop.permute.xlu1 %1424  ;;  %v337_v40 = vadd.bf16 %v229_v53, %v121_v23  ;;  %v1140_v60 = vrot.slane %v6438_v10, 1  ;;  %v964_v34 = vshrl.u32 %v6506_v3, 16 }
 0x18c   :  { %8532 = vst [vmem:[#allocation17_spill] sm:$0xff] %v6501_v12  ;;  %v1026_v9 = vpop.permute.xlu0 %1025  ;;  %1608 = vrot.lane.b32.xlu1 %v6499_v20, %s4720_s24  ;;  %v1975_v55 = vsel %vm1916_vm5, %v1891_v63, %v1425_v8  ;;  %v968_v63 = vrot.slane %v966_v61, 1 }
 0x18d   :  { %v1664_v1 = vsel %vm1624_vm2, %v5847_v47, %v1026_v9  ;;  %2817 = vmatprep.mubr.bf16.mxu1 %v1975_v55  ;;  %v230_v47 = vld [vmem:[%s8396_s1 + $0x190] sm:$0xf] }
 0x18e   :  { %1514 = vrot.lane.b32.xlu0 %v6421_v16, %s4714_s25  ;;  %v1748_v18 = vsel %vm1689_vm7, %v1664_v1, %v1187_v7  ;;  %v338_v21 = vadd.bf16 %v230_v47, %v122_v17  ;;  %v969_v61 = vor.u32 %v968_v63, %v964_v34  ;;  %v1142_v63 = vrot.slane %v6506_v3, 1 }
 0x18f   :  { %2818 = vmatmul.mubr.bf16.gmra.mrb[76].mxu1 %v1748_v18  ;;  %v1593_v30 = vpop.permute.xlu1 %1592  ;;  %v339_v18 = vadd.bf16 %v231_v57, %v123_v27 }
 0x190   :  { %v1499_v0 = vpop.permute.xlu0 %1498  ;;  %1278 = vrot.lane.b32.xlu1 %v6421_v16, %s4715_s30  ;;  %v6551_v23 = vcombine.low %v337_v40, %v338_v21 }
 0x191   :  { %v2053_v7 = vsel %vm2013_vm6, %v1425_v8, %v1499_v0  ;;  %v971_v8 = vshll.u32 %v6528_v58, 16 }
 0x192   :  { %1204 = vrot.lane.b32.xlu0 %v6477_v33, %s4716_s12  ;;  %v2669_v35 = vpop.f32.mrb[16].mxu1  ;;  %v2137_v54 = vsel %vm2078_vm8, %v2053_v7, %v1593_v30 }
 0x193   :  { %v2671_v11 = vpop.f32.mrb[17].mxu1  ;;  %3171 = vmatmul.mubr.bf16.gmra.mrb[76].mxu0 %v2137_v54  ;;  %v1263_v59 = vpop.permute.xlu1 %1262  ;;  %v978_v54 = vshll.u32 %v6551_v23, 16 }
 0x194   :  { %v1189_v39 = vpop.permute.xlu0 %1188  ;;  %v2673_v9 = vpop.f32.mrb[18].mxu1  ;;  %1043 = vrot.lane.b32.xlu1 %v6447_v31, %s4719_s21  ;;  %4455 = vmatprep.mubr.msk.bf16.mxu0 %vm1624_vm2, %v6109_v19  ;;  %v6560_v31 = vsel %vm1051_vm0, %v1139_v2, %v1140_v60  ;;  %v973_v19 = vrot.slane %v971_v8, 1  ;;  %v1143_v8 = vrot.slane %v6528_v58, 1  ;;  %v124_v58 = vld [vmem:[%s8395_s0 + $0x198] sm:$0xf] }
 0x195   :  { %v2675_v55 = vpop.f32.mrb[19].mxu1  ;;  %v3022_v1 = vpop.f32.mrb[16].mxu0  ;;  %v1828_v2 = vsel %vm1786_vm3, %v1189_v39, %v1263_v59  ;;  %v976_v59 = vshrl.u32 %v6551_v23, 16 }
 0x196   :  { %v6553_v17 = vadd.f32 %v3022_v1, %v2669_v35  ;;  %1372 = vrot.lane.b32.xlu0 %v6499_v20, %s4717_s19  ;;  %v3024_v10 = vpop.f32.mrb[17].mxu0  ;;  %v6568_v35 = vcombine.low %v339_v18, %v339_v18 }
 0x197   :  { %v6557_v53 = vadd.f32 %v3024_v10, %v2671_v11  ;;  %v3026_v47 = vpop.f32.mrb[18].mxu0  ;;  %v1028_v30 = vpop.permute.xlu1 %1027  ;;  %v6577_v11 = vsel %vm602_vm1, %v969_v61, %v973_v19 }
 0x198   :  { %8533 = vst [vmem:[#allocation18_spill] sm:$0xff] %v6553_v17  ;;  %v6562_v0 = vadd.f32 %v3026_v47, %v2673_v9  ;;  %v1357_v7 = vpop.permute.xlu0 %1356  ;;  %v3028_v40 = vpop.f32.mrb[19].mxu0  ;;  %1516 = vrot.lane.b32.xlu1 %v6506_v3, %s4714_s25  ;;  %v1666_v27 = vsel %vm1624_vm2, %v5911_v4, %v1028_v30  ;;  %v983_v4 = vshll.u32 %v6568_v35, 16  ;;  %v125_v30 = vld [vmem:[%s8395_s0 + $0x19c] sm:$0xf] }
 0x199   :  { %8534 = vst [vmem:[#allocation19_spill] sm:$0xff] %v6557_v53  ;;  %v6566_v21 = vadd.f32 %v3028_v40, %v2675_v55  ;;  %v1893_v60 = vsel %vm1851_vm4, %v1828_v2, %v1357_v7  ;;  %v980_v55 = vrot.slane %v978_v54, 1  ;;  %v1751_v18 = vsel %vm1689_vm7, %v1666_v27, %v1189_v39  ;;  %v232_v39 = vld [vmem:[%s8396_s1 + $0x198] sm:$0xf]  ;;  %v233_v40 = vld [vmem:[%s8396_s1 + $0x19c] sm:$0xf] }
 0x19a   :  { %8535 = vst [vmem:[#allocation20_spill] sm:$0xff] %v6562_v0  ;;  %1442 = vrot.lane.b32.xlu0 %v6560_v31, %s4718_s20  ;;  %v6607_v27 = vsel %vm1051_vm0, %v1142_v63, %v1143_v8  ;;  %v341_v17 = vadd.bf16 %v233_v40, %v125_v30 }
 0x19b   :  { %8536 = vst [vmem:[#allocation21_spill] sm:$0xff] %v6566_v21  ;;  %v1501_v57 = vpop.permute.xlu1 %1500  ;;  %v340_v21 = vadd.bf16 %v232_v39, %v124_v58 }
 0x19c   :  { %v1427_v34 = vpop.permute.xlu0 %1426  ;;  %1206 = vrot.lane.b32.xlu1 %v6560_v31, %s4716_s12 }
 0x19d   :  { %v1978_v9 = vsel %vm1916_vm5, %v1893_v60, %v1427_v34  ;;  %v2055_v61 = vsel %vm2013_vm6, %v1427_v34, %v1501_v57  ;;  %v981_v57 = vor.u32 %v980_v55, %v976_v59  ;;  %v985_v60 = vrot.slane %v983_v4, 1  ;;  %v126_v59 = vld [vmem:[%s8395_s0 + $0x1a0] sm:$0x1] }
 0x19e   :  { %1610 = vrot.lane.b32.xlu0 %v6577_v11, %s4720_s24  ;;  %v2679_v1 = vpop.f32.mrb[20].mxu1  ;;  %2827 = vmatprep.mubr.bf16.mxu1 %v1978_v9  ;;  %v234_v55 = vld [vmem:[%s8396_s1 + $0x1a0] sm:$0x1]  ;;  %v6636_v39 = vcombine.low %v340_v21, %v341_v17  ;;  %v235_v21 = vld [vmem:[%s8396_s1 + $0x1a4] sm:$0xf] }
 0x19f   :  { %v2681_v10 = vpop.f32.mrb[21].mxu1  ;;  %2828 = vmatmul.mubr.bf16.gmra.mrb[80].mxu1 %v1751_v18  ;;  %v1191_v47 = vpop.permute.xlu1 %1190  ;;  %v342_v40 = vadd.bf16 %v234_v55, %v126_v59 }
 0x1a0   :  { %v1595_v19 = vpop.permute.xlu0 %1594  ;;  %v2683_v7 = vpop.f32.mrb[22].mxu1  ;;  %1374 = vrot.lane.b32.xlu1 %v6577_v11, %s4717_s19 }
 0x1a1   :  { %v2685_v54 = vpop.f32.mrb[23].mxu1  ;;  %v2140_v2 = vsel %vm2078_vm8, %v2055_v61, %v1595_v19 }
 0x1a2   :  { %1280 = vrot.lane.b32.xlu0 %v6506_v3, %s4715_s30  ;;  %v3032_v34 = vpop.f32.mrb[20].mxu0  ;;  %3181 = vmatmul.mubr.bf16.gmra.mrb[80].mxu0 %v2140_v2 }
 0x1a3   :  { %v6611_v9 = vadd.f32 %v3032_v34, %v2679_v1  ;;  %v3034_v18 = vpop.f32.mrb[21].mxu0  ;;  %v1359_v0 = vpop.permute.xlu1 %1358  ;;  %4456 = vmatprep.mubr.msk.bf16.mxu0 %vm1624_vm2, %v6180_v29  ;;  %v1307_v34 = vshll.u32 %v6636_v39, 16 }
 0x1a4   :  { %v6615_v61 = vadd.f32 %v3034_v18, %v2681_v10  ;;  %v1265_v63 = vpop.permute.xlu0 %1264  ;;  %v3036_v8 = vpop.f32.mrb[22].mxu0  ;;  %1444 = vrot.lane.b32.xlu1 %v6607_v27, %s4718_s20  ;;  %v6629_v10 = vsel %vm602_vm1, %v981_v57, %v985_v60  ;;  %v6658_v60 = vcombine.low %v342_v40, %v342_v40 }
 0x1a5   :  { %8537 = vst [vmem:[#allocation22_spill] sm:$0xff] %v6611_v9  ;;  %v1830_v4 = vsel %vm1786_vm3, %v1191_v47, %v1265_v63  ;;  %v6626_v29 = vadd.f32 %v3036_v8, %v2683_v7  ;;  %v3038_v1 = vpop.f32.mrb[23].mxu0 }
 0x1a6   :  { %8538 = vst [vmem:[#allocation23_spill] sm:$0xff] %v6615_v61  ;;  %v6631_v58 = vadd.f32 %v3038_v1, %v2685_v54  ;;  %1045 = vrot.lane.b32.xlu0 %v6499_v20, %s4719_s21  ;;  %v1895_v30 = vsel %vm1851_vm4, %v1830_v4, %v1359_v0  ;;  %v127_v20 = vld [vmem:[%s8395_s0 + $0x1a4] sm:$0xf]  ;;  %v128_v0 = vld [vmem:[%s8395_s0 + $0x1a8] sm:$0xf]  ;;  %v1145_v4 = vrot.slane %v6551_v23, 1 }
 0x1a7   :  { %8539 = vst [vmem:[#allocation24_spill] sm:$0xff] %v6626_v29  ;;  %v1429_v19 = vpop.permute.xlu1 %1428  ;;  %v343_v63 = vadd.bf16 %v235_v21, %v127_v20  ;;  %v129_v1 = vld [vmem:[%s8395_s0 + $0x1ac] sm:$0x1]  ;;  %v1312_v20 = vshll.u32 %v6658_v60, 16 }
 0x1a8   :  { %8540 = vst [vmem:[#allocation25_spill] sm:$0xff] %v6631_v58  ;;  %v1030_v2 = vpop.permute.xlu0 %1029  ;;  %1612 = vrot.lane.b32.xlu1 %v6629_v10, %s4720_s24  ;;  %v1981_v7 = vsel %vm1916_vm5, %v1895_v30, %v1429_v19  ;;  %v237_v30 = vld [vmem:[%s8396_s1 + $0x1ac] sm:$0x1] }
 0x1a9   :  { %v1668_v57 = vsel %vm1624_vm2, %v5952_v26, %v1030_v2  ;;  %2837 = vmatprep.mubr.bf16.mxu1 %v1981_v7  ;;  %v236_v26 = vld [vmem:[%s8396_s1 + $0x1a8] sm:$0xf]  ;;  %v1146_v2 = vrot.slane %v6568_v35, 1  ;;  %v1305_v7 = vshrl.u32 %v6636_v39, 16 }
 0x1aa   :  { %1518 = vrot.lane.b32.xlu0 %v6551_v23, %s4714_s25  ;;  %v1754_v17 = vsel %vm1689_vm7, %v1668_v57, %v1191_v47  ;;  %v344_v8 = vadd.bf16 %v236_v26, %v128_v0  ;;  %v1309_v57 = vrot.slane %v1307_v34, 1 }
 0x1ab   :  { %2838 = vmatmul.mubr.bf16.gmra.mrb[84].mxu1 %v1754_v17  ;;  %v1597_v54 = vpop.permute.xlu1 %1596 }
 0x1ac   :  { %v1503_v18 = vpop.permute.xlu0 %1502  ;;  %1282 = vrot.lane.b32.xlu1 %v6551_v23, %s4715_s30  ;;  %v1310_v58 = vor.u32 %v1309_v57, %v1305_v7 }
 0x1ad   :  { %v2057_v47 = vsel %vm2013_vm6, %v1429_v19, %v1503_v18  ;;  %v345_v18 = vadd.bf16 %v237_v30, %v129_v1 }
 0x1ae   :  { %1208 = vrot.lane.b32.xlu0 %v6607_v27, %s4716_s12  ;;  %v2689_v59 = vpop.f32.mrb[24].mxu1  ;;  %v2143_v55 = vsel %vm2078_vm8, %v2057_v47, %v1597_v54  ;;  %v6681_v54 = vcombine.low %v343_v63, %v344_v8 }
 0x1af   :  { %v2691_v40 = vpop.f32.mrb[25].mxu1  ;;  %3191 = vmatmul.mubr.bf16.gmra.mrb[84].mxu0 %v2143_v55  ;;  %v1267_v19 = vpop.permute.xlu1 %1266  ;;  %v6698_v1 = vcombine.low %v345_v18, %v345_v18 }
 0x1b0   :  { %v1193_v17 = vpop.permute.xlu0 %1192  ;;  %v2693_v0 = vpop.f32.mrb[26].mxu1  ;;  %1047 = vrot.lane.b32.xlu1 %v6577_v11, %s4719_s21  ;;  %4457 = vmatprep.mubr.msk.bf16.mxu0 %vm1624_vm2, %v6226_v5  ;;  %v6690_v11 = vsel %vm1051_vm0, %v1145_v4, %v1146_v2  ;;  %v1314_v5 = vrot.slane %v1312_v20, 1  ;;  %v1545_v30 = vshll.u32 %v6681_v54, 16 }
 0x1b1   :  { %v2695_v21 = vpop.f32.mrb[27].mxu1  ;;  %v3042_v26 = vpop.f32.mrb[24].mxu0  ;;  %v1832_v4 = vsel %vm1786_vm3, %v1193_v17, %v1267_v19  ;;  %v1543_v19 = vshrl.u32 %v6681_v54, 16 }
 0x1b2   :  { %v6683_v47 = vadd.f32 %v3042_v26, %v2689_v59  ;;  %1376 = vrot.lane.b32.xlu0 %v6629_v10, %s4717_s19  ;;  %v3044_v35 = vpop.f32.mrb[25].mxu0  ;;  %v1315_v7 = vsel %vm602_vm1, %v1310_v58, %v1314_v5  ;;  %v1547_v18 = vrot.slane %v1545_v30, 1 }
 0x1b3   :  { %v6687_v34 = vadd.f32 %v3044_v35, %v2691_v40  ;;  %v3046_v55 = vpop.f32.mrb[26].mxu0  ;;  %v1032_v29 = vpop.permute.xlu1 %1031 }
 0x1b4   :  { %v6692_v9 = vadd.f32 %v3046_v55, %v2693_v0  ;;  %v1361_v63 = vpop.permute.xlu0 %1360  ;;  %v3048_v8 = vpop.f32.mrb[27].mxu0  ;;  %1520 = vrot.lane.b32.xlu1 %v6636_v39, %s4714_s25  ;;  %v1670_v40 = vsel %vm1624_vm2, %v6021_v13, %v1032_v29  ;;  %v1383_v0 = vrot.slane %v6636_v39, 1  ;;  %v1550_v13 = vshll.u32 %v6698_v1, 16 }
 0x1b5   :  { %8541 = vst [vmem:[#allocation26_spill] sm:$0xff] %v6687_v34  ;;  %v6696_v59 = vadd.f32 %v3048_v8, %v2695_v21  ;;  %v1897_v57 = vsel %vm1851_vm4, %v1832_v4, %v1361_v63  ;;  %v1384_v21 = vrot.slane %v6658_v60, 1  ;;  %v1757_v58 = vsel %vm1689_vm7, %v1670_v40, %v1193_v17 }
 0x1b6   :  { %8542 = vst [vmem:[#allocation27_spill] sm:$0xff] %v6692_v9  ;;  %1446 = vrot.lane.b32.xlu0 %v6690_v11, %s4718_s20  ;;  %v1552_v9 = vrot.slane %v1550_v13, 1 }
 0x1b7   :  { %8543 = vst [vmem:[#allocation28_spill] sm:$0xff] %v6696_v59  ;;  %v1505_v2 = vpop.permute.xlu1 %1504  ;;  %v6721_v4 = vsel %vm1051_vm0, %v1383_v0, %v1384_v21 }
 0x1b8   :  { %v1431_v20 = vpop.permute.xlu0 %1430  ;;  %1210 = vrot.lane.b32.xlu1 %v6690_v11, %s4716_s12 }
 0x1b9   :  { %v1984_v26 = vsel %vm1916_vm5, %v1897_v57, %v1431_v20  ;;  %v2059_v5 = vsel %vm2013_vm6, %v1431_v20, %v1505_v2  ;;  %v1548_v57 = vor.u32 %v1547_v18, %v1543_v19 }
 0x1ba   :  { %1614 = vrot.lane.b32.xlu0 %v1315_v7, %s4720_s24  ;;  %v2699_v29 = vpop.f32.mrb[28].mxu1  ;;  %2847 = vmatprep.mubr.bf16.mxu1 %v1984_v26 }
 0x1bb   :  { %v2701_v35 = vpop.f32.mrb[29].mxu1  ;;  %2848 = vmatmul.mubr.bf16.gmra.mrb[88].mxu1 %v1757_v58  ;;  %v1195_v55 = vpop.permute.xlu1 %1194  ;;  %v1553_v19 = vsel %vm602_vm1, %v1548_v57, %v1552_v9 }
 0x1bc   :  { %v1599_v63 = vpop.permute.xlu0 %1598  ;;  %v2703_v60 = vpop.f32.mrb[30].mxu1  ;;  %1378 = vrot.lane.b32.xlu1 %v1315_v7, %s4717_s19 }
 0x1bd   :  { %v2705_v8 = vpop.f32.mrb[31].mxu1  ;;  %v2146_v30 = vsel %vm2078_vm8, %v2059_v5, %v1599_v63 }
 0x1be   :  { %1284 = vrot.lane.b32.xlu0 %v6636_v39, %s4715_s30  ;;  %v3052_v17 = vpop.f32.mrb[28].mxu0  ;;  %3201 = vmatmul.mubr.bf16.gmra.mrb[88].mxu0 %v2146_v30 }
 0x1bf   :  { %v6725_v40 = vadd.f32 %v3052_v17, %v2699_v29  ;;  %v3054_v2 = vpop.f32.mrb[29].mxu0  ;;  %v1363_v20 = vpop.permute.xlu1 %1362  ;;  %4458 = vmatprep.mubr.msk.bf16.mxu0 %vm1624_vm2, %v6300_v45 }
 0x1c0   :  { %v6729_v7 = vadd.f32 %v3054_v2, %v2701_v35  ;;  %v1269_v26 = vpop.permute.xlu0 %1268  ;;  %v3056_v58 = vpop.f32.mrb[30].mxu0  ;;  %1448 = vrot.lane.b32.xlu1 %v6721_v4, %s4718_s20 }
 0x1c1   :  { %8544 = vst [vmem:[#allocation29_spill] sm:$0xff] %v6725_v40  ;;  %v1834_v0 = vsel %vm1786_vm3, %v1195_v55, %v1269_v26  ;;  %v6734_v21 = vadd.f32 %v3056_v58, %v2703_v60  ;;  %v3058_v39 = vpop.f32.mrb[31].mxu0 }
 0x1c2   :  { %8545 = vst [vmem:[#allocation30_spill] sm:$0xff] %v6729_v7  ;;  %v6737_v18 = vadd.f32 %v3058_v39, %v2705_v8  ;;  %1049 = vrot.lane.b32.xlu0 %v6629_v10, %s4719_s21  ;;  %v1899_v45 = vsel %vm1851_vm4, %v1834_v0, %v1363_v20 }
 0x1c3   :  { %8546 = vst [vmem:[#allocation31_spill] sm:$0xff] %v6734_v21  ;;  %v1433_v13 = vpop.permute.xlu1 %1432 }
 0x1c4   :  { %8547 = vst [vmem:[#allocation32_spill] sm:$0xff] %v6737_v18  ;;  %v1034_v29 = vpop.permute.xlu0 %1033  ;;  %v1987_v35 = vsel %vm1916_vm5, %v1899_v45, %v1433_v13  ;;  %1616 = vrot.lane.b32.xlu1 %v1553_v19, %s4720_s24 }
 0x1c5   :  { %v1672_v5 = vsel %vm1624_vm2, %v6062_v32, %v1034_v29  ;;  %2857 = vmatprep.mubr.bf16.mxu1 %v1987_v35 }
 0x1c6   :  { %1522 = vrot.lane.b32.xlu0 %v6681_v54, %s4714_s25  ;;  %v1760_v9 = vsel %vm1689_vm7, %v1672_v5, %v1195_v55 }
 0x1c7   :  { %2858 = vmatmul.mubr.bf16.gmra.mrb[92].mxu1 %v1760_v9  ;;  %v1601_v63 = vpop.permute.xlu1 %1600 }
 0x1c8   :  { %v1507_v10 = vpop.permute.xlu0 %1506 }
 0x1c9   :  { %v2061_v60 = vsel %vm2013_vm6, %v1433_v13, %v1507_v10 }
 0x1ca   :  { %v2709_v8 = vpop.f32.mrb[32].mxu1  ;;  %v2149_v30 = vsel %vm2078_vm8, %v2061_v60, %v1601_v63 }
 0x1cb   :  { %v2711_v57 = vpop.f32.mrb[33].mxu1  ;;  %3211 = vmatmul.mubr.bf16.gmra.mrb[92].mxu0 %v2149_v30  ;;  %v1271_v17 = vpop.permute.xlu1 %1270 }
 0x1cc   :  { %v1197_v2 = vpop.permute.xlu0 %1196  ;;  %v2713_v20 = vpop.f32.mrb[34].mxu1  ;;  %4459 = vmatprep.mubr.msk.bf16.mxu0 %vm1624_vm2, %v6347_v50 }
 0x1cd   :  { %v2715_v32 = vpop.f32.mrb[35].mxu1  ;;  %v3062_v26 = vpop.f32.mrb[32].mxu0  ;;  %v1836_v5 = vsel %vm1786_vm3, %v1197_v2, %v1271_v17 }
 0x1ce   :  { %v6753_v58 = vadd.f32 %v3062_v26, %v2709_v8  ;;  %v3064_v55 = vpop.f32.mrb[33].mxu0 }
 0x1cf   :  { %v6755_v0 = vadd.f32 %v3064_v55, %v2711_v57  ;;  %v3066_v39 = vpop.f32.mrb[34].mxu0  ;;  %v1036_v19 = vpop.permute.xlu1 %1035 }
 0x1d0   :  { %8548 = vst [vmem:[#allocation33_spill] sm:$0xff] %v6753_v58  ;;  %v6757_v45 = vadd.f32 %v3066_v39, %v2713_v20  ;;  %v1365_v13 = vpop.permute.xlu0 %1364  ;;  %v3068_v29 = vpop.f32.mrb[35].mxu0  ;;  %v1674_v50 = vsel %vm1624_vm2, %v6131_v46, %v1036_v19 }
 0x1d1   :  { %8549 = vst [vmem:[#allocation34_spill] sm:$0xff] %v6755_v0  ;;  %v6759_v35 = vadd.f32 %v3068_v29, %v2715_v32  ;;  %v1901_v63 = vsel %vm1851_vm4, %v1836_v5, %v1365_v13  ;;  %v1763_v30 = vsel %vm1689_vm7, %v1674_v50, %v1197_v2 }
 0x1d2   :  { %8550 = vst [vmem:[#allocation35_spill] sm:$0xff] %v6757_v45 }
 0x1d3   :  { %8551 = vst [vmem:[#allocation36_spill] sm:$0xff] %v6759_v35  ;;  %v1509_v9 = vpop.permute.xlu1 %1508 }
 0x1d4   :  { %v1435_v10 = vpop.permute.xlu0 %1434 }
 0x1d5   :  { %v1990_v60 = vsel %vm1916_vm5, %v1901_v63, %v1435_v10  ;;  %v2063_v32 = vsel %vm2013_vm6, %v1435_v10, %v1509_v9 }
 0x1d6   :  { %v2719_v8 = vpop.f32.mrb[36].mxu1  ;;  %2867 = vmatprep.mubr.bf16.mxu1 %v1990_v60 }
 0x1d7   :  { %v2721_v57 = vpop.f32.mrb[37].mxu1  ;;  %2868 = vmatmul.mubr.bf16.gmra.mrb[96].mxu1 %v1763_v30  ;;  %v1199_v20 = vpop.permute.xlu1 %1198 }
 0x1d8   :  { %v1603_v26 = vpop.permute.xlu0 %1602  ;;  %v2723_v17 = vpop.f32.mrb[38].mxu1 }
 0x1d9   :  { %v2725_v55 = vpop.f32.mrb[39].mxu1  ;;  %v2152_v46 = vsel %vm2078_vm8, %v2063_v32, %v1603_v26 }
 0x1da   :  { %v3072_v39 = vpop.f32.mrb[36].mxu0  ;;  %3221 = vmatmul.mubr.bf16.gmra.mrb[96].mxu0 %v2152_v46 }
 0x1db   :  { %v6769_v19 = vadd.f32 %v3072_v39, %v2719_v8  ;;  %v3074_v13 = vpop.f32.mrb[37].mxu0  ;;  %v1367_v29 = vpop.permute.xlu1 %1366  ;;  %4460 = vmatprep.mubr.msk.bf16.mxu0 %vm1624_vm2, %v6430_v62 }
 0x1dc   :  { %v6773_v2 = vadd.f32 %v3074_v13, %v2721_v57  ;;  %v1273_v5 = vpop.permute.xlu0 %1272  ;;  %v3076_v50 = vpop.f32.mrb[38].mxu0 }
 0x1dd   :  { %8552 = vst [vmem:[#allocation37_spill] sm:$0xff] %v6769_v19  ;;  %v1838_v9 = vsel %vm1786_vm3, %v1199_v20, %v1273_v5  ;;  %v6776_v63 = vadd.f32 %v3076_v50, %v2723_v17  ;;  %v3078_v10 = vpop.f32.mrb[39].mxu0 }
 0x1de   :  { %8553 = vst [vmem:[#allocation38_spill] sm:$0xff] %v6773_v2  ;;  %v6778_v60 = vadd.f32 %v3078_v10, %v2725_v55  ;;  %v1903_v30 = vsel %vm1851_vm4, %v1838_v9, %v1367_v29 }
 0x1df   :  { %8554 = vst [vmem:[#allocation39_spill] sm:$0xff] %v6776_v63  ;;  %v1437_v8 = vpop.permute.xlu1 %1436 }
 0x1e0   :  { %8555 = vst [vmem:[#allocation40_spill] sm:$0xff] %v6778_v60  ;;  %v1038_v32 = vpop.permute.xlu0 %1037  ;;  %v1993_v26 = vsel %vm1916_vm5, %v1903_v30, %v1437_v8 }
 0x1e1   :  { %v1676_v62 = vsel %vm1624_vm2, %v6175_v52, %v1038_v32  ;;  %2877 = vmatprep.mubr.bf16.mxu1 %v1993_v26 }
 0x1e2   :  { %v1766_v57 = vsel %vm1689_vm7, %v1676_v62, %v1199_v20 }
 0x1e3   :  { %2878 = vmatmul.mubr.bf16.gmra.mrb[100].mxu1 %v1766_v57  ;;  %v1605_v46 = vpop.permute.xlu1 %1604 }
 0x1e4   :  { %v1511_v39 = vpop.permute.xlu0 %1510 }
 0x1e5   :  { %v2065_v17 = vsel %vm2013_vm6, %v1437_v8, %v1511_v39 }
 0x1e6   :  { %v2729_v13 = vpop.f32.mrb[40].mxu1  ;;  %v2155_v55 = vsel %vm2078_vm8, %v2065_v17, %v1605_v46 }
 0x1e7   :  { %v2731_v5 = vpop.f32.mrb[41].mxu1  ;;  %3231 = vmatmul.mubr.bf16.gmra.mrb[100].mxu0 %v2155_v55  ;;  %v1275_v29 = vpop.permute.xlu1 %1274 }
 0x1e8   :  { %v1201_v50 = vpop.permute.xlu0 %1200  ;;  %v2733_v9 = vpop.f32.mrb[42].mxu1  ;;  %4461 = vmatprep.mubr.msk.bf16.mxu0 %vm1624_vm2, %v6477_v33 }
 0x1e9   :  { %v2735_v52 = vpop.f32.mrb[43].mxu1  ;;  %v3082_v10 = vpop.f32.mrb[40].mxu0  ;;  %v1840_v17 = vsel %vm1786_vm3, %v1201_v50, %v1275_v29 }
 0x1ea   :  { %v6789_v30 = vadd.f32 %v3082_v10, %v2729_v13  ;;  %v3084_v20 = vpop.f32.mrb[41].mxu0 }
 0x1eb   :  { %v6791_v32 = vadd.f32 %v3084_v20, %v2731_v5  ;;  %v3086_v26 = vpop.f32.mrb[42].mxu0  ;;  %v1040_v8 = vpop.permute.xlu1 %1039 }
 0x1ec   :  { %8556 = vst [vmem:[#allocation41_spill] sm:$0xff] %v6789_v30  ;;  %v6793_v62 = vadd.f32 %v3086_v26, %v2733_v9  ;;  %v1369_v57 = vpop.permute.xlu0 %1368  ;;  %v3088_v46 = vpop.f32.mrb[43].mxu0  ;;  %v1678_v33 = vsel %vm1624_vm2, %v6247_v6, %v1040_v8 }
 0x1ed   :  { %8557 = vst [vmem:[#allocation42_spill] sm:$0xff] %v6791_v32  ;;  %v6795_v39 = vadd.f32 %v3088_v46, %v2735_v52  ;;  %v1905_v13 = vsel %vm1851_vm4, %v1840_v17, %v1369_v57  ;;  %v1769_v9 = vsel %vm1689_vm7, %v1678_v33, %v1201_v50 }
 0x1ee   :  { %8558 = vst [vmem:[#allocation43_spill] sm:$0xff] %v6793_v62 }
 0x1ef   :  { %8559 = vst [vmem:[#allocation44_spill] sm:$0xff] %v6795_v39  ;;  %v1513_v55 = vpop.permute.xlu1 %1512 }
 0x1f0   :  { %v1439_v10 = vpop.permute.xlu0 %1438 }
 0x1f1   :  { %v1996_v5 = vsel %vm1916_vm5, %v1905_v13, %v1439_v10  ;;  %v2067_v52 = vsel %vm2013_vm6, %v1439_v10, %v1513_v55 }
 0x1f2   :  { %v2739_v20 = vpop.f32.mrb[44].mxu1  ;;  %2887 = vmatprep.mubr.bf16.mxu1 %v1996_v5 }
 0x1f3   :  { %v2741_v26 = vpop.f32.mrb[45].mxu1  ;;  %2888 = vmatmul.mubr.bf16.gmra.mrb[104].mxu1 %v1769_v9  ;;  %v1203_v62 = vpop.permute.xlu1 %1202 }
 0x1f4   :  { %v1607_v46 = vpop.permute.xlu0 %1606  ;;  %v2743_v29 = vpop.f32.mrb[46].mxu1 }
 0x1f5   :  { %v2745_v39 = vpop.f32.mrb[47].mxu1  ;;  %v2158_v6 = vsel %vm2078_vm8, %v2067_v52, %v1607_v46 }
 0x1f6   :  { %v3092_v8 = vpop.f32.mrb[44].mxu0  ;;  %3241 = vmatmul.mubr.bf16.gmra.mrb[104].mxu0 %v2158_v6 }
 0x1f7   :  { %v6805_v57 = vadd.f32 %v3092_v8, %v2739_v20  ;;  %v3094_v17 = vpop.f32.mrb[45].mxu0  ;;  %v1371_v13 = vpop.permute.xlu1 %1370  ;;  %4462 = vmatprep.mubr.msk.bf16.mxu0 %vm1624_vm2, %v6560_v31 }
 0x1f8   :  { %v6809_v50 = vadd.f32 %v3094_v17, %v2741_v26  ;;  %v1277_v33 = vpop.permute.xlu0 %1276  ;;  %v3096_v5 = vpop.f32.mrb[46].mxu0 }
 0x1f9   :  { %8560 = vst [vmem:[#allocation45_spill] sm:$0xff] %v6805_v57  ;;  %v1842_v55 = vsel %vm1786_vm3, %v1203_v62, %v1277_v33  ;;  %v6812_v10 = vadd.f32 %v3096_v5, %v2743_v29  ;;  %v3098_v9 = vpop.f32.mrb[47].mxu0 }
 0x1fa   :  { %8561 = vst [vmem:[#allocation46_spill] sm:$0xff] %v6809_v50  ;;  %v6814_v30 = vadd.f32 %v3098_v9, %v2745_v39  ;;  %v1907_v52 = vsel %vm1851_vm4, %v1842_v55, %v1371_v13 }
 0x1fb   :  { %8562 = vst [vmem:[#allocation47_spill] sm:$0xff] %v6812_v10  ;;  %v1441_v20 = vpop.permute.xlu1 %1440 }
 0x1fc   :  { %8563 = vst [vmem:[#allocation48_spill] sm:$0xff] %v6814_v30  ;;  %v1042_v46 = vpop.permute.xlu0 %1041  ;;  %v1999_v6 = vsel %vm1916_vm5, %v1907_v52, %v1441_v20 }
 0x1fd   :  { %v1680_v31 = vsel %vm1624_vm2, %v6291_v43, %v1042_v46  ;;  %2897 = vmatprep.mubr.bf16.mxu1 %v1999_v6 }
 0x1fe   :  { %v1772_v26 = vsel %vm1689_vm7, %v1680_v31, %v1203_v62 }
 0x1ff   :  { %2898 = vmatmul.mubr.bf16.gmra.mrb[108].mxu1 %v1772_v26  ;;  %v1609_v8 = vpop.permute.xlu1 %1608 }
 0x200   :  { %v1515_v17 = vpop.permute.xlu0 %1514 }
 0x201   :  { %v2069_v29 = vsel %vm2013_vm6, %v1441_v20, %v1515_v17 }
 0x202   :  { %v2749_v33 = vpop.f32.mrb[48].mxu1  ;;  %v2161_v39 = vsel %vm2078_vm8, %v2069_v29, %v1609_v8 }
 0x203   :  { %v2751_v5 = vpop.f32.mrb[49].mxu1  ;;  %3251 = vmatmul.mubr.bf16.gmra.mrb[108].mxu0 %v2161_v39  ;;  %v1279_v13 = vpop.permute.xlu1 %1278 }
 0x204   :  { %v1205_v55 = vpop.permute.xlu0 %1204  ;;  %v2753_v9 = vpop.f32.mrb[50].mxu1  ;;  %4463 = vmatprep.mubr.msk.bf16.mxu0 %vm1624_vm2, %v6607_v27 }
 0x205   :  { %v2755_v43 = vpop.f32.mrb[51].mxu1  ;;  %v3102_v52 = vpop.f32.mrb[48].mxu0  ;;  %v1844_v39 = vsel %vm1786_vm3, %v1205_v55, %v1279_v13 }
 0x206   :  { %v6825_v46 = vadd.f32 %v3102_v52, %v2749_v33  ;;  %v3104_v62 = vpop.f32.mrb[49].mxu0 }
 0x207   :  { %v6827_v6 = vadd.f32 %v3104_v62, %v2751_v5  ;;  %v3106_v31 = vpop.f32.mrb[50].mxu0  ;;  %v1044_v20 = vpop.permute.xlu1 %1043 }
 0x208   :  { %8564 = vst [vmem:[#allocation49_spill] sm:$0xff] %v6825_v46  ;;  %v6829_v26 = vadd.f32 %v3106_v31, %v2753_v9  ;;  %v1373_v8 = vpop.permute.xlu0 %1372  ;;  %v3108_v17 = vpop.f32.mrb[51].mxu0  ;;  %v1682_v27 = vsel %vm1624_vm2, %v6376_v42, %v1044_v20 }
 0x209   :  { %8565 = vst [vmem:[#allocation50_spill] sm:$0xff] %v6827_v6  ;;  %v6831_v29 = vadd.f32 %v3108_v17, %v2755_v43  ;;  %v1909_v33 = vsel %vm1851_vm4, %v1844_v39, %v1373_v8  ;;  %v1775_v9 = vsel %vm1689_vm7, %v1682_v27, %v1205_v55 }
 0x20a   :  { %8566 = vst [vmem:[#allocation51_spill] sm:$0xff] %v6829_v26 }
 0x20b   :  { %8567 = vst [vmem:[#allocation52_spill] sm:$0xff] %v6831_v29  ;;  %v1517_v10 = vpop.permute.xlu1 %1516 }
 0x20c   :  { %v1443_v52 = vpop.permute.xlu0 %1442 }
 0x20d   :  { %v2002_v5 = vsel %vm1916_vm5, %v1909_v33, %v1443_v52  ;;  %v2071_v43 = vsel %vm2013_vm6, %v1443_v52, %v1517_v10 }
 0x20e   :  { %v2759_v62 = vpop.f32.mrb[52].mxu1  ;;  %2907 = vmatprep.mubr.bf16.mxu1 %v2002_v5 }
 0x20f   :  { %v2761_v31 = vpop.f32.mrb[53].mxu1  ;;  %2908 = vmatmul.mubr.bf16.gmra.mrb[112].mxu1 %v1775_v9  ;;  %v1207_v26 = vpop.permute.xlu1 %1206 }
 0x210   :  { %v1611_v17 = vpop.permute.xlu0 %1610  ;;  %v2763_v13 = vpop.f32.mrb[54].mxu1 }
 0x211   :  { %v2765_v29 = vpop.f32.mrb[55].mxu1  ;;  %v2164_v42 = vsel %vm2078_vm8, %v2071_v43, %v1611_v17 }
 0x212   :  { %v3112_v20 = vpop.f32.mrb[52].mxu0  ;;  %3261 = vmatmul.mubr.bf16.gmra.mrb[112].mxu0 %v2164_v42 }
 0x213   :  { %v6841_v8 = vadd.f32 %v3112_v20, %v2759_v62  ;;  %v3114_v39 = vpop.f32.mrb[53].mxu0  ;;  %v1375_v33 = vpop.permute.xlu1 %1374  ;;  %4464 = vmatprep.mubr.msk.bf16.mxu0 %vm1624_vm2, %v6690_v11 }
 0x214   :  { %v6845_v55 = vadd.f32 %v3114_v39, %v2761_v31  ;;  %v1281_v27 = vpop.permute.xlu0 %1280  ;;  %v3116_v5 = vpop.f32.mrb[54].mxu0 }
 0x215   :  { %8568 = vst [vmem:[#allocation53_spill] sm:$0xff] %v6841_v8  ;;  %v1846_v10 = vsel %vm1786_vm3, %v1207_v26, %v1281_v27  ;;  %v6848_v52 = vadd.f32 %v3116_v5, %v2763_v13  ;;  %v3118_v9 = vpop.f32.mrb[55].mxu0 }
 0x216   :  { %8569 = vst [vmem:[#allocation54_spill] sm:$0xff] %v6845_v55  ;;  %v6850_v46 = vadd.f32 %v3118_v9, %v2765_v29  ;;  %v1911_v43 = vsel %vm1851_vm4, %v1846_v10, %v1375_v33 }
 0x217   :  { %8570 = vst [vmem:[#allocation55_spill] sm:$0xff] %v6848_v52  ;;  %v1445_v62 = vpop.permute.xlu1 %1444 }
 0x218   :  { %8571 = vst [vmem:[#allocation56_spill] sm:$0xff] %v6850_v46  ;;  %v1046_v17 = vpop.permute.xlu0 %1045  ;;  %v2005_v42 = vsel %vm1916_vm5, %v1911_v43, %v1445_v62 }
 0x219   :  { %v1684_v11 = vsel %vm1624_vm2, %v6421_v16, %v1046_v17  ;;  %2917 = vmatprep.mubr.bf16.mxu1 %v2005_v42 }
 0x21a   :  { %v1778_v31 = vsel %vm1689_vm7, %v1684_v11, %v1207_v26 }
 0x21b   :  { %2918 = vmatmul.mubr.bf16.gmra.mrb[116].mxu1 %v1778_v31  ;;  %v1613_v20 = vpop.permute.xlu1 %1612 }
 0x21c   :  { %v1519_v39 = vpop.permute.xlu0 %1518 }
 0x21d   :  { %v2073_v13 = vsel %vm2013_vm6, %v1445_v62, %v1519_v39 }
 0x21e   :  { %v2769_v27 = vpop.f32.mrb[56].mxu1  ;;  %v2167_v29 = vsel %vm2078_vm8, %v2073_v13, %v1613_v20 }
 0x21f   :  { %v2771_v5 = vpop.f32.mrb[57].mxu1  ;;  %3271 = vmatmul.mubr.bf16.gmra.mrb[116].mxu0 %v2167_v29  ;;  %v1283_v33 = vpop.permute.xlu1 %1282 }
 0x220   :  { %v1209_v10 = vpop.permute.xlu0 %1208  ;;  %v2773_v9 = vpop.f32.mrb[58].mxu1  ;;  %4465 = vmatprep.mubr.msk.bf16.mxu0 %vm1624_vm2, %v6721_v4 }
 0x221   :  { %v2775_v16 = vpop.f32.mrb[59].mxu1  ;;  %v3122_v43 = vpop.f32.mrb[56].mxu0  ;;  %v1848_v29 = vsel %vm1786_vm3, %v1209_v10, %v1283_v33 }
 0x222   :  { %v6861_v17 = vadd.f32 %v3122_v43, %v2769_v27  ;;  %v3124_v26 = vpop.f32.mrb[57].mxu0 }
 0x223   :  { %v6863_v42 = vadd.f32 %v3124_v26, %v2771_v5  ;;  %v3126_v11 = vpop.f32.mrb[58].mxu0  ;;  %v1048_v62 = vpop.permute.xlu1 %1047  ;;  %v1621_v5 = vrot.slane %v6681_v54, 1  ;;  %v1622_v26 = vrot.slane %v6698_v1, 1 }
 0x224   :  { %8572 = vst [vmem:[#allocation57_spill] sm:$0xff] %v6861_v17  ;;  %v6865_v31 = vadd.f32 %v3126_v11, %v2773_v9  ;;  %v1377_v20 = vpop.permute.xlu0 %1376  ;;  %v3128_v39 = vpop.f32.mrb[59].mxu0  ;;  %v1686_v4 = vsel %vm1624_vm2, %v6506_v3, %v1048_v62 }
 0x225   :  { %8573 = vst [vmem:[#allocation58_spill] sm:$0xff] %v6863_v42  ;;  %v6867_v13 = vadd.f32 %v3128_v39, %v2775_v16  ;;  %v1913_v27 = vsel %vm1851_vm4, %v1848_v29, %v1377_v20  ;;  %v1781_v16 = vsel %vm1689_vm7, %v1686_v4, %v1209_v10  ;;  %v1623_v20 = vsel %vm1051_vm0, %v1621_v5, %v1622_v26 }
 0x226   :  { %8574 = vst [vmem:[#allocation59_spill] sm:$0xff] %v6865_v31 }
 0x227   :  { %8575 = vst [vmem:[#allocation60_spill] sm:$0xff] %v6867_v13  ;;  %v1521_v52 = vpop.permute.xlu1 %1520 }
 0x228   :  { %v1447_v43 = vpop.permute.xlu0 %1446 }
 0x229   :  { %v2008_v9 = vsel %vm1916_vm5, %v1913_v27, %v1447_v43  ;;  %v2075_v31 = vsel %vm2013_vm6, %v1447_v43, %v1521_v52 }
 0x22a   :  { %v2779_v11 = vpop.f32.mrb[60].mxu1  ;;  %2927 = vmatprep.mubr.bf16.mxu1 %v2008_v9 }
 0x22b   :  { %v2781_v39 = vpop.f32.mrb[61].mxu1  ;;  %2928 = vmatmul.mubr.bf16.gmra.mrb[120].mxu1 %v1781_v16  ;;  %v1211_v33 = vpop.permute.xlu1 %1210 }
 0x22c   :  { %v1615_v3 = vpop.permute.xlu0 %1614  ;;  %v2783_v62 = vpop.f32.mrb[62].mxu1 }
 0x22d   :  { %v2785_v29 = vpop.f32.mrb[63].mxu1  ;;  %v2170_v54 = vsel %vm2078_vm8, %v2075_v31, %v1615_v3 }
 0x22e   :  { %v3132_v13 = vpop.f32.mrb[60].mxu0  ;;  %3281 = vmatmul.mubr.bf16.gmra.mrb[120].mxu0 %v2170_v54 }
 0x22f   :  { %v6880_v1 = vadd.f32 %v3132_v13, %v2779_v11  ;;  %v3134_v27 = vpop.f32.mrb[61].mxu0  ;;  %v1379_v9 = vpop.permute.xlu1 %1378  ;;  %4466 = vmatprep.mubr.msk.bf16.mxu0 %vm1624_vm2, %v1623_v20 }
 0x230   :  { %v6883_v10 = vadd.f32 %v3134_v27, %v2781_v39  ;;  %v1285_v4 = vpop.permute.xlu0 %1284  ;;  %v3136_v16 = vpop.f32.mrb[62].mxu0 }
 0x231   :  { %8576 = vst [vmem:[#allocation61_spill] sm:$0xff] %v6880_v1  ;;  %v1850_v52 = vsel %vm1786_vm3, %v1211_v33, %v1285_v4  ;;  %v6886_v43 = vadd.f32 %v3136_v16, %v2783_v62  ;;  %v3138_v5 = vpop.f32.mrb[63].mxu0 }
 0x232   :  { %8577 = vst [vmem:[#allocation62_spill] sm:$0xff] %v6883_v10  ;;  %v6888_v26 = vadd.f32 %v3138_v5, %v2785_v29  ;;  %v1915_v31 = vsel %vm1851_vm4, %v1850_v52, %v1379_v9 }
 0x233   :  { %8578 = vst [vmem:[#allocation63_spill] sm:$0xff] %v6886_v43  ;;  %v1449_v3 = vpop.permute.xlu1 %1448 }
 0x234   :  { %8579 = vst [vmem:[#allocation64_spill] sm:$0xff] %v6888_v26  ;;  %v1050_v13 = vpop.permute.xlu0 %1049  ;;  %v2011_v11 = vsel %vm1916_vm5, %v1915_v31, %v1449_v3 }
 0x235   :  { %v1688_v20 = vsel %vm1624_vm2, %v6551_v23, %v1050_v13  ;;  %2937 = vmatprep.mubr.bf16.mxu1 %v2011_v11 }
 0x236   :  { %v1784_v39 = vsel %vm1689_vm7, %v1688_v20, %v1211_v33 }
 0x237   :  { %2938 = vmatmul.mubr.bf16.gmra.mrb[124].mxu1 %v1784_v39  ;;  %v1617_v54 = vpop.permute.xlu1 %1616 }
 0x238   :  { %v1523_v27 = vpop.permute.xlu0 %1522 }
 0x239   :  { %v2077_v62 = vsel %vm2013_vm6, %v1449_v3, %v1523_v27 }
 0x23a   :  { %v2789_v4 = vpop.f32.mrb[64].mxu1  ;;  %v2173_v29 = vsel %vm2078_vm8, %v2077_v62, %v1617_v54 }
 0x23b   :  { %v2791_v16 = vpop.f32.mrb[65].mxu1  ;;  %3291 = vmatmul.mubr.bf16.gmra.mrb[124].mxu0 %v2173_v29 }
 0x23c   :  { %v2793_v9 = vpop.f32.mrb[66].mxu1 }
 0x23d   :  { %v2795_v52 = vpop.f32.mrb[67].mxu1  ;;  %v3142_v5 = vpop.f32.mrb[64].mxu0 }
 0x23e   :  { %v6897_v31 = vadd.f32 %v3142_v5, %v2789_v4  ;;  %v3144_v43 = vpop.f32.mrb[65].mxu0 }
 0x23f   :  { %v6899_v23 = vadd.f32 %v3144_v43, %v2791_v16  ;;  %v3146_v13 = vpop.f32.mrb[66].mxu0 }
 0x240   :  { %8580 = vst [vmem:[#allocation65_spill] sm:$0xff] %v6897_v31  ;;  %v6901_v33 = vadd.f32 %v3146_v13, %v2793_v9  ;;  %v3148_v11 = vpop.f32.mrb[67].mxu0  ;;  %v3508_v9 = vmul.f32 %v6309_v28, %v6309_v28  ;;  %v3507_v13 = vmul.f32 %v6302_v22, %v6302_v22 }
 0x241   :  { %8581 = vst [vmem:[#allocation66_spill] sm:$0xff] %v6899_v23  ;;  %v6903_v20 = vadd.f32 %v3148_v11, %v2795_v52  ;;  %v3506_v52 = vmul.f32 %v6297_v15, %v6297_v15  ;;  %v3510_v11 = vmul.f32 %v6355_v56, %v6355_v56 }
 0x242   :  { %8582 = vst [vmem:[#allocation67_spill] sm:$0xff] %v6901_v33 }
 0x243   :  { %8583 = vst [vmem:[#allocation68_spill] sm:$0xff] %v6903_v20  ;;  %v3705_v33 = vsel %vm1851_vm4, %v3510_v11, 0.0  ;;  %v3512_v20 = vmul.f32 %v6371_v37, %v6371_v37 }
 0x246   :  { %v2799_v3 = vpop.f32.mrb[68].mxu1 }
 0x247   :  { %v2801_v39 = vpop.f32.mrb[69].mxu1 }
 0x248   :  { %v2803_v27 = vpop.f32.mrb[70].mxu1 }
 0x249   :  { %v2805_v54 = vpop.f32.mrb[71].mxu1 }
 0x24a   :  { %v3152_v62 = vpop.f32.mrb[68].mxu0 }
 0x24b   :  { %v6905_v29 = vadd.f32 %v3152_v62, %v2799_v3  ;;  %v3154_v26 = vpop.f32.mrb[69].mxu0  ;;  %v3371_v3 = vsel %vm1851_vm4, %v6309_v28, 0.0  ;;  %v3370_v62 = vsel %vm1851_vm4, %v6297_v15, 0.0 }
 0x24c   :  { %v6907_v1 = vadd.f32 %v3154_v26, %v2801_v39  ;;  %v3156_v4 = vpop.f32.mrb[70].mxu0  ;;  %v3505_v26 = vmul.f32 %v6295_v48, %v6295_v48  ;;  %v3703_v39 = vsel %vm1851_vm4, %v3508_v9, 0.0 }
 0x24d   :  { %8584 = vst [vmem:[#allocation69_spill] sm:$0xff] %v6905_v29  ;;  %v6909_v5 = vadd.f32 %v3156_v4, %v2803_v27  ;;  %v3158_v43 = vpop.f32.mrb[71].mxu0  ;;  %v3509_v27 = vmul.f32 %v6351_v36, %v6351_v36  ;;  %v3373_v29 = vsel %vm1851_vm4, %v6355_v56, 0.0 }
 0x24e   :  { %8585 = vst [vmem:[#allocation70_spill] sm:$0xff] %v6907_v1  ;;  %v6911_v16 = vadd.f32 %v3158_v43, %v2805_v54  ;;  %v3702_v43 = vsel %vm1851_vm4, %v3506_v52, 0.0  ;;  %v3372_v1 = vadd.f32 %v3371_v3, %v3370_v62  ;;  %v3514_v3 = vmul.f32 %v6427_v38, %v6427_v38 }
 0x24f   :  { %8586 = vst [vmem:[#allocation71_spill] sm:$0xff] %v6909_v5  ;;  %v3301_v5 = vadd.f32 %v6302_v22, %v6295_v48  ;;  %v3704_v9 = vadd.f32 %v3703_v39, %v3702_v43  ;;  %v3511_v22 = vmul.f32 %v6366_v24, %v6366_v24  ;;  %v3375_v43 = vsel %vm1851_vm4, %v6371_v37, 0.0 }
 0x250   :  { %8587 = vst [vmem:[#allocation72_spill] sm:$0xff] %v6911_v16  ;;  %v3633_v16 = vadd.f32 %v3507_v13, %v3505_v26  ;;  %v3374_v56 = vadd.f32 %v3373_v29, %v3372_v1 }
 0x251   :  { %v3302_v23 = vadd.f32 %v3301_v5, %v6351_v36  ;;  %v3706_v62 = vadd.f32 %v3705_v33, %v3704_v9  ;;  %v3513_v5 = vmul.f32 %v6423_v14, %v6423_v14  ;;  %v3709_v9 = vsel %vm1851_vm4, %v3514_v3, 0.0 }
 0x252   :  { %v3634_v52 = vadd.f32 %v3633_v16, %v3509_v27  ;;  %v3376_v33 = vadd.f32 %v3375_v43, %v3374_v56  ;;  %v3379_v56 = vsel %vm1851_vm4, %v6436_v51, 0.0 }
 0x253   :  { %v3303_v1 = vadd.f32 %v3302_v23, %v6366_v24 }
 0x254   :  { %v3635_v29 = vadd.f32 %v3634_v52, %v3511_v22  ;;  %v3518_v22 = vmul.f32 %v6485_v41, %v6485_v41  ;;  %v3517_v52 = vmul.f32 %v6481_v25, %v6481_v25 }
 0x256   :  { %v2809_v54 = vpop.f32.mrb[72].mxu1 }
 0x257   :  { %v2811_v4 = vpop.f32.mrb[73].mxu1 }
 0x258   :  { %v2813_v28 = vpop.f32.mrb[74].mxu1 }
 0x259   :  { %v2815_v31 = vpop.f32.mrb[75].mxu1  ;;  %v3162_v15 = vpop.f32.mrb[72].mxu0 }
 0x25a   :  { %v6941_v13 = vadd.f32 %v3162_v15, %v2809_v54  ;;  %v3164_v26 = vpop.f32.mrb[73].mxu0  ;;  %v3707_v15 = vsel %vm1851_vm4, %v3512_v20, 0.0 }
 0x25b   :  { %v6945_v39 = vadd.f32 %v3164_v26, %v2811_v4  ;;  %v3166_v11 = vpop.f32.mrb[74].mxu0  ;;  %v3377_v4 = vsel %vm1851_vm4, %v6427_v38, 0.0  ;;  %v3516_v26 = vmul.f32 %v6436_v51, %v6436_v51  ;;  %v3708_v37 = vadd.f32 %v3707_v15, %v3706_v62 }
 0x25c   :  { %v6951_v16 = vadd.f32 %v3166_v11, %v2813_v28  ;;  %v3168_v27 = vpop.f32.mrb[75].mxu0  ;;  %v3304_v28 = vadd.f32 %v3303_v1, %v6423_v14  ;;  %v3636_v11 = vadd.f32 %v3635_v29, %v3513_v5  ;;  %v3378_v20 = vadd.f32 %v3377_v4, %v3376_v33 }
 0x25d   :  { %v6954_v54 = vadd.f32 %v3168_v27, %v2815_v31  ;;  %v3515_v31 = vmul.f32 %v6432_v49, %v6432_v49  ;;  %v3710_v23 = vadd.f32 %v3709_v9, %v3708_v37  ;;  %v3711_v62 = vsel %vm1851_vm4, %v3516_v26, 0.0 }
 0x25e   :  { %8588 = vst [vmem:[#allocation73_spill] sm:$0xff] %v6951_v16  ;;  %v3305_v5 = vadd.f32 %v3304_v28, %v6432_v49  ;;  %v3381_v15 = vsel %vm1851_vm4, %v6485_v41, 0.0  ;;  %v3380_v29 = vadd.f32 %v3379_v56, %v3378_v20  ;;  %v3713_v37 = vsel %vm1851_vm4, %v3518_v22, 0.0  ;;  %v8591_v49 = vld [vmem:[#allocation18_spill] sm:$0xff] }
 0x25f   :  { %8589 = vst [vmem:[#allocation74_spill] sm:$0xff] %v6954_v54  ;;  %v3637_v27 = vadd.f32 %v3636_v11, %v3515_v31  ;;  %v3520_v4 = vmul.f32 %v6501_v12, %v6501_v12  ;;  %v3712_v9 = vadd.f32 %v3711_v62, %v3710_v23  ;;  %v3519_v26 = vmul.f32 %v6496_v44, %v6496_v44 }
 0x260   :  { %v3306_v51 = vadd.f32 %v3305_v5, %v6481_v25  ;;  %v3382_v11 = vadd.f32 %v3381_v15, %v3380_v29  ;;  %v3522_v31 = vmul.f32 %v6557_v53, %v6557_v53  ;;  %v3383_v56 = vsel %vm1851_vm4, %v6501_v12, 0.0  ;;  %v8594_v25 = vld [vmem:[#allocation21_spill] sm:$0xff] }
 0x261   :  { %v3638_v38 = vadd.f32 %v3637_v27, %v3517_v52  ;;  %v3714_v22 = vadd.f32 %v3713_v37, %v3712_v9  ;;  %v3521_v23 = vmul.f32 %v8591_v49, %v8591_v49  ;;  %v3715_v5 = vsel %vm1851_vm4, %v3520_v4, 0.0 }
 0x262   :  { %v2819_v3 = vpop.f32.mrb[76].mxu1  ;;  %v3307_v29 = vadd.f32 %v3306_v51, %v6496_v44  ;;  %v3385_v37 = vsel %vm1851_vm4, %v6557_v53, 0.0  ;;  %v3717_v12 = vsel %vm1851_vm4, %v3522_v31, 0.0 }
 0x263   :  { %v2821_v43 = vpop.f32.mrb[77].mxu1 }
 0x264   :  { %v2823_v1 = vpop.f32.mrb[78].mxu1  ;;  %v3308_v4 = vadd.f32 %v3307_v29, %v8591_v49 }
 0x265   :  { %v2825_v33 = vpop.f32.mrb[79].mxu1 }
 0x266   :  { %v3172_v28 = vpop.f32.mrb[76].mxu0 }
 0x267   :  { %v6983_v41 = vadd.f32 %v3172_v28, %v2819_v3  ;;  %v3174_v20 = vpop.f32.mrb[77].mxu0  ;;  %v3639_v3 = vadd.f32 %v3638_v38, %v3519_v26  ;;  %v3384_v28 = vadd.f32 %v3383_v56, %v3382_v11  ;;  %v3526_v38 = vmul.f32 %v6615_v61, %v6615_v61  ;;  %v8596_v11 = vld [vmem:[#allocation22_spill] sm:$0xff] }
 0x268   :  { %v6989_v62 = vadd.f32 %v3174_v20, %v2821_v43  ;;  %v3176_v52 = vpop.f32.mrb[78].mxu0  ;;  %v3524_v43 = vmul.f32 %v8594_v25, %v8594_v25  ;;  %v3716_v20 = vadd.f32 %v3715_v5, %v3714_v22  ;;  %v3525_v31 = vmul.f32 %v8596_v11, %v8596_v11 }
 0x269   :  { %8590 = vst [vmem:[#allocation75_spill] sm:$0xff] %v6983_v41  ;;  %v6992_v27 = vadd.f32 %v3176_v52, %v2823_v1  ;;  %v3178_v15 = vpop.f32.mrb[79].mxu0  ;;  %v3640_v1 = vadd.f32 %v3639_v3, %v3521_v23  ;;  %v8595_v52 = vld [vmem:[#allocation20_spill] sm:$0xff]  ;;  %v3386_v51 = vadd.f32 %v3385_v37, %v3384_v28  ;;  %v3389_v23 = vsel %vm1851_vm4, %v6615_v61, 0.0  ;;  %v8597_v3 = vld [vmem:[#allocation25_spill] sm:$0xff] }
 0x26a   :  { %8592 = vst [vmem:[#allocation76_spill] sm:$0xff] %v6989_v62  ;;  %v6997_v9 = vadd.f32 %v3178_v15, %v2825_v33  ;;  %v3523_v14 = vmul.f32 %v8595_v52, %v8595_v52  ;;  %v3718_v26 = vadd.f32 %v3717_v12, %v3716_v20  ;;  %v3387_v33 = vsel %vm1851_vm4, %v8594_v25, 0.0  ;;  %v8598_v25 = vld [vmem:[#allocation24_spill] sm:$0xff] }
 0x26b   :  { %v3719_v56 = vsel %vm1851_vm4, %v3524_v43, 0.0  ;;  %v3309_v22 = vadd.f32 %v3308_v4, %v8595_v52  ;;  %v3388_v15 = vadd.f32 %v3387_v33, %v3386_v51  ;;  %v3721_v29 = vsel %vm1851_vm4, %v3526_v38, 0.0 }
 0x26c   :  { %8593 = vst [vmem:[#allocation77_spill] sm:$0xff] %v6997_v9  ;;  %v3641_v5 = vadd.f32 %v3640_v1, %v3523_v14  ;;  %v3528_v12 = vmul.f32 %v8597_v3, %v8597_v3  ;;  %v3720_v37 = vadd.f32 %v3719_v56, %v3718_v26  ;;  %v3527_v53 = vmul.f32 %v8598_v25, %v8598_v25 }
 0x26d   :  { %v3310_v28 = vadd.f32 %v3309_v22, %v8596_v11  ;;  %v3390_v49 = vadd.f32 %v3389_v23, %v3388_v15  ;;  %v3530_v14 = vmul.f32 %v6687_v34, %v6687_v34  ;;  %v3391_v51 = vsel %vm1851_vm4, %v8597_v3, 0.0 }
 0x26e   :  { %v3642_v20 = vadd.f32 %v3641_v5, %v3525_v31  ;;  %v3722_v1 = vadd.f32 %v3721_v29, %v3720_v37  ;;  %v3529_v38 = vmul.f32 %v6683_v47, %v6683_v47  ;;  %v3723_v33 = vsel %vm1851_vm4, %v3528_v12, 0.0 }
 0x26f   :  { %v3311_v22 = vadd.f32 %v3310_v28, %v8598_v25  ;;  %v3393_v23 = vsel %vm1851_vm4, %v6687_v34, 0.0  ;;  %v3392_v37 = vadd.f32 %v3391_v51, %v3390_v49  ;;  %v3725_v3 = vsel %vm1851_vm4, %v3530_v14, 0.0 }
 0x270   :  { %v3643_v5 = vadd.f32 %v3642_v20, %v3527_v53  ;;  %v3532_v61 = vmul.f32 %v6696_v59, %v6696_v59  ;;  %v3724_v52 = vadd.f32 %v3723_v33, %v3722_v1  ;;  %v3534_v49 = vmul.f32 %v6729_v7, %v6729_v7 }
 0x271   :  { %v3312_v44 = vadd.f32 %v3311_v22, %v6683_v47  ;;  %v3394_v34 = vadd.f32 %v3393_v23, %v3392_v37  ;;  %v3397_v33 = vsel %vm1851_vm4, %v6729_v7, 0.0 }
 0x272   :  { %v2829_v43 = vpop.f32.mrb[80].mxu1  ;;  %v3644_v28 = vadd.f32 %v3643_v5, %v3529_v38  ;;  %v3726_v51 = vadd.f32 %v3725_v3, %v3724_v52  ;;  %v3727_v1 = vsel %vm1851_vm4, %v3532_v61, 0.0  ;;  %v3533_v38 = vmul.f32 %v6725_v40, %v6725_v40 }
 0x273   :  { %v2831_v4 = vpop.f32.mrb[81].mxu1  ;;  %v3729_v23 = vsel %vm1851_vm4, %v3534_v49, 0.0  ;;  %v3536_v52 = vmul.f32 %v6737_v18, %v6737_v18 }
 0x274   :  { %v2833_v26 = vpop.f32.mrb[82].mxu1  ;;  %v3728_v3 = vadd.f32 %v3727_v1, %v3726_v51  ;;  %v3537_v51 = vmul.f32 %v6753_v58, %v6753_v58 }
 0x275   :  { %v2835_v31 = vpop.f32.mrb[83].mxu1  ;;  %v3182_v56 = vpop.f32.mrb[80].mxu0  ;;  %v3731_v49 = vsel %vm1851_vm4, %v3536_v52, 0.0  ;;  %v3540_v52 = vmul.f32 %v6759_v35, %v6759_v35 }
 0x276   :  { %v7031_v15 = vadd.f32 %v3182_v56, %v2829_v43  ;;  %v3184_v29 = vpop.f32.mrb[81].mxu0  ;;  %v8599_v43 = vld [vmem:[#allocation27_spill] sm:$0xff] }
 0x277   :  { %v7036_v11 = vadd.f32 %v3184_v29, %v2831_v4  ;;  %v3186_v12 = vpop.f32.mrb[82].mxu0  ;;  %v3531_v56 = vmul.f32 %v8599_v43, %v8599_v43  ;;  %v3395_v4 = vsel %vm1851_vm4, %v6696_v59, 0.0  ;;  %v8630_v59 = vld [vmem:[#allocation71_spill] sm:$0xff] }
 0x278   :  { %v7039_v53 = vadd.f32 %v3186_v12, %v2833_v26  ;;  %v3188_v20 = vpop.f32.mrb[83].mxu0  ;;  %v3313_v26 = vadd.f32 %v3312_v44, %v8599_v43  ;;  %v3396_v5 = vadd.f32 %v3395_v4, %v3394_v34  ;;  %v3535_v12 = vmul.f32 %v6734_v21, %v6734_v21 }
 0x279   :  { %v7045_v14 = vadd.f32 %v3188_v20, %v2835_v31  ;;  %v3645_v22 = vadd.f32 %v3644_v28, %v3531_v56  ;;  %v3730_v20 = vadd.f32 %v3729_v23, %v3728_v3  ;;  %v3399_v28 = vsel %vm1851_vm4, %v6737_v18, 0.0 }
 0x27a   :  { %v3314_v31 = vadd.f32 %v3313_v26, %v6725_v40  ;;  %v3398_v37 = vadd.f32 %v3397_v33, %v3396_v5  ;;  %v3538_v34 = vmul.f32 %v6755_v0, %v6755_v0 }
 0x27b   :  { %8600 = vst [vmem:[#allocation24_spill] sm:$0xff] %v7045_v14  ;;  %v3646_v61 = vadd.f32 %v3645_v22, %v3533_v38  ;;  %v3401_v22 = vsel %vm1851_vm4, %v6755_v0, 0.0  ;;  %v3732_v3 = vadd.f32 %v3731_v49, %v3730_v20  ;;  %v3542_v20 = vmul.f32 %v6773_v2, %v6773_v2 }
 0x27c   :  { %v3315_v1 = vadd.f32 %v3314_v31, %v6734_v21  ;;  %v3400_v33 = vadd.f32 %v3399_v28, %v3398_v37  ;;  %v3733_v18 = vsel %vm1851_vm4, %v3538_v34, 0.0  ;;  %v3541_v49 = vmul.f32 %v6769_v19, %v6769_v19 }
 0x27d   :  { %v3647_v26 = vadd.f32 %v3646_v61, %v3535_v12  ;;  %v3539_v61 = vmul.f32 %v6757_v45, %v6757_v45  ;;  %v3734_v34 = vadd.f32 %v3733_v18, %v3732_v3  ;;  %v3544_v18 = vmul.f32 %v6778_v60, %v6778_v60 }
 0x27e   :  { %v2839_v29 = vpop.f32.mrb[84].mxu1  ;;  %v3316_v31 = vadd.f32 %v3315_v1, %v6753_v58  ;;  %v3402_v12 = vadd.f32 %v3401_v22, %v3400_v33 }
 0x27f   :  { %v2841_v44 = vpop.f32.mrb[85].mxu1  ;;  %v3648_v21 = vadd.f32 %v3647_v26, %v3537_v51  ;;  %v3735_v51 = vsel %vm1851_vm4, %v3540_v52, 0.0  ;;  %v3737_v26 = vsel %vm1851_vm4, %v3542_v20, 0.0 }
 0x280   :  { %v2843_v56 = vpop.f32.mrb[86].mxu1  ;;  %v3317_v1 = vadd.f32 %v3316_v31, %v6757_v45  ;;  %v3407_v31 = vsel %vm1851_vm4, %v6778_v60, 0.0 }
 0x281   :  { %v2845_v4 = vpop.f32.mrb[87].mxu1 }
 0x282   :  { %v3192_v38 = vpop.f32.mrb[84].mxu0  ;;  %v3318_v33 = vadd.f32 %v3317_v1, %v6769_v19 }
 0x283   :  { %v7071_v5 = vadd.f32 %v3192_v38, %v2839_v29  ;;  %v3194_v23 = vpop.f32.mrb[85].mxu0 }
 0x284   :  { %v7076_v7 = vadd.f32 %v3194_v23, %v2841_v44  ;;  %v3196_v40 = vpop.f32.mrb[86].mxu0  ;;  %v3403_v44 = vsel %vm1851_vm4, %v6759_v35, 0.0  ;;  %v3543_v23 = vmul.f32 %v6776_v63, %v6776_v63 }
 0x285   :  { %8601 = vst [vmem:[#allocation27_spill] sm:$0xff] %v7071_v5  ;;  %v7081_v37 = vadd.f32 %v3196_v40, %v2843_v56  ;;  %v3198_v29 = vpop.f32.mrb[87].mxu0  ;;  %v3649_v40 = vadd.f32 %v3648_v21, %v3539_v61  ;;  %v3405_v56 = vsel %vm1851_vm4, %v6773_v2, 0.0  ;;  %v3404_v38 = vadd.f32 %v3403_v44, %v3402_v12  ;;  %v8604_v61 = vld [vmem:[#allocation41_spill] sm:$0xff] }
 0x286   :  { %8602 = vst [vmem:[#allocation78_spill] sm:$0xff] %v7076_v7  ;;  %v7085_v28 = vadd.f32 %v3198_v29, %v2845_v4  ;;  %v3736_v4 = vadd.f32 %v3735_v51, %v3734_v34  ;;  %v3546_v21 = vmul.f32 %v6791_v32, %v6791_v32  ;;  %v3545_v29 = vmul.f32 %v8604_v61, %v8604_v61 }
 0x287   :  { %v3650_v22 = vadd.f32 %v3649_v40, %v3541_v49  ;;  %v3406_v3 = vadd.f32 %v3405_v56, %v3404_v38  ;;  %v3739_v12 = vsel %vm1851_vm4, %v3544_v18, 0.0  ;;  %v3319_v34 = vadd.f32 %v3318_v33, %v6776_v63  ;;  %v8605_v56 = vld [vmem:[#allocation44_spill] sm:$0xff]  ;;  %v8606_v18 = vld [vmem:[#allocation43_spill] sm:$0xff] }
 0x288   :  { %8603 = vst [vmem:[#allocation79_spill] sm:$0xff] %v7085_v28  ;;  %v3738_v52 = vadd.f32 %v3737_v26, %v3736_v4  ;;  %v3409_v49 = vsel %vm1851_vm4, %v6791_v32, 0.0  ;;  %v3741_v40 = vsel %vm1851_vm4, %v3546_v21, 0.0  ;;  %v3548_v38 = vmul.f32 %v8605_v56, %v8605_v56 }
 0x289   :  { %v3651_v44 = vadd.f32 %v3650_v22, %v3543_v23  ;;  %v3408_v1 = vadd.f32 %v3407_v31, %v3406_v3  ;;  %v3320_v60 = vadd.f32 %v3319_v34, %v8604_v61  ;;  %v3547_v19 = vmul.f32 %v8606_v18, %v8606_v18 }
 0x28a   :  { %v3740_v4 = vadd.f32 %v3739_v12, %v3738_v52  ;;  %v3550_v32 = vmul.f32 %v6809_v50, %v6809_v50  ;;  %v3411_v63 = vsel %vm1851_vm4, %v8605_v56, 0.0  ;;  %v3549_v52 = vmul.f32 %v6805_v57, %v6805_v57 }
 0x28b   :  { %v3652_v2 = vadd.f32 %v3651_v44, %v3545_v29  ;;  %v3410_v23 = vadd.f32 %v3409_v49, %v3408_v1  ;;  %v3743_v34 = vsel %vm1851_vm4, %v3548_v38, 0.0  ;;  %v3321_v1 = vadd.f32 %v3320_v60, %v8606_v18 }
 0x28c   :  { %v3742_v31 = vadd.f32 %v3741_v40, %v3740_v4  ;;  %v3413_v40 = vsel %vm1851_vm4, %v6809_v50, 0.0  ;;  %v3745_v56 = vsel %vm1851_vm4, %v3550_v32, 0.0 }
 0x28d   :  { %v3322_v38 = vadd.f32 %v3321_v1, %v6805_v57 }
 0x28e   :  { %v2849_v20 = vpop.f32.mrb[88].mxu1 }
 0x28f   :  { %v2851_v51 = vpop.f32.mrb[89].mxu1 }
 0x290   :  { %v2853_v26 = vpop.f32.mrb[90].mxu1 }
 0x291   :  { %v2855_v33 = vpop.f32.mrb[91].mxu1  ;;  %v3202_v22 = vpop.f32.mrb[88].mxu0 }
 0x292   :  { %v7119_v3 = vadd.f32 %v3202_v22, %v2849_v20  ;;  %v3204_v21 = vpop.f32.mrb[89].mxu0  ;;  %v3653_v20 = vadd.f32 %v3652_v2, %v3547_v19  ;;  %v3412_v22 = vadd.f32 %v3411_v63, %v3410_v23  ;;  %v3554_v19 = vmul.f32 %v6827_v6, %v6827_v6 }
 0x293   :  { %v7125_v29 = vadd.f32 %v3204_v21, %v2851_v51  ;;  %v3206_v12 = vpop.f32.mrb[90].mxu0  ;;  %v3552_v51 = vmul.f32 %v6814_v30, %v6814_v30  ;;  %v3744_v21 = vadd.f32 %v3743_v34, %v3742_v31  ;;  %v3415_v63 = vsel %vm1851_vm4, %v6814_v30, 0.0 }
 0x294   :  { %v7128_v44 = vadd.f32 %v3206_v12, %v2853_v26  ;;  %v3208_v49 = vpop.f32.mrb[91].mxu0  ;;  %v3654_v26 = vadd.f32 %v3653_v20, %v3549_v52  ;;  %v8608_v12 = vld [vmem:[#allocation47_spill] sm:$0xff]  ;;  %v3414_v60 = vadd.f32 %v3413_v40, %v3412_v22  ;;  %v3749_v40 = vsel %vm1851_vm4, %v3554_v19, 0.0 }
 0x295   :  { %v7133_v4 = vadd.f32 %v3208_v49, %v2855_v33  ;;  %v3551_v61 = vmul.f32 %v8608_v12, %v8608_v12  ;;  %v3746_v2 = vadd.f32 %v3745_v56, %v3744_v21  ;;  %v8609_v33 = vld [vmem:[#allocation49_spill] sm:$0xff]  ;;  %v3747_v23 = vsel %vm1851_vm4, %v3552_v51, 0.0  ;;  %v8610_v56 = vld [vmem:[#allocation52_spill] sm:$0xff]  ;;  %v8611_v51 = vld [vmem:[#allocation51_spill] sm:$0xff] }
 0x296   :  { %v3553_v32 = vmul.f32 %v8609_v33, %v8609_v33  ;;  %v3323_v34 = vadd.f32 %v3322_v38, %v8608_v12  ;;  %v3417_v49 = vsel %vm1851_vm4, %v6827_v6, 0.0  ;;  %v3416_v20 = vadd.f32 %v3415_v63, %v3414_v60 }
 0x297   :  { %8607 = vst [vmem:[#allocation80_spill] sm:$0xff] %v7133_v4  ;;  %v3655_v52 = vadd.f32 %v3654_v26, %v3551_v61  ;;  %v3556_v22 = vmul.f32 %v8610_v56, %v8610_v56  ;;  %v3748_v30 = vadd.f32 %v3747_v23, %v3746_v2  ;;  %v3555_v18 = vmul.f32 %v8611_v51, %v8611_v51 }
 0x298   :  { %v3324_v50 = vadd.f32 %v3323_v34, %v8609_v33  ;;  %v3418_v61 = vadd.f32 %v3417_v49, %v3416_v20  ;;  %v3558_v26 = vmul.f32 %v6845_v55, %v6845_v55  ;;  %v3419_v19 = vsel %vm1851_vm4, %v8610_v56, 0.0 }
 0x299   :  { %v3656_v57 = vadd.f32 %v3655_v52, %v3553_v32  ;;  %v3750_v60 = vadd.f32 %v3749_v40, %v3748_v30  ;;  %v3557_v63 = vmul.f32 %v6841_v8, %v6841_v8  ;;  %v3751_v32 = vsel %vm1851_vm4, %v3556_v22, 0.0 }
 0x29a   :  { %v2859_v31 = vpop.f32.mrb[92].mxu1  ;;  %v3325_v49 = vadd.f32 %v3324_v50, %v8611_v51  ;;  %v3421_v30 = vsel %vm1851_vm4, %v6845_v55, 0.0  ;;  %v3420_v33 = vadd.f32 %v3419_v19, %v3418_v61  ;;  %v3753_v12 = vsel %vm1851_vm4, %v3558_v26, 0.0  ;;  %v8616_v50 = vld [vmem:[#allocation55_spill] sm:$0xff] }
 0x29b   :  { %v2861_v1 = vpop.f32.mrb[93].mxu1  ;;  %v3657_v20 = vadd.f32 %v3656_v57, %v3555_v18  ;;  %v3559_v57 = vmul.f32 %v8616_v50, %v8616_v50  ;;  %v3423_v61 = vsel %vm1851_vm4, %v6850_v46, 0.0  ;;  %v3561_v26 = vmul.f32 %v6861_v17, %v6861_v17 }
 0x29c   :  { %v2863_v21 = vpop.f32.mrb[94].mxu1  ;;  %v3326_v22 = vadd.f32 %v3325_v49, %v6841_v8  ;;  %v3422_v18 = vadd.f32 %v3421_v30, %v3420_v33  ;;  %v3425_v19 = vsel %vm1851_vm4, %v6863_v42, 0.0 }
 0x29d   :  { %v2865_v38 = vpop.f32.mrb[95].mxu1 }
 0x29e   :  { %v3212_v6 = vpop.f32.mrb[92].mxu0 }
 0x29f   :  { %v7163_v2 = vadd.f32 %v3212_v6, %v2859_v31  ;;  %v3214_v23 = vpop.f32.mrb[93].mxu0  ;;  %v3560_v6 = vmul.f32 %v6850_v46, %v6850_v46 }
 0x2a0   :  { %v7166_v34 = vadd.f32 %v3214_v23, %v2861_v1  ;;  %v3216_v52 = vpop.f32.mrb[94].mxu0  ;;  %v3752_v1 = vadd.f32 %v3751_v32, %v3750_v60  ;;  %v3658_v23 = vadd.f32 %v3657_v20, %v3557_v63  ;;  %v3424_v63 = vadd.f32 %v3423_v61, %v3422_v18  ;;  %v8617_v32 = vld [vmem:[#allocation60_spill] sm:$0xff] }
 0x2a1   :  { %8612 = vst [vmem:[#allocation81_spill] sm:$0xff] %v7163_v2  ;;  %v7171_v40 = vadd.f32 %v3216_v52, %v2863_v21  ;;  %v3218_v56 = vpop.f32.mrb[95].mxu0  ;;  %v3562_v21 = vmul.f32 %v6863_v42, %v6863_v42  ;;  %v3427_v18 = vsel %vm1851_vm4, %v8617_v32, 0.0 }
 0x2a2   :  { %8613 = vst [vmem:[#allocation82_spill] sm:$0xff] %v7166_v34  ;;  %v7176_v31 = vadd.f32 %v3218_v56, %v2865_v38  ;;  %v3754_v52 = vadd.f32 %v3753_v12, %v3752_v1  ;;  %v3755_v56 = vsel %vm1851_vm4, %v3560_v6, 0.0  ;;  %v3327_v38 = vadd.f32 %v3326_v22, %v8616_v50  ;;  %v8618_v1 = vld [vmem:[#allocation59_spill] sm:$0xff] }
 0x2a3   :  { %8614 = vst [vmem:[#allocation83_spill] sm:$0xff] %v7171_v40  ;;  %v3659_v60 = vadd.f32 %v3658_v23, %v3559_v57  ;;  %v3757_v33 = vsel %vm1851_vm4, %v3562_v21, 0.0  ;;  %v3564_v12 = vmul.f32 %v8617_v32, %v8617_v32  ;;  %v3563_v46 = vmul.f32 %v8618_v1, %v8618_v1  ;;  %v8619_v21 = vld [vmem:[#allocation61_spill] sm:$0xff] }
 0x2a4   :  { %8615 = vst [vmem:[#allocation84_spill] sm:$0xff] %v7176_v31  ;;  %v3756_v49 = vadd.f32 %v3755_v56, %v3754_v52  ;;  %v3328_v20 = vadd.f32 %v3327_v38, %v6861_v17  ;;  %v3426_v6 = vadd.f32 %v3425_v19, %v3424_v63  ;;  %v3566_v22 = vmul.f32 %v6883_v10, %v6883_v10 }
 0x2a5   :  { %v3660_v30 = vadd.f32 %v3659_v60, %v3561_v26  ;;  %v3565_v61 = vmul.f32 %v8619_v21, %v8619_v21  ;;  %v3759_v52 = vsel %vm1851_vm4, %v3564_v12, 0.0  ;;  %v3429_v60 = vsel %vm1851_vm4, %v6883_v10, 0.0  ;;  %v8622_v10 = vld [vmem:[#allocation63_spill] sm:$0xff] }
 0x2a6   :  { %v3758_v57 = vadd.f32 %v3757_v33, %v3756_v49  ;;  %v3329_v26 = vadd.f32 %v3328_v20, %v8618_v1  ;;  %v3428_v17 = vadd.f32 %v3427_v18, %v3426_v6  ;;  %v3761_v33 = vsel %vm1851_vm4, %v3566_v22, 0.0  ;;  %v8620_v49 = vld [vmem:[#allocation64_spill] sm:$0xff]  ;;  %v8623_v6 = vld [vmem:[#allocation66_spill] sm:$0xff] }
 0x2a7   :  { %v3661_v38 = vadd.f32 %v3660_v30, %v3563_v46  ;;  %v3568_v32 = vmul.f32 %v8620_v49, %v8620_v49  ;;  %v3567_v1 = vmul.f32 %v8622_v10, %v8622_v10  ;;  %v3570_v22 = vmul.f32 %v8623_v6, %v8623_v6 }
 0x2a8   :  { %v3760_v8 = vadd.f32 %v3759_v52, %v3758_v57  ;;  %v3330_v12 = vadd.f32 %v3329_v26, %v8619_v21  ;;  %v3430_v30 = vadd.f32 %v3429_v60, %v3428_v17  ;;  %v3431_v57 = vsel %vm1851_vm4, %v8620_v49, 0.0 }
 0x2a9   :  { %v3662_v51 = vadd.f32 %v3661_v38, %v3565_v61  ;;  %v3433_v26 = vsel %vm1851_vm4, %v8623_v6, 0.0  ;;  %v3765_v60 = vsel %vm1851_vm4, %v3570_v22, 0.0 }
 0x2aa   :  { %v2869_v23 = vpop.f32.mrb[96].mxu1  ;;  %v3331_v61 = vadd.f32 %v3330_v12, %v8622_v10 }
 0x2ab   :  { %v2871_v42 = vpop.f32.mrb[97].mxu1  ;;  %v3663_v38 = vadd.f32 %v3662_v51, %v3567_v1  ;;  %v8627_v51 = vld [vmem:[#allocation70_spill] sm:$0xff] }
 0x2ac   :  { %v2873_v56 = vpop.f32.mrb[98].mxu1  ;;  %v3574_v1 = vmul.f32 %v8627_v51, %v8627_v51 }
 0x2ad   :  { %v2875_v19 = vpop.f32.mrb[99].mxu1  ;;  %v3222_v63 = vpop.f32.mrb[96].mxu0 }
 0x2ae   :  { %v7210_v50 = vadd.f32 %v3222_v63, %v2869_v23  ;;  %v3224_v55 = vpop.f32.mrb[97].mxu0  ;;  %v3762_v23 = vadd.f32 %v3761_v33, %v3760_v8  ;;  %v8625_v8 = vld [vmem:[#allocation68_spill] sm:$0xff] }
 0x2af   :  { %v7213_v20 = vadd.f32 %v3224_v55, %v2871_v42  ;;  %v3226_v46 = vpop.f32.mrb[98].mxu0  ;;  %v3763_v55 = vsel %vm1851_vm4, %v3568_v32, 0.0  ;;  %v8624_v42 = vld [vmem:[#allocation65_spill] sm:$0xff]  ;;  %v3572_v63 = vmul.f32 %v8625_v8, %v8625_v8  ;;  %v3435_v6 = vsel %vm1851_vm4, %v8625_v8, 0.0 }
 0x2b0   :  { %v7219_v18 = vadd.f32 %v3226_v46, %v2873_v56  ;;  %v3228_v35 = vpop.f32.mrb[99].mxu0  ;;  %v3569_v17 = vmul.f32 %v8624_v42, %v8624_v42  ;;  %v3432_v56 = vadd.f32 %v3431_v57, %v3430_v30  ;;  %v3764_v33 = vadd.f32 %v3763_v55, %v3762_v23  ;;  %v8626_v46 = vld [vmem:[#allocation67_spill] sm:$0xff]  ;;  %v8628_v57 = vld [vmem:[#allocation69_spill] sm:$0xff] }
 0x2b1   :  { %8621 = vst [vmem:[#allocation85_spill] sm:$0xff] %v7213_v20  ;;  %v7223_v52 = vadd.f32 %v3228_v35, %v2875_v19  ;;  %v3332_v35 = vadd.f32 %v3331_v61, %v8624_v42  ;;  %v3571_v49 = vmul.f32 %v8626_v46, %v8626_v46  ;;  %v3767_v22 = vsel %vm1851_vm4, %v3572_v63, 0.0  ;;  %v8629_v42 = vld [vmem:[#allocation72_spill] sm:$0xff] }
 0x2b2   :  { %v3664_v19 = vadd.f32 %v3663_v38, %v3569_v17  ;;  %v3434_v32 = vadd.f32 %v3433_v26, %v3432_v56  ;;  %v3766_v12 = vadd.f32 %v3765_v60, %v3764_v33  ;;  %v3573_v23 = vmul.f32 %v8628_v57, %v8628_v57 }
 0x2b3   :  { %v3333_v61 = vadd.f32 %v3332_v35, %v8626_v46  ;;  %v3437_v56 = vsel %vm1851_vm4, %v8627_v51, 0.0  ;;  %v3769_v8 = vsel %vm1851_vm4, %v3574_v1, 0.0  ;;  %v3576_v10 = vmul.f32 %v8629_v42, %v8629_v42 }
 0x2b4   :  { %v3665_v26 = vadd.f32 %v3664_v19, %v3571_v49  ;;  %v3436_v38 = vadd.f32 %v3435_v6, %v3434_v32  ;;  %v3768_v33 = vadd.f32 %v3767_v22, %v3766_v12  ;;  %v3575_v49 = vmul.f32 %v8630_v59, %v8630_v59 }
 0x2b5   :  { %v3334_v0 = vadd.f32 %v3333_v61, %v8628_v57  ;;  %v3578_v32 = vmul.f32 %v6945_v39, %v6945_v39 }
 0x2b6   :  { %v2879_v21 = vpop.f32.mrb[100].mxu1  ;;  %v3666_v58 = vadd.f32 %v3665_v26, %v3573_v23  ;;  %v3438_v19 = vadd.f32 %v3437_v56, %v3436_v38  ;;  %v3770_v22 = vadd.f32 %v3769_v8, %v3768_v33  ;;  %v3577_v23 = vmul.f32 %v6941_v13, %v6941_v13 }
 0x2b7   :  { %v2881_v30 = vpop.f32.mrb[101].mxu1  ;;  %v3441_v38 = vsel %vm1851_vm4, %v6945_v39, 0.0  ;;  %v3773_v56 = vsel %vm1851_vm4, %v3578_v32, 0.0  ;;  %v3580_v8 = vmul.f32 %v6954_v54, %v6954_v54 }
 0x2b8   :  { %v2883_v55 = vpop.f32.mrb[102].mxu1  ;;  %v3667_v26 = vadd.f32 %v3666_v58, %v3575_v49  ;;  %v3582_v58 = vmul.f32 %v6989_v62, %v6989_v62  ;;  %v3443_v49 = vsel %vm1851_vm4, %v6954_v54, 0.0 }
 0x2b9   :  { %v2885_v17 = vpop.f32.mrb[103].mxu1  ;;  %v3775_v32 = vsel %vm1851_vm4, %v3580_v8, 0.0  ;;  %v3583_v8 = vmul.f32 %v6992_v27, %v6992_v27 }
 0x2ba   :  { %v3232_v60 = vpop.f32.mrb[100].mxu0 }
 0x2bb   :  { %v7250_v63 = vadd.f32 %v3232_v60, %v2879_v21  ;;  %v3234_v45 = vpop.f32.mrb[101].mxu0  ;;  %v3439_v21 = vsel %vm1851_vm4, %v8629_v42, 0.0 }
 0x2bc   :  { %v7255_v6 = vadd.f32 %v3234_v45, %v2881_v30  ;;  %v3236_v35 = vpop.f32.mrb[102].mxu0  ;;  %v3771_v45 = vsel %vm1851_vm4, %v3576_v10, 0.0  ;;  %v3335_v30 = vadd.f32 %v3334_v0, %v8630_v59 }
 0x2bd   :  { %v7259_v12 = vadd.f32 %v3236_v35, %v2883_v55  ;;  %v3238_v1 = vpop.f32.mrb[103].mxu0  ;;  %v3440_v55 = vadd.f32 %v3439_v21, %v3438_v19  ;;  %v3772_v60 = vadd.f32 %v3771_v45, %v3770_v22  ;;  %v3668_v35 = vadd.f32 %v3667_v26, %v3577_v23 }
 0x2be   :  { %v7265_v61 = vadd.f32 %v3238_v1, %v2885_v17  ;;  %v3336_v33 = vadd.f32 %v3335_v30, %v6941_v13  ;;  %v3579_v17 = vmul.f32 %v6951_v16, %v6951_v16  ;;  %v3581_v19 = vmul.f32 %v6983_v41, %v6983_v41 }
 0x2bf   :  { %8631 = vst [vmem:[#allocation67_spill] sm:$0xff] %v7259_v12  ;;  %v3442_v10 = vadd.f32 %v3441_v38, %v3440_v55  ;;  %v3774_v0 = vadd.f32 %v3773_v56, %v3772_v60  ;;  %v3445_v21 = vsel %vm1851_vm4, %v6989_v62, 0.0  ;;  %v3777_v30 = vsel %vm1851_vm4, %v3582_v58, 0.0 }
 0x2c0   :  { %8632 = vst [vmem:[#allocation70_spill] sm:$0xff] %v7265_v61  ;;  %v3337_v1 = vadd.f32 %v3336_v33, %v6951_v16  ;;  %v3669_v22 = vadd.f32 %v3668_v35, %v3579_v17  ;;  %v3584_v26 = vmul.f32 %v6997_v9, %v6997_v9  ;;  %v3586_v17 = vmul.f32 %v7036_v11, %v7036_v11 }
 0x2c1   :  { %v3444_v45 = vadd.f32 %v3443_v49, %v3442_v10  ;;  %v3776_v55 = vadd.f32 %v3775_v32, %v3774_v0  ;;  %v3447_v58 = vsel %vm1851_vm4, %v6997_v9, 0.0  ;;  %v3585_v0 = vmul.f32 %v7031_v15, %v7031_v15 }
 0x2c2   :  { %v3338_v56 = vadd.f32 %v3337_v1, %v6983_v41  ;;  %v3670_v60 = vadd.f32 %v3669_v22, %v3581_v19  ;;  %v3779_v1 = vsel %vm1851_vm4, %v3584_v26, 0.0  ;;  %v3781_v16 = vsel %vm1851_vm4, %v3586_v17, 0.0 }
 0x2c3   :  { %v3446_v35 = vadd.f32 %v3445_v21, %v3444_v45  ;;  %v3778_v49 = vadd.f32 %v3777_v30, %v3776_v55  ;;  %v3449_v30 = vsel %vm1851_vm4, %v7036_v11, 0.0  ;;  %v3589_v17 = vmul.f32 %v7071_v5, %v7071_v5 }
 0x2c4   :  { %v3339_v45 = vadd.f32 %v3338_v56, %v6992_v27  ;;  %v3671_v41 = vadd.f32 %v3670_v60, %v3583_v8  ;;  %v3587_v56 = vmul.f32 %v7039_v53, %v7039_v53  ;;  %v3590_v8 = vmul.f32 %v7076_v7, %v7076_v7 }
 0x2c5   :  { %v3448_v54 = vadd.f32 %v3447_v58, %v3446_v35  ;;  %v3780_v26 = vadd.f32 %v3779_v1, %v3778_v49  ;;  %v3451_v35 = vsel %vm1851_vm4, %v7045_v14, 0.0 }
 0x2c6   :  { %v2889_v23 = vpop.f32.mrb[104].mxu1 }
 0x2c7   :  { %v2891_v38 = vpop.f32.mrb[105].mxu1  ;;  %v3450_v60 = vadd.f32 %v3449_v30, %v3448_v54  ;;  %v3453_v54 = vsel %vm1851_vm4, %v7076_v7, 0.0 }
 0x2c8   :  { %v2893_v33 = vpop.f32.mrb[106].mxu1 }
 0x2c9   :  { %v2895_v62 = vpop.f32.mrb[107].mxu1  ;;  %v3242_v10 = vpop.f32.mrb[104].mxu0  ;;  %v3452_v58 = vadd.f32 %v3451_v35, %v3450_v60 }
 0x2ca   :  { %v7299_v32 = vadd.f32 %v3242_v10, %v2889_v23  ;;  %v3244_v19 = vpop.f32.mrb[105].mxu0  ;;  %v3588_v23 = vmul.f32 %v7045_v14, %v7045_v14 }
 0x2cb   :  { %v7302_v22 = vadd.f32 %v3244_v19, %v2891_v38  ;;  %v3246_v21 = vpop.f32.mrb[106].mxu0  ;;  %v3340_v38 = vadd.f32 %v3339_v45, %v7031_v15  ;;  %v3672_v19 = vadd.f32 %v3671_v41, %v3585_v0  ;;  %v3785_v0 = vsel %vm1851_vm4, %v3590_v8, 0.0 }
 0x2cc   :  { %v7307_v55 = vadd.f32 %v3246_v21, %v2893_v33  ;;  %v3248_v9 = vpop.f32.mrb[107].mxu0  ;;  %v3782_v33 = vadd.f32 %v3781_v16, %v3780_v26  ;;  %v3592_v16 = vmul.f32 %v7085_v28, %v7085_v28  ;;  %v3455_v8 = vsel %vm1851_vm4, %v7085_v28, 0.0 }
 0x2cd   :  { %8633 = vst [vmem:[#allocation69_spill] sm:$0xff] %v7302_v22  ;;  %v7312_v10 = vadd.f32 %v3248_v9, %v2895_v62  ;;  %v3783_v62 = vsel %vm1851_vm4, %v3588_v23, 0.0  ;;  %v3341_v9 = vadd.f32 %v3340_v38, %v7039_v53  ;;  %v3673_v49 = vadd.f32 %v3672_v19, %v3587_v56 }
 0x2ce   :  { %v3784_v21 = vadd.f32 %v3783_v62, %v3782_v33  ;;  %v3591_v23 = vmul.f32 %v7081_v37, %v7081_v37  ;;  %v3594_v38 = vmul.f32 %v7125_v29, %v7125_v29  ;;  %v3454_v56 = vadd.f32 %v3453_v54, %v3452_v58 }
 0x2cf   :  { %v3342_v45 = vadd.f32 %v3341_v9, %v7071_v5  ;;  %v3674_v30 = vadd.f32 %v3673_v49, %v3589_v17  ;;  %v3787_v7 = vsel %vm1851_vm4, %v3592_v16, 0.0  ;;  %v3593_v33 = vmul.f32 %v7119_v3, %v7119_v3 }
 0x2d0   :  { %v3786_v60 = vadd.f32 %v3785_v0, %v3784_v21  ;;  %v3457_v58 = vsel %vm1851_vm4, %v7125_v29, 0.0  ;;  %v3789_v54 = vsel %vm1851_vm4, %v3594_v38, 0.0  ;;  %v3596_v0 = vmul.f32 %v7133_v4, %v7133_v4 }
 0x2d1   :  { %v3343_v9 = vadd.f32 %v3342_v45, %v7081_v37  ;;  %v3675_v49 = vadd.f32 %v3674_v30, %v3591_v23  ;;  %v3595_v30 = vmul.f32 %v7128_v44, %v7128_v44  ;;  %v3598_v23 = vmul.f32 %v7166_v34, %v7166_v34 }
 0x2d2   :  { %v2899_v41 = vpop.f32.mrb[108].mxu1 }
 0x2d3   :  { %v2901_v1 = vpop.f32.mrb[109].mxu1  ;;  %v3344_v28 = vadd.f32 %v3343_v9, %v7119_v3 }
 0x2d4   :  { %v2903_v26 = vpop.f32.mrb[110].mxu1 }
 0x2d5   :  { %v2905_v19 = vpop.f32.mrb[111].mxu1 }
 0x2d6   :  { %v3252_v35 = vpop.f32.mrb[108].mxu0 }
 0x2d7   :  { %v7340_v17 = vadd.f32 %v3252_v35, %v2899_v41  ;;  %v3254_v62 = vpop.f32.mrb[109].mxu0  ;;  %v3456_v41 = vadd.f32 %v3455_v8, %v3454_v56  ;;  %v3788_v35 = vadd.f32 %v3787_v7, %v3786_v60  ;;  %v3597_v7 = vmul.f32 %v7163_v2, %v7163_v2 }
 0x2d8   :  { %v7343_v5 = vadd.f32 %v3254_v62, %v2901_v1  ;;  %v3256_v14 = vpop.f32.mrb[110].mxu0  ;;  %v3676_v1 = vadd.f32 %v3675_v49, %v3593_v33  ;;  %v3461_v60 = vsel %vm1851_vm4, %v7166_v34, 0.0  ;;  %v3793_v8 = vsel %vm1851_vm4, %v3598_v23, 0.0 }
 0x2d9   :  { %v7350_v16 = vadd.f32 %v3256_v14, %v2903_v26  ;;  %v3258_v21 = vpop.f32.mrb[111].mxu0  ;;  %v3458_v38 = vadd.f32 %v3457_v58, %v3456_v41  ;;  %v3790_v62 = vadd.f32 %v3789_v54, %v3788_v35  ;;  %v3459_v14 = vsel %vm1851_vm4, %v7133_v4, 0.0 }
 0x2da   :  { %v7353_v45 = vadd.f32 %v3258_v21, %v2905_v19  ;;  %v3791_v26 = vsel %vm1851_vm4, %v3596_v0, 0.0  ;;  %v3345_v19 = vadd.f32 %v3344_v28, %v7128_v44  ;;  %v3677_v56 = vadd.f32 %v3676_v1, %v3595_v30 }
 0x2db   :  { %v3600_v33 = vmul.f32 %v7176_v31, %v7176_v31  ;;  %v3460_v9 = vadd.f32 %v3459_v14, %v3458_v38  ;;  %v3792_v49 = vadd.f32 %v3791_v26, %v3790_v62  ;;  %v3599_v0 = vmul.f32 %v7171_v40, %v7171_v40 }
 0x2dc   :  { %v3346_v58 = vadd.f32 %v3345_v19, %v7163_v2  ;;  %v3678_v54 = vadd.f32 %v3677_v56, %v3597_v7  ;;  %v3602_v28 = vmul.f32 %v7213_v20, %v7213_v20  ;;  %v3463_v1 = vsel %vm1851_vm4, %v7176_v31, 0.0 }
 0x2dd   :  { %v3462_v21 = vadd.f32 %v3461_v60, %v3460_v9  ;;  %v3794_v41 = vadd.f32 %v3793_v8, %v3792_v49  ;;  %v3795_v30 = vsel %vm1851_vm4, %v3600_v33, 0.0  ;;  %v3601_v23 = vmul.f32 %v7210_v50, %v7210_v50 }
 0x2de   :  { %v3347_v62 = vadd.f32 %v3346_v58, %v7171_v40  ;;  %v3679_v26 = vadd.f32 %v3678_v54, %v3599_v0  ;;  %v3465_v7 = vsel %vm1851_vm4, %v7213_v20, 0.0  ;;  %v3797_v19 = vsel %vm1851_vm4, %v3602_v28, 0.0 }
 0x2df   :  { %v3604_v56 = vmul.f32 %v7223_v52, %v7223_v52  ;;  %v3464_v9 = vadd.f32 %v3463_v1, %v3462_v21  ;;  %v3796_v33 = vadd.f32 %v3795_v30, %v3794_v41  ;;  %v3606_v54 = vmul.f32 %v7255_v6, %v7255_v6 }
 0x2e0   :  { %v3348_v34 = vadd.f32 %v3347_v62, %v7210_v50  ;;  %v3680_v58 = vadd.f32 %v3679_v26, %v3601_v23  ;;  %v3603_v2 = vmul.f32 %v7219_v18, %v7219_v18  ;;  %v3467_v41 = vsel %vm1851_vm4, %v7223_v52, 0.0 }
 0x2e1   :  { %v3466_v28 = vadd.f32 %v3465_v7, %v3464_v9  ;;  %v3798_v40 = vadd.f32 %v3797_v19, %v3796_v33  ;;  %v3469_v23 = vsel %vm1851_vm4, %v7255_v6, 0.0  ;;  %v3471_v9 = vsel %vm1851_vm4, %v7265_v61, 0.0 }
 0x2e2   :  { %v2909_v35 = vpop.f32.mrb[112].mxu1  ;;  %v3349_v30 = vadd.f32 %v3348_v34, %v7219_v18  ;;  %v3681_v62 = vadd.f32 %v3680_v58, %v3603_v2 }
 0x2e3   :  { %v2911_v38 = vpop.f32.mrb[113].mxu1 }
 0x2e4   :  { %v2913_v14 = vpop.f32.mrb[114].mxu1  ;;  %v3350_v7 = vadd.f32 %v3349_v30, %v7250_v63 }
 0x2e5   :  { %v2915_v60 = vpop.f32.mrb[115].mxu1  ;;  %v3262_v8 = vpop.f32.mrb[112].mxu0 }
 0x2e6   :  { %v7386_v49 = vadd.f32 %v3262_v8, %v2909_v35  ;;  %v3264_v31 = vpop.f32.mrb[113].mxu0  ;;  %v3799_v35 = vsel %vm1851_vm4, %v3604_v56, 0.0  ;;  %v3607_v8 = vmul.f32 %v7259_v12, %v7259_v12 }
 0x2e7   :  { %v7391_v0 = vadd.f32 %v3264_v31, %v2911_v38  ;;  %v3266_v20 = vpop.f32.mrb[114].mxu0  ;;  %v3605_v31 = vmul.f32 %v7250_v63, %v7250_v63  ;;  %v3801_v38 = vsel %vm1851_vm4, %v3606_v54, 0.0  ;;  %v3800_v26 = vadd.f32 %v3799_v35, %v3798_v40 }
 0x2e8   :  { %8634 = vst [vmem:[#allocation72_spill] sm:$0xff] %v7386_v49  ;;  %v7395_v4 = vadd.f32 %v3266_v20, %v2913_v14  ;;  %v3268_v21 = vpop.f32.mrb[115].mxu0  ;;  %v3608_v20 = vmul.f32 %v7265_v61, %v7265_v61  ;;  %v3468_v14 = vadd.f32 %v3467_v41, %v3466_v28  ;;  %v3610_v54 = vmul.f32 %v7302_v22, %v7302_v22 }
 0x2e9   :  { %8635 = vst [vmem:[#allocation71_spill] sm:$0xff] %v7391_v0  ;;  %v7400_v1 = vadd.f32 %v3268_v21, %v2915_v60  ;;  %v3682_v19 = vadd.f32 %v3681_v62, %v3605_v31  ;;  %v3802_v60 = vadd.f32 %v3801_v38, %v3800_v26  ;;  %v3609_v40 = vmul.f32 %v7299_v32, %v7299_v32 }
 0x2ea   :  { %v3470_v56 = vadd.f32 %v3469_v23, %v3468_v14  ;;  %v3803_v33 = vsel %vm1851_vm4, %v3608_v20, 0.0  ;;  %v3351_v28 = vadd.f32 %v3350_v7, %v7259_v12  ;;  %v3473_v21 = vsel %vm1851_vm4, %v7302_v22, 0.0 }
 0x2eb   :  { %8636 = vst [vmem:[#allocation86_spill] sm:$0xff] %v7400_v1  ;;  %v3683_v35 = vadd.f32 %v3682_v19, %v3607_v8  ;;  %v3804_v30 = vadd.f32 %v3803_v33, %v3802_v60  ;;  %v3805_v20 = vsel %vm1851_vm4, %v3610_v54, 0.0  ;;  %v3612_v62 = vmul.f32 %v7312_v10, %v7312_v10 }
 0x2ec   :  { %v3472_v31 = vadd.f32 %v3471_v9, %v3470_v56  ;;  %v3352_v38 = vadd.f32 %v3351_v28, %v7299_v32  ;;  %v3611_v22 = vmul.f32 %v7307_v55, %v7307_v55  ;;  %v3475_v56 = vsel %vm1851_vm4, %v7312_v10, 0.0 }
 0x2ed   :  { %v3684_v61 = vadd.f32 %v3683_v35, %v3609_v40  ;;  %v3614_v60 = vmul.f32 %v7343_v5, %v7343_v5  ;;  %v3613_v33 = vmul.f32 %v7340_v17, %v7340_v17  ;;  %v3477_v28 = vsel %vm1851_vm4, %v7343_v5, 0.0 }
 0x2ee   :  { %v2919_v34 = vpop.f32.mrb[116].mxu1  ;;  %v3474_v7 = vadd.f32 %v3473_v21, %v3472_v31  ;;  %v3353_v40 = vadd.f32 %v3352_v38, %v7307_v55  ;;  %v3615_v38 = vmul.f32 %v7350_v16, %v7350_v16 }
 0x2ef   :  { %v2921_v2 = vpop.f32.mrb[117].mxu1  ;;  %v3685_v21 = vadd.f32 %v3684_v61, %v3611_v22  ;;  %v3618_v61 = vmul.f32 %v7391_v0, %v7391_v0 }
 0x2f0   :  { %v2923_v58 = vpop.f32.mrb[118].mxu1  ;;  %v3476_v35 = vadd.f32 %v3475_v56, %v3474_v7  ;;  %v3354_v31 = vadd.f32 %v3353_v40, %v7340_v17  ;;  %v3481_v56 = vsel %vm1851_vm4, %v7391_v0, 0.0 }
 0x2f1   :  { %v2925_v41 = vpop.f32.mrb[119].mxu1  ;;  %v3813_v40 = vsel %vm1851_vm4, %v3618_v61, 0.0 }
 0x2f2   :  { %v3272_v23 = vpop.f32.mrb[116].mxu0  ;;  %v3355_v7 = vadd.f32 %v3354_v31, %v7350_v16  ;;  %v3619_v31 = vmul.f32 %v7395_v4, %v7395_v4 }
 0x2f3   :  { %v7427_v14 = vadd.f32 %v3272_v23, %v2919_v34  ;;  %v3274_v26 = vpop.f32.mrb[117].mxu0  ;;  %v3806_v34 = vadd.f32 %v3805_v20, %v3804_v30  ;;  %v3616_v30 = vmul.f32 %v7353_v45, %v7353_v45  ;;  %v3686_v20 = vadd.f32 %v3685_v21, %v3613_v33 }
 0x2f4   :  { %v7431_v12 = vadd.f32 %v3274_v26, %v2921_v2  ;;  %v3276_v19 = vpop.f32.mrb[118].mxu0  ;;  %v3807_v2 = vsel %vm1851_vm4, %v3612_v62, 0.0  ;;  %v3479_v62 = vsel %vm1851_vm4, %v7353_v45, 0.0  ;;  %v3617_v26 = vmul.f32 %v7386_v49, %v7386_v49 }
 0x2f5   :  { %v7437_v8 = vadd.f32 %v3276_v19, %v2923_v58  ;;  %v3278_v9 = vpop.f32.mrb[119].mxu0  ;;  %v3809_v58 = vsel %vm1851_vm4, %v3614_v60, 0.0  ;;  %v3808_v23 = vadd.f32 %v3807_v2, %v3806_v34  ;;  %v3811_v19 = vsel %vm1851_vm4, %v3616_v30, 0.0 }
 0x2f6   :  { %v7441_v54 = vadd.f32 %v3278_v9, %v2925_v41  ;;  %v3478_v41 = vadd.f32 %v3477_v28, %v3476_v35  ;;  %v3687_v60 = vadd.f32 %v3686_v20, %v3615_v38  ;;  %v3356_v33 = vadd.f32 %v3355_v7, %v7386_v49 }
 0x2f7   :  { %8637 = vst [vmem:[#allocation87_spill] sm:$0xff] %v7437_v8  ;;  %v3810_v22 = vadd.f32 %v3809_v58, %v3808_v23  ;;  %v3620_v2 = vmul.f32 %v7400_v1, %v7400_v1  ;;  %v3483_v23 = vsel %vm1851_vm4, %v7400_v1, 0.0  ;;  %v3622_v20 = vmul.f32 %v7431_v12, %v7431_v12 }
 0x2f8   :  { %8638 = vst [vmem:[#allocation88_spill] sm:$0xff] %v7441_v54  ;;  %v3480_v9 = vadd.f32 %v3479_v62, %v3478_v41  ;;  %v3688_v35 = vadd.f32 %v3687_v60, %v3617_v26  ;;  %v3621_v61 = vmul.f32 %v7427_v14, %v7427_v14  ;;  %v3357_v26 = vadd.f32 %v3356_v33, %v7395_v4 }
 0x2f9   :  { %v3812_v21 = vadd.f32 %v3811_v19, %v3810_v22  ;;  %v3815_v19 = vsel %vm1851_vm4, %v3620_v2, 0.0  ;;  %v3485_v0 = vsel %vm1851_vm4, %v7431_v12, 0.0  ;;  %v3624_v33 = vmul.f32 %v7441_v54, %v7441_v54 }
 0x2fa   :  { %v3482_v58 = vadd.f32 %v3481_v56, %v3480_v9  ;;  %v3689_v9 = vadd.f32 %v3688_v35, %v3619_v31  ;;  %v3623_v35 = vmul.f32 %v7437_v8, %v7437_v8 }
 0x2fb   :  { %v3814_v62 = vadd.f32 %v3813_v40, %v3812_v21  ;;  %v3358_v21 = vadd.f32 %v3357_v26, %v7427_v14 }
 0x2fc   :  { %v3484_v1 = vadd.f32 %v3483_v23, %v3482_v58  ;;  %v3487_v23 = vsel %vm1851_vm4, %v7441_v54, 0.0 }
 0x2fd   :  { %v3816_v2 = vadd.f32 %v3815_v19, %v3814_v62 }
 0x2fe   :  { %v2929_v34 = vpop.f32.mrb[120].mxu1  ;;  %v3486_v58 = vadd.f32 %v3485_v0, %v3484_v1 }
 0x2ff   :  { %v2931_v28 = vpop.f32.mrb[121].mxu1 }
 0x300   :  { %v2933_v30 = vpop.f32.mrb[122].mxu1  ;;  %v3488_v0 = vadd.f32 %v3487_v23, %v3486_v58 }
 0x301   :  { %v2935_v41 = vpop.f32.mrb[123].mxu1  ;;  %v3282_v38 = vpop.f32.mrb[120].mxu0 }
 0x302   :  { %v7475_v7 = vadd.f32 %v3282_v38, %v2929_v34  ;;  %v3284_v22 = vpop.f32.mrb[121].mxu0  ;;  %v3817_v34 = vsel %vm1851_vm4, %v3622_v20, 0.0 }
 0x303   :  { %v7479_v56 = vadd.f32 %v3284_v22, %v2931_v28  ;;  %v3286_v60 = vpop.f32.mrb[122].mxu0  ;;  %v3690_v28 = vadd.f32 %v3689_v9, %v3621_v61  ;;  %v3359_v22 = vadd.f32 %v3358_v21, %v7437_v8 }
 0x304   :  { %8639 = vst [vmem:[#allocation89_spill] sm:$0xff] %v7475_v7  ;;  %v7483_v49 = vadd.f32 %v3286_v60, %v2933_v30  ;;  %v3288_v40 = vpop.f32.mrb[123].mxu0  ;;  %v3818_v30 = vadd.f32 %v3817_v34, %v3816_v2  ;;  %v3625_v20 = vmul.f32 %v7475_v7, %v7475_v7 }
 0x305   :  { %8640 = vst [vmem:[#allocation90_spill] sm:$0xff] %v7479_v56  ;;  %v7489_v38 = vadd.f32 %v3288_v40, %v2935_v41  ;;  %v3626_v31 = vmul.f32 %v7479_v56, %v7479_v56  ;;  %v3819_v41 = vsel %vm1851_vm4, %v3624_v33, 0.0  ;;  %v3691_v62 = vadd.f32 %v3690_v28, %v3623_v35 }
 0x306   :  { %8641 = vst [vmem:[#allocation91_spill] sm:$0xff] %v7483_v49  ;;  %v3489_v61 = vsel %vm1851_vm4, %v7479_v56, 0.0  ;;  %v3360_v1 = vadd.f32 %v3359_v22, %v7475_v7  ;;  %v3820_v40 = vadd.f32 %v3819_v41, %v3818_v30  ;;  %v3627_v21 = vmul.f32 %v7483_v49, %v7483_v49 }
 0x307   :  { %8642 = vst [vmem:[#allocation92_spill] sm:$0xff] %v7489_v38  ;;  %v3821_v19 = vsel %vm1851_vm4, %v3626_v31, 0.0  ;;  %v3628_v60 = vmul.f32 %v7489_v38, %v7489_v38  ;;  %v3692_v34 = vadd.f32 %v3691_v62, %v3625_v20  ;;  %v3490_v2 = vadd.f32 %v3489_v61, %v3488_v0 }
 0x308   :  { %v3822_v35 = vadd.f32 %v3821_v19, %v3820_v40  ;;  %v3491_v58 = vsel %vm1851_vm4, %v7489_v38, 0.0  ;;  %v3361_v22 = vadd.f32 %v3360_v1, %v7483_v49 }
 0x309   :  { %v3823_v31 = vsel %vm1851_vm4, %v3628_v60, 0.0  ;;  %v3693_v30 = vadd.f32 %v3692_v34, %v3627_v21  ;;  %v3492_v62 = vadd.f32 %v3491_v58, %v3490_v2 }
 0x30a   :  { %v2939_v26 = vpop.f32.mrb[124].mxu1  ;;  %v3824_v38 = vadd.f32 %v3823_v31, %v3822_v35 }
 0x30b   :  { %v2941_v9 = vpop.f32.mrb[125].mxu1 }
 0x30c   :  { %v2943_v33 = vpop.f32.mrb[126].mxu1 }
 0x30d   :  { %v2945_v28 = vpop.f32.mrb[127].mxu1 }
 0x30e   :  { %v3292_v23 = vpop.f32.mrb[124].mxu0 }
 0x30f   :  { %v7513_v56 = vadd.f32 %v3292_v23, %v2939_v26  ;;  %v3294_v7 = vpop.f32.mrb[125].mxu0 }
 0x310   :  { %v7515_v20 = vadd.f32 %v3294_v7, %v2941_v9  ;;  %v3296_v41 = vpop.f32.mrb[126].mxu0 }
 0x311   :  { %8643 = vst [vmem:[#allocation93_spill] sm:$0xff] %v7513_v56  ;;  %v3362_v61 = vadd.f32 %v3361_v22, %v7513_v56  ;;  %v3629_v0 = vmul.f32 %v7513_v56, %v7513_v56  ;;  %v7520_v19 = vadd.f32 %v3296_v41, %v2943_v33  ;;  %v3298_v40 = vpop.f32.mrb[127].mxu0 }
 0x312   :  { %8644 = vst [vmem:[#allocation94_spill] sm:$0xff] %v7515_v20  ;;  %v3493_v1 = vsel %vm1851_vm4, %v7515_v20, 0.0  ;;  %v3630_v26 = vmul.f32 %v7515_v20, %v7515_v20  ;;  %v7526_v60 = vadd.f32 %v3298_v40, %v2945_v28 }
 0x313   :  { %8645 = vst [vmem:[#allocation95_spill] sm:$0xff] %v7520_v19  ;;  %v3694_v7 = vadd.f32 %v3693_v30, %v3629_v0  ;;  %v3494_v9 = vadd.f32 %v3493_v1, %v3492_v62  ;;  %v3363_v34 = vadd.f32 %v3362_v61, %v7520_v19  ;;  %v3631_v21 = vmul.f32 %v7520_v19, %v7520_v19 }
 0x314   :  { %v3825_v33 = vsel %vm1851_vm4, %v3630_v26, 0.0  ;;  %v3495_v2 = vsel %vm1851_vm4, %v7526_v60, 0.0  ;;  %v3632_v35 = vmul.f32 %v7526_v60, %v7526_v60 }
 0x315   :  { %v3826_v58 = vadd.f32 %v3825_v33, %v3824_v38  ;;  %v3364_v23 = vrot.slane %v3363_v34, 4  ;;  %v3695_v22 = vadd.f32 %v3694_v7, %v3631_v21  ;;  %v3496_v28 = vadd.f32 %v3495_v2, %v3494_v9 }
 0x316   :  { %v3827_v31 = vsel %vm1851_vm4, %v3632_v35, 0.0 }
 0x317   :  { %v3365_v30 = vadd.f32 %v3364_v23, %v3363_v34  ;;  %v3696_v41 = vrot.slane %v3695_v22, 4  ;;  %v3497_v62 = vrot.slane %v3496_v28, 4  ;;  %v3828_v61 = vadd.f32 %v3827_v31, %v3826_v58 }
 0x319   :  { %v3366_v0 = vrot.slane %v3365_v30, 2  ;;  %v3697_v40 = vadd.f32 %v3696_v41, %v3695_v22  ;;  %v3498_v1 = vadd.f32 %v3497_v62, %v3496_v28  ;;  %v3829_v26 = vrot.slane %v3828_v61, 4 }
 0x31b   :  { %v3367_v19 = vadd.f32 %v3366_v0, %v3365_v30  ;;  %v3698_v20 = vrot.slane %v3697_v40, 2  ;;  %v3499_v56 = vrot.slane %v3498_v1, 2  ;;  %v3830_v49 = vadd.f32 %v3829_v26, %v3828_v61 }
 0x31d   :  { %v3368_v54 = vrot.slane %v3367_v19, 1  ;;  %v3699_v8 = vadd.f32 %v3698_v20, %v3697_v40  ;;  %v3500_v38 = vadd.f32 %v3499_v56, %v3498_v1  ;;  %v3831_v33 = vrot.slane %v3830_v49, 2 }
 0x31f   :  { %v3369_v7 = vadd.f32 %v3368_v54, %v3367_v19  ;;  %v3700_v9 = vrot.slane %v3699_v8, 1  ;;  %v3501_v21 = vrot.slane %v3500_v38, 1  ;;  %v3832_v2 = vadd.f32 %v3831_v33, %v3830_v49 }
 0x320   :  { %v4721_v54 = vmov 1966171168   ;;  %v3852_v19 = vlaneseq }
 0x321   :  { %v3503_v34 = vmul.f32 0.001953125, %v3369_v7  ;;  %v3701_v35 = vadd.f32 %v3700_v9, %v3699_v8  ;;  %v3502_v23 = vadd.f32 %v3501_v21, %v3500_v38  ;;  %v3833_v58 = vrot.slane %v3832_v2, 1  ;;  %v3841_v9 = vld [vmem:[%s8398_s3] sm:$0x3] }
 0x322   :  { %v3850_v56 = vunpack.c.l.s4 %v4721_v54  ;;  %v3853_v40 = vshrl.u32 %v3852_v19, 7  ;;  %v8648_v54 = vld [vmem:[#allocation7_spill] sm:$0xff] }
 0x323   :  { %v3835_v31 = vmul.f32 0.001953125, %v3701_v35  ;;  %v3837_v22 = vmul.f32 %v3503_v34, %v3503_v34  ;;  %v3504_v28 = vmul.f32 0.001953125, %v3502_v23  ;;  %v3834_v41 = vadd.f32 %v3833_v58, %v3832_v2 }
 0x324   :  { %v3851_v49 = vunpack.c.0.s8 %v3850_v56  ;;  %v3869_v2 = vsub.s32 0, %v3853_v40  ;;  %v3873_v35 = vsub.s32 1, %v3853_v40  ;;  %v8649_v56 = vld [vmem:[#allocation8_spill] sm:$0xff] }
 0x325   :  { %v3839_v30 = vsub.f32 %v3835_v31, %v3837_v22  ;;  %v3836_v62 = vmul.f32 0.001953125, %v3834_v41  ;;  %v3838_v0 = vmul.f32 %v3504_v28, %v3504_v28 }
 0x326   :  { %v3854_v1 = vsub.s32 %v3851_v49, %v3853_v40  ;;  %v8650_v49 = vld [vmem:[#allocation9_spill] sm:$0xff] }
 0x327   :  { %v3842_v61 = vadd.f32 0.001, %v3839_v30  ;;  %v3840_v26 = vsub.f32 %v3836_v62, %v3838_v0  ;;  %v8646_v0 = vld [vmem:[#allocation5_spill] sm:$0xff] }
 0x329   :  { %v3843_v20 = vadd.f32 0.001, %v3840_v26  ;;  %4686 = vrsqrt.f32 %v3842_v61  ;;  %v8647_v26 = vld [vmem:[#allocation6_spill] sm:$0xff] }
 0x32b   :  { %4688 = vrsqrt.f32 %v3843_v20 }
 0x333   :  { %v4687_v8 = vpop.eup %4686 }
 0x335   :  { %v4689_v38 = vpop.eup %4688 }
 0x336   :  { %v3848_v33 = vcombine.low %v4687_v8, %v4689_v38  ;;  %v8651_v8 = vld [vmem:[#allocation10_spill] sm:$0xff] }
 0x338   :  { %v3855_v7 = vrot.slane %v3848_v33, %v3854_v1  ;;  %v8652_v33 = vld [vmem:[#allocation11_spill] sm:$0xff] }
 0x33a   :  { %v3862_v21 = vrot.slane %v3855_v7, %v3854_v1  ;;  %v8653_v7 = vld [vmem:[#allocation12_spill] sm:$0xff] }
 0x33c   :  { %v3864_v23 = vmul.f32 %v3862_v21, %v3841_v9  ;;  %v8654_v21 = vld [vmem:[#allocation13_spill] sm:$0xff] }
 0x33e   :  { %v7540_v58 = vrot.slane %v3864_v23, %v3869_v2  ;;  %v7542_v31 = vrot.slane %v3864_v23, %v3873_v35 }
 0x340   :  { %v3877_v22 = vmul.f32 %v7540_v58, %v3503_v34  ;;  %v3878_v41 = vmul.f32 %v7542_v31, %v3504_v28  ;;  %v4025_v30 = vmul.f32 %v7542_v31, %v7526_v60  ;;  %v7550_v62 = vmul.f32 %v7540_v58, %v6295_v48 }
 0x341   :  { %v7554_v61 = vmul.f32 %v7542_v31, %v8646_v0  ;;  %v7558_v20 = vmul.f32 %v7540_v58, %v8647_v26  ;;  %v7562_v34 = vmul.f32 %v7542_v31, %v8648_v54  ;;  %v7566_v28 = vmul.f32 %v7540_v58, %v6351_v36  ;;  %v8658_v0 = vld [vmem:[#allocation15_spill] sm:$0xff]  ;;  %v8660_v54 = vld [vmem:[#allocation16_spill] sm:$0xff] }
 0x342   :  { %v3881_v60 = vcombine.low %v3877_v22, %v3878_v41  ;;  %v7570_v48 = vmul.f32 %v7542_v31, %v8649_v56  ;;  %v7574_v19 = vmul.f32 %v7540_v58, %v6366_v24  ;;  %v7578_v40 = vmul.f32 %v7542_v31, %v8650_v49  ;;  %v8656_v22 = vld [vmem:[#allocation14_spill] sm:$0xff]  ;;  %v3865_v49 = vld [vmem:[%s8399_s4] sm:$0x3]  ;;  %s4722_s4 = smov [#allocation2]  }
 0x343   :  { %v7582_v38 = vmul.f32 %v7540_v58, %v8651_v8  ;;  %v7586_v36 = vmul.f32 %v7542_v31, %v8652_v33  ;;  %v7590_v9 = vmul.f32 %v7540_v58, %v8653_v7  ;;  %v7594_v24 = vmul.f32 %v7542_v31, %v8654_v21  ;;  %v8662_v8 = vld [vmem:[#allocation17_spill] sm:$0xff]  ;;  %v8665_v21 = vld [vmem:[#allocation19_spill] sm:$0xff]  ;;  %s4298_s12 = sshll.u32 %s4722_s4, 4  ;;  %s4299_s12 = int_to_ptr.vmem [resolvable:$true] %s4298_s12 }
 0x344   :  { %v3888_v23 = vrot.slane %v3881_v60, %v3854_v1  ;;  %v7598_v41 = vmul.f32 %v7540_v58, %v8656_v22  ;;  %v7602_v26 = vmul.f32 %v7542_v31, %v8658_v0  ;;  %v7606_v56 = vmul.f32 %v7540_v58, %v8660_v54  ;;  %v8664_v60 = vld [vmem:[#allocation18_spill] sm:$0xff]  ;;  %v8667_v0 = vld [vmem:[#allocation20_spill] sm:$0xff]  ;;  %s4690_s19 = scalar_lea.vmem %s4299_s12, 16384  ;;  %p4695_p1 = scmp.lt.s32.totalorder %s4299_s12, %s4299_s12 }
 0x345   :  { %8655 = vst [vmem:[#allocation5_spill] sm:$0xff] %v7594_v24  ;;  %v7613_v33 = vmul.f32 %v7542_v31, %v8662_v8  ;;  %v7617_v7 = vmul.f32 %v7540_v58, %v8664_v60  ;;  %v7621_v22 = vmul.f32 %v7542_v31, %v8665_v21  ;;  %v7625_v54 = vmul.f32 %v7540_v58, %v8667_v0  ;;  %v8669_v24 = vld [vmem:[#allocation22_spill] sm:$0xff]  ;;  %p4691_p0 = scmp.ne.s32.totalorder %s4299_s12, %s4690_s19  ;;  %p4696_p2 = scmp.lt.s32.totalorder %s4690_s19, %s4690_s19 }
 0x346   :  { %8657 = vst [vmem:[#allocation6_spill] sm:$0xff] %v7598_v41  ;;  %8659 = vst [vmem:[#allocation7_spill] sm:$0xff] %v7602_v26  ;;  %v8668_v26 = vld [vmem:[#allocation21_spill] sm:$0xff]  ;;  %v7633_v8 = vmul.f32 %v7540_v58, %v8669_v24  ;;  %v7641_v21 = vmul.f32 %v7540_v58, %v8598_v25 }
 0x347   :  { %8661 = vst [vmem:[#allocation8_spill] sm:$0xff] %v7606_v56  ;;  %8663 = vst [vmem:[#allocation9_spill] sm:$0xff] %v7613_v33  ;;  %v3895_v56 = vrot.slane %v3888_v23, %v3854_v1  ;;  %v7629_v41 = vmul.f32 %v7542_v31, %v8668_v26  ;;  %v8670_v33 = vld [vmem:[#allocation23_spill] sm:$0xff]  ;;  %v7649_v1 = vmul.f32 %v7540_v58, %v6683_v47  ;;  %v8676_v23 = vld [vmem:[#allocation26_spill] sm:$0xff]  ;;  %p4697_p3 = por %p4696_p2, %p4695_p1 }
 0x348   :  { %8666 = vst [vmem:[#allocation10_spill] sm:$0xff] %v7621_v22  ;;  %v7637_v60 = vmul.f32 %v7542_v31, %v8670_v33  ;;  %8672 = vst [vmem:[#allocation12_spill] sm:$0xff] %v7641_v21  ;;  %v8673_v22 = vld [vmem:[#allocation25_spill] sm:$0xff]  ;;  %v7653_v24 = vmul.f32 %v7542_v31, %v8676_v23  ;;  %v7657_v33 = vmul.f32 %v7540_v58, %v8599_v43 }
 0x349   :  { %v7645_v0 = vmul.f32 %v7542_v31, %v8673_v22  ;;  %8675 = vst [vmem:[#allocation14_spill] sm:$0xff] %v7649_v1  ;;  %v3897_v26 = vsub.f32 %v3865_v49, %v3895_v56  ;;  %v8679_v21 = vld [vmem:[#allocation29_spill] sm:$0xff]  ;;  %v8683_v1 = vld [vmem:[#allocation31_spill] sm:$0xff]  ;;  %v8685_v56 = vld [vmem:[#allocation32_spill] sm:$0xff]  ;;  %p4698_p4 = pnand %p4697_p3, %p4691_p0 }
 0x34a   :  { %8671 = vst [vmem:[#allocation11_spill] sm:$0xff] %v7637_v60  ;;  %v8677_v60 = vld [vmem:[#allocation28_spill] sm:$0xff]  ;;  %v7665_v22 = vmul.f32 %v7540_v58, %v8679_v21  ;;  %v7673_v23 = vmul.f32 %v7540_v58, %v8683_v1  ;;  %v7677_v43 = vmul.f32 %v7542_v31, %v8685_v56  ;;  %v8687_v49 = vld [vmem:[#allocation33_spill] sm:$0xff] }
 0x34b   :  { %8674 = vst [vmem:[#allocation13_spill] sm:$0xff] %v7645_v0  ;;  %v7661_v25 = vmul.f32 %v7542_v31, %v8677_v60  ;;  %v8681_v0 = vld [vmem:[#allocation30_spill] sm:$0xff]  ;;  %v7681_v60 = vmul.f32 %v7540_v58, %v8687_v49  ;;  %v7685_v21 = vrot.slane %v3897_v26, %v3873_v35 }
 0x34c   :  { %8680 = vst [vmem:[#allocation16_spill] sm:$0xff] %v7665_v22  ;;  %v7669_v47 = vmul.f32 %v7542_v31, %v8681_v0  ;;  %8684 = vst [vmem:[#allocation18_spill] sm:$0xff] %v7673_v23  ;;  %v8688_v22 = vld [vmem:[#allocation34_spill] sm:$0xff]  ;;  %v8692_v23 = vld [vmem:[#allocation36_spill] sm:$0xff] }
 0x34d   :  { %8678 = vst [vmem:[#allocation15_spill] sm:$0xff] %v7661_v25  ;;  %8686 = vst [vmem:[#allocation19_spill] sm:$0xff] %v7677_v43  ;;  %v7683_v25 = vrot.slane %v3897_v26, %v3869_v2  ;;  %v7689_v0 = vmul.f32 %v7542_v31, %v8688_v22  ;;  %v7697_v56 = vmul.f32 %v7542_v31, %v8692_v23  ;;  %v8694_v43 = vld [vmem:[#allocation37_spill] sm:$0xff]  ;;  %v8696_v2 = vld [vmem:[#allocation38_spill] sm:$0xff] }
 0x34e   :  { %8682 = vst [vmem:[#allocation17_spill] sm:$0xff] %v7669_v47  ;;  %v8690_v47 = vld [vmem:[#allocation35_spill] sm:$0xff]  ;;  %v7701_v49 = vmul.f32 %v7540_v58, %v8694_v43  ;;  %v7705_v35 = vmul.f32 %v7542_v31, %v8696_v2  ;;  %v8702_v23 = vld [vmem:[#allocation41_spill] sm:$0xff]  ;;  %v8703_v43 = vld [vmem:[#allocation42_spill] sm:$0xff] }
 0x34f   :  { %8689 = vst [vmem:[#allocation20_spill] sm:$0xff] %v7689_v0  ;;  %v7693_v1 = vmul.f32 %v7540_v58, %v8690_v47  ;;  %8693 = vst [vmem:[#allocation22_spill] sm:$0xff] %v7697_v56  ;;  %v8698_v26 = vld [vmem:[#allocation39_spill] sm:$0xff]  ;;  %v4164_v0 = vadd.f32 %v7685_v21, %v4025_v30  ;;  %v8700_v47 = vld [vmem:[#allocation40_spill] sm:$0xff]  ;;  %v7718_v56 = vmul.f32 %v7540_v58, %v8702_v23 }
 0x350   :  { %8695 = vst [vmem:[#allocation23_spill] sm:$0xff] %v7701_v49  ;;  %8697 = vst [vmem:[#allocation25_spill] sm:$0xff] %v7705_v35  ;;  %v7709_v22 = vmul.f32 %v7540_v58, %v8698_v26  ;;  %v7722_v49 = vmul.f32 %v7542_v31, %v8703_v43  ;;  %v8705_v2 = vld [vmem:[#allocation43_spill] sm:$0xff]  ;;  %v8707_v26 = vld [vmem:[#allocation44_spill] sm:$0xff] }
 0x351   :  { %8691 = vst [vmem:[#allocation21_spill] sm:$0xff] %v7693_v1  ;;  %v7714_v1 = vmul.f32 %v7542_v31, %v8700_v47  ;;  %v7726_v35 = vmul.f32 %v7540_v58, %v8705_v2  ;;  %v8709_v30 = vld [vmem:[#allocation45_spill] sm:$0xff]  ;;  %4292 = vst.msk [vmem:[#allocation2 + $0x3f8] sm:$0xff] %vm1851_vm4, %v4164_v0  ;;  %v8713_v43 = vld [vmem:[#allocation47_spill] sm:$0xff] }
 0x352   :  { %8699 = vst [vmem:[#allocation26_spill] sm:$0xff] %v7709_v22  ;;  %8704 = vst [vmem:[#allocation29_spill] sm:$0xff] %v7722_v49  ;;  %v7730_v22 = vmul.f32 %v7542_v31, %v8707_v26  ;;  %v7734_v47 = vmul.f32 %v7540_v58, %v8709_v30  ;;  %v7743_v49 = vmul.f32 %v7540_v58, %v8713_v43  ;;  %v8715_v2 = vld [vmem:[#allocation48_spill] sm:$0xff]  ;;  %v8717_v26 = vld [vmem:[#allocation49_spill] sm:$0xff] }
 0x353   :  { %8701 = vst [vmem:[#allocation28_spill] sm:$0xff] %v7714_v1  ;;  %8706 = vst [vmem:[#allocation30_spill] sm:$0xff] %v7726_v35  ;;  %v8711_v1 = vld [vmem:[#allocation46_spill] sm:$0xff]  ;;  %v7747_v35 = vmul.f32 %v7542_v31, %v8715_v2  ;;  %v8723_v0 = vld [vmem:[#allocation52_spill] sm:$0xff] }
 0x354   :  { %8708 = vst [vmem:[#allocation31_spill] sm:$0xff] %v7730_v22  ;;  %8710 = vst [vmem:[#allocation32_spill] sm:$0xff] %v7734_v47  ;;  %v7738_v23 = vmul.f32 %v7542_v31, %v8711_v1  ;;  %v7751_v22 = vmul.f32 %v7540_v58, %v8717_v26  ;;  %v8719_v30 = vld [vmem:[#allocation50_spill] sm:$0xff]  ;;  %v8721_v1 = vld [vmem:[#allocation51_spill] sm:$0xff]  ;;  %v7763_v43 = vmul.f32 %v7542_v31, %v8723_v0 }
 0x355   :  { %8714 = vst [vmem:[#allocation34_spill] sm:$0xff] %v7743_v49  ;;  %8716 = vst [vmem:[#allocation35_spill] sm:$0xff] %v7747_v35  ;;  %v7755_v47 = vmul.f32 %v7542_v31, %v8719_v30  ;;  %v8725_v49 = vld [vmem:[#allocation53_spill] sm:$0xff]  ;;  %v8727_v35 = vld [vmem:[#allocation54_spill] sm:$0xff] }
 0x356   :  { %8712 = vst [vmem:[#allocation33_spill] sm:$0xff] %v7738_v23  ;;  %8718 = vst [vmem:[#allocation36_spill] sm:$0xff] %v7751_v22  ;;  %v7759_v23 = vmul.f32 %v7540_v58, %v8721_v1  ;;  %v7767_v2 = vmul.f32 %v7540_v58, %v8725_v49  ;;  %v7771_v26 = vmul.f32 %v7542_v31, %v8727_v35  ;;  %v8729_v22 = vld [vmem:[#allocation55_spill] sm:$0xff] }
 0x357   :  { %8720 = vst [vmem:[#allocation37_spill] sm:$0xff] %v7755_v47  ;;  %8724 = vst [vmem:[#allocation39_spill] sm:$0xff] %v7763_v43  ;;  %v7775_v30 = vmul.f32 %v7540_v58, %v8729_v22  ;;  %v8731_v47 = vld [vmem:[#allocation56_spill] sm:$0xff]  ;;  %v8735_v43 = vld [vmem:[#allocation58_spill] sm:$0xff] }
 0x358   :  { %8722 = vst [vmem:[#allocation38_spill] sm:$0xff] %v7759_v23  ;;  %8726 = vst [vmem:[#allocation40_spill] sm:$0xff] %v7767_v2  ;;  %v7779_v1 = vmul.f32 %v7542_v31, %v8731_v47  ;;  %v8733_v23 = vld [vmem:[#allocation57_spill] sm:$0xff]  ;;  %v7787_v49 = vmul.f32 %v7542_v31, %v8735_v43  ;;  %v8737_v2 = vld [vmem:[#allocation59_spill] sm:$0xff] }
 0x359   :  { %8728 = vst [vmem:[#allocation41_spill] sm:$0xff] %v7771_v26  ;;  %8730 = vst [vmem:[#allocation42_spill] sm:$0xff] %v7775_v30  ;;  %v7783_v0 = vmul.f32 %v7540_v58, %v8733_v23  ;;  %v7791_v35 = vmul.f32 %v7540_v58, %v8737_v2  ;;  %v8739_v26 = vld [vmem:[#allocation60_spill] sm:$0xff]  ;;  %v8741_v30 = vld [vmem:[#allocation61_spill] sm:$0xff] }
 0x35a   :  { %8732 = vst [vmem:[#allocation43_spill] sm:$0xff] %v7779_v1  ;;  %8736 = vst [vmem:[#allocation45_spill] sm:$0xff] %v7787_v49  ;;  %v7795_v22 = vmul.f32 %v7542_v31, %v8739_v26  ;;  %v7799_v47 = vmul.f32 %v7540_v58, %v8741_v30  ;;  %v8742_v1 = vld [vmem:[#allocation62_spill] sm:$0xff]  ;;  %v8745_v49 = vld [vmem:[#allocation64_spill] sm:$0xff] }
 0x35b   :  { %8734 = vst [vmem:[#allocation44_spill] sm:$0xff] %v7783_v0  ;;  %8738 = vst [vmem:[#allocation46_spill] sm:$0xff] %v7791_v35  ;;  %v7803_v23 = vmul.f32 %v7542_v31, %v8742_v1  ;;  %v8744_v0 = vld [vmem:[#allocation63_spill] sm:$0xff]  ;;  %v7811_v2 = vmul.f32 %v7542_v31, %v8745_v49  ;;  %v8746_v35 = vld [vmem:[#allocation65_spill] sm:$0xff]  ;;  %v7823_v1 = vmul.f32 %v7540_v58, %v8626_v46 }
 0x35c   :  { %8740 = vst [vmem:[#allocation47_spill] sm:$0xff] %v7795_v22  ;;  %v7807_v43 = vmul.f32 %v7540_v58, %v8744_v0  ;;  %v7815_v26 = vmul.f32 %v7540_v58, %v8746_v35  ;;  %v8747_v22 = vld [vmem:[#allocation66_spill] sm:$0xff]  ;;  %v7831_v49 = vmul.f32 %v7540_v58, %v8628_v57  ;;  %v7835_v35 = vmul.f32 %v7542_v31, %v8627_v51 }
 0x35d   :  { %8743 = vst [vmem:[#allocation48_spill] sm:$0xff] %v7803_v23  ;;  %v7819_v30 = vmul.f32 %v7542_v31, %v8747_v22  ;;  %v8748_v23 = vld [vmem:[#allocation68_spill] sm:$0xff]  ;;  %v7839_v22 = vmul.f32 %v7540_v58, %v8630_v59  ;;  %v7843_v46 = vmul.f32 %v7542_v31, %v8629_v42  ;;  %v7851_v57 = vmul.f32 %v7542_v31, %v6945_v39 }
 0x35e   :  { %v7827_v0 = vmul.f32 %v7542_v31, %v8748_v23  ;;  %8749 = vst [vmem:[#allocation49_spill] sm:$0xff] %v7831_v49  ;;  %8750 = vst [vmem:[#allocation50_spill] sm:$0xff] %v7835_v35  ;;  %v7847_v23 = vmul.f32 %v7540_v58, %v6941_v13  ;;  %v8754_v49 = vld [vmem:[#allocation73_spill] sm:$0xff]  ;;  %v8755_v35 = vld [vmem:[#allocation74_spill] sm:$0xff]  ;;  %v7871_v39 = vmul.f32 %v7540_v58, %v6992_v27 }
 0x35f   :  { %8751 = vst [vmem:[#allocation51_spill] sm:$0xff] %v7839_v22  ;;  %8752 = vst [vmem:[#allocation52_spill] sm:$0xff] %v7843_v46  ;;  %v7855_v51 = vmul.f32 %v7540_v58, %v8754_v49  ;;  %v7859_v59 = vmul.f32 %v7542_v31, %v8755_v35  ;;  %v8756_v22 = vld [vmem:[#allocation75_spill] sm:$0xff]  ;;  %v8757_v46 = vld [vmem:[#allocation76_spill] sm:$0xff]  ;;  %v7879_v35 = vmul.f32 %v7540_v58, %v7031_v15 }
 0x360   :  { %8753 = vst [vmem:[#allocation53_spill] sm:$0xff] %v7851_v57  ;;  %v7863_v42 = vmul.f32 %v7540_v58, %v8756_v22  ;;  %v7867_v13 = vmul.f32 %v7542_v31, %v8757_v46  ;;  %8759 = vst [vmem:[#allocation55_spill] sm:$0xff] %v7871_v39  ;;  %v8760_v57 = vld [vmem:[#allocation77_spill] sm:$0xff]  ;;  %v7883_v22 = vmul.f32 %v7542_v31, %v7036_v11  ;;  %v8764_v39 = vld [vmem:[#allocation27_spill] sm:$0xff] }
 0x361   :  { %v7875_v49 = vmul.f32 %v7542_v31, %v8760_v57  ;;  %v7887_v46 = vmul.f32 %v7540_v58, %v7039_v53  ;;  %v7895_v57 = vmul.f32 %v7540_v58, %v8764_v39  ;;  %v7903_v11 = vmul.f32 %v7540_v58, %v7081_v37 }
 0x362   :  { %8758 = vst [vmem:[#allocation54_spill] sm:$0xff] %v7867_v13  ;;  %8762 = vst [vmem:[#allocation57_spill] sm:$0xff] %v7883_v22  ;;  %v8763_v13 = vld [vmem:[#allocation24_spill] sm:$0xff]  ;;  %v8768_v22 = vld [vmem:[#allocation79_spill] sm:$0xff]  ;;  %v7915_v39 = vmul.f32 %v7542_v31, %v7125_v29 }
 0x363   :  { %8761 = vst [vmem:[#allocation56_spill] sm:$0xff] %v7875_v49  ;;  %v7891_v27 = vmul.f32 %v7542_v31, %v8763_v13  ;;  %v8765_v49 = vld [vmem:[#allocation78_spill] sm:$0xff]  ;;  %8767 = vst [vmem:[#allocation59_spill] sm:$0xff] %v7903_v11  ;;  %v7907_v53 = vmul.f32 %v7542_v31, %v8768_v22  ;;  %v7911_v13 = vmul.f32 %v7540_v58, %v7119_v3  ;;  %v8774_v11 = vld [vmem:[#allocation81_spill] sm:$0xff] }
 0x364   :  { %v7899_v15 = vmul.f32 %v7542_v31, %v8765_v49  ;;  %8771 = vst [vmem:[#allocation62_spill] sm:$0xff] %v7915_v39  ;;  %v7919_v49 = vmul.f32 %v7540_v58, %v7128_v44  ;;  %v7927_v22 = vmul.f32 %v7540_v58, %v8774_v11  ;;  %v8777_v39 = vld [vmem:[#allocation84_spill] sm:$0xff] }
 0x365   :  { %8769 = vst [vmem:[#allocation60_spill] sm:$0xff] %v7907_v53  ;;  %8770 = vst [vmem:[#allocation61_spill] sm:$0xff] %v7911_v13  ;;  %v8775_v53 = vld [vmem:[#allocation82_spill] sm:$0xff]  ;;  %v8776_v13 = vld [vmem:[#allocation83_spill] sm:$0xff]  ;;  %v7939_v44 = vmul.f32 %v7542_v31, %v8777_v39  ;;  %v7959_v39 = vmul.f32 %v7540_v58, %v7250_v63 }
 0x366   :  { %8766 = vst [vmem:[#allocation58_spill] sm:$0xff] %v7899_v15  ;;  %v8772_v15 = vld [vmem:[#allocation80_spill] sm:$0xff]  ;;  %v7931_v3 = vmul.f32 %v7542_v31, %v8775_v53  ;;  %v7935_v29 = vmul.f32 %v7540_v58, %v8776_v13  ;;  %v7951_v53 = vmul.f32 %v7540_v58, %v7219_v18  ;;  %v7955_v13 = vmul.f32 %v7542_v31, %v7223_v52 }
 0x367   :  { %v7923_v37 = vmul.f32 %v7542_v31, %v8772_v15  ;;  %v7943_v15 = vmul.f32 %v7540_v58, %v7210_v50  ;;  %v7963_v50 = vmul.f32 %v7542_v31, %v7255_v6  ;;  %v7975_v52 = vmul.f32 %v7540_v58, %v7299_v32 }
 0x368   :  { %8781 = vst [vmem:[#allocation66_spill] sm:$0xff] %v7955_v13  ;;  %v8784_v13 = vld [vmem:[#allocation69_spill] sm:$0xff]  ;;  %v7983_v6 = vmul.f32 %v7540_v58, %v7307_v55  ;;  %v7995_v32 = vmul.f32 %v7542_v31, %v7343_v5  ;;  %v8003_v55 = vmul.f32 %v7542_v31, %v7353_v45  ;;  %v8015_v5 = vmul.f32 %v7540_v58, %v7395_v4 }
 0x369   :  { %8773 = vst [vmem:[#allocation63_spill] sm:$0xff] %v7923_v37  ;;  %8778 = vst [vmem:[#allocation64_spill] sm:$0xff] %v7943_v15  ;;  %v8779_v37 = vld [vmem:[#allocation85_spill] sm:$0xff]  ;;  %v8782_v15 = vld [vmem:[#allocation67_spill] sm:$0xff]  ;;  %v7979_v63 = vmul.f32 %v7542_v31, %v8784_v13  ;;  %v7999_v13 = vmul.f32 %v7540_v58, %v7350_v16  ;;  %v8023_v45 = vmul.f32 %v7540_v58, %v7427_v14 }
 0x36a   :  { %v7947_v11 = vmul.f32 %v7542_v31, %v8779_v37  ;;  %v7967_v37 = vmul.f32 %v7540_v58, %v8782_v15  ;;  %8785 = vst [vmem:[#allocation68_spill] sm:$0xff] %v7983_v6  ;;  %v7987_v15 = vmul.f32 %v7542_v31, %v7312_v10  ;;  %8787 = vst [vmem:[#allocation74_spill] sm:$0xff] %v7995_v32  ;;  %v8788_v6 = vld [vmem:[#allocation72_spill] sm:$0xff]  ;;  %v8793_v32 = vld [vmem:[#allocation86_spill] sm:$0xff] }
 0x36b   :  { %v8007_v10 = vmul.f32 %v7540_v58, %v8788_v6  ;;  %8792 = vst [vmem:[#allocation77_spill] sm:$0xff] %v8015_v5  ;;  %v8019_v16 = vmul.f32 %v7542_v31, %v8793_v32  ;;  %8795 = vst [vmem:[#allocation27_spill] sm:$0xff] %v8023_v45  ;;  %v8027_v6 = vmul.f32 %v7542_v31, %v7431_v12  ;;  %v8801_v5 = vld [vmem:[#allocation89_spill] sm:$0xff]  ;;  %v8804_v45 = vld [vmem:[#allocation91_spill] sm:$0xff] }
 0x36c   :  { %8780 = vst [vmem:[#allocation65_spill] sm:$0xff] %v7947_v11  ;;  %v8783_v11 = vld [vmem:[#allocation70_spill] sm:$0xff]  ;;  %8786 = vst [vmem:[#allocation73_spill] sm:$0xff] %v7987_v15  ;;  %v8790_v15 = vld [vmem:[#allocation71_spill] sm:$0xff]  ;;  %v8039_v32 = vmul.f32 %v7540_v58, %v8801_v5  ;;  %v8047_v12 = vmul.f32 %v7540_v58, %v8804_v45  ;;  %v4037_v45 = vadd.f32 %v7683_v25, %v7550_v62 }
 0x36d   :  { %v7971_v18 = vmul.f32 %v7542_v31, %v8783_v11  ;;  %v7991_v11 = vmul.f32 %v7540_v58, %v7340_v17  ;;  %8789 = vst [vmem:[#allocation75_spill] sm:$0xff] %v8007_v10  ;;  %v8011_v17 = vmul.f32 %v7542_v31, %v8790_v15  ;;  %8794 = vst [vmem:[#allocation24_spill] sm:$0xff] %v8019_v16  ;;  %v8797_v10 = vld [vmem:[#allocation87_spill] sm:$0xff]  ;;  %v8803_v16 = vld [vmem:[#allocation90_spill] sm:$0xff] }
 0x36e   :  { %8796 = vst [vmem:[#allocation78_spill] sm:$0xff] %v8027_v6  ;;  %v8031_v15 = vmul.f32 %v7540_v58, %v8797_v10  ;;  %8802 = vst [vmem:[#allocation81_spill] sm:$0xff] %v8039_v32  ;;  %v8043_v14 = vmul.f32 %v7542_v31, %v8803_v16  ;;  %v8806_v6 = vld [vmem:[#allocation92_spill] sm:$0xff]  ;;  %v8810_v32 = vld [vmem:[#allocation95_spill] sm:$0xff]  ;;  %v4044_v62 = vadd.f32 %v7685_v21, %v7578_v40 }
 0x36f   :  { %8791 = vst [vmem:[#allocation76_spill] sm:$0xff] %v8011_v17  ;;  %v8799_v17 = vld [vmem:[#allocation88_spill] sm:$0xff]  ;;  %8805 = vst [vmem:[#allocation82_spill] sm:$0xff] %v8047_v12  ;;  %v8051_v10 = vmul.f32 %v7542_v31, %v8806_v6  ;;  %v8063_v16 = vmul.f32 %v7540_v58, %v8810_v32  ;;  %v4038_v12 = vadd.f32 %v7685_v21, %v7554_v61  ;;  %v8814_v40 = vld [vmem:[#allocation7_spill] sm:$0xff] }
 0x370   :  { %8798 = vst [vmem:[#allocation79_spill] sm:$0xff] %v8031_v15  ;;  %v8035_v4 = vmul.f32 %v7542_v31, %v8799_v17  ;;  %v8807_v15 = vld [vmem:[#allocation93_spill] sm:$0xff]  ;;  %v4039_v6 = vadd.f32 %v7683_v25, %v7558_v20  ;;  %v4045_v61 = vadd.f32 %v7683_v25, %v7582_v38  ;;  %v4046_v20 = vadd.f32 %v7685_v21, %v7586_v36  ;;  %v8815_v38 = vld [vmem:[#allocation8_spill] sm:$0xff] }
 0x371   :  { %v8055_v17 = vmul.f32 %v7540_v58, %v8807_v15  ;;  %8811 = vst [vmem:[#allocation84_spill] sm:$0xff] %v8063_v16  ;;  %v4040_v15 = vadd.f32 %v7685_v21, %v7562_v34  ;;  %v4043_v58 = vadd.f32 %v7683_v25, %v7574_v19  ;;  %v4047_v34 = vadd.f32 %v7683_v25, %v7590_v9  ;;  %v8813_v19 = vld [vmem:[#allocation6_spill] sm:$0xff]  ;;  %v8816_v36 = vld [vmem:[#allocation9_spill] sm:$0xff] }
 0x372   :  { %8800 = vst [vmem:[#allocation80_spill] sm:$0xff] %v8035_v4  ;;  %v8808_v4 = vld [vmem:[#allocation94_spill] sm:$0xff]  ;;  %4165 = vst [vmem:[#allocation2] sm:$0xff] %v4037_v45  ;;  %v4049_v32 = vadd.f32 %v7683_v25, %v8813_v19  ;;  %v4050_v16 = vadd.f32 %v7685_v21, %v8814_v40  ;;  %v4052_v9 = vadd.f32 %v7685_v21, %v8816_v36 }
 0x373   :  { %v8059_v5 = vmul.f32 %v7542_v31, %v8808_v4  ;;  %v4041_v31 = vadd.f32 %v7683_v25, %v7566_v28  ;;  %v4042_v4 = vadd.f32 %v7685_v21, %v7570_v48  ;;  %4166 = vst.msk [vmem:[#allocation2 + $0x8] sm:$0xff] %vm1851_vm4, %v4038_v12  ;;  %4167 = vst [vmem:[#allocation2 + $0x10] sm:$0xff] %v4039_v6  ;;  %v8812_v28 = vld [vmem:[#allocation5_spill] sm:$0xff]  ;;  %v8817_v45 = vld [vmem:[#allocation10_spill] sm:$0xff] }
 0x374   :  { %v4048_v48 = vadd.f32 %v7685_v21, %v8812_v28  ;;  %4168 = vst.msk [vmem:[#allocation2 + $0x18] sm:$0xff] %vm1851_vm4, %v4040_v15  ;;  %4171 = vst [vmem:[#allocation2 + $0x30] sm:$0xff] %v4043_v58  ;;  %v4053_v12 = vadd.f32 %v7683_v25, %v7617_v7  ;;  %v4054_v6 = vadd.f32 %v7685_v21, %v8817_v45  ;;  %v8819_v58 = vld [vmem:[#allocation12_spill] sm:$0xff] }
 0x375   :  { %8809 = vst [vmem:[#allocation83_spill] sm:$0xff] %v8059_v5  ;;  %v4051_v5 = vadd.f32 %v7683_v25, %v8815_v38  ;;  %4169 = vst [vmem:[#allocation2 + $0x20] sm:$0xff] %v4041_v31  ;;  %v4055_v28 = vadd.f32 %v7683_v25, %v7625_v54  ;;  %v4056_v15 = vadd.f32 %v7685_v21, %v7629_v41  ;;  %v8820_v54 = vld [vmem:[#allocation13_spill] sm:$0xff]  ;;  %v8825_v38 = vld [vmem:[#allocation18_spill] sm:$0xff] }
 0x376   :  { %4170 = vst.msk [vmem:[#allocation2 + $0x28] sm:$0xff] %vm1851_vm4, %v4042_v4  ;;  %4172 = vst.msk [vmem:[#allocation2 + $0x38] sm:$0xff] %vm1851_vm4, %v4044_v62  ;;  %v4057_v31 = vadd.f32 %v7683_v25, %v7633_v8  ;;  %v8818_v4 = vld [vmem:[#allocation11_spill] sm:$0xff]  ;;  %v4059_v19 = vadd.f32 %v7683_v25, %v8819_v58  ;;  %v4060_v62 = vadd.f32 %v7685_v21, %v8820_v54  ;;  %v8831_v58 = vld [vmem:[#allocation25_spill] sm:$0xff] }
 0x377   :  { %4173 = vst [vmem:[#allocation2 + $0x40] sm:$0xff] %v4045_v61  ;;  %4174 = vst.msk [vmem:[#allocation2 + $0x48] sm:$0xff] %vm1851_vm4, %v4046_v20  ;;  %v4058_v7 = vadd.f32 %v7685_v21, %v8818_v4  ;;  %v8821_v61 = vld [vmem:[#allocation14_spill] sm:$0xff]  ;;  %v4062_v8 = vadd.f32 %v7685_v21, %v7653_v24  ;;  %v4063_v20 = vadd.f32 %v7683_v25, %v7657_v33  ;;  %v8826_v33 = vld [vmem:[#allocation19_spill] sm:$0xff] }
 0x378   :  { %4175 = vst [vmem:[#allocation2 + $0x50] sm:$0xff] %v4047_v34  ;;  %4176 = vst.msk [vmem:[#allocation2 + $0x58] sm:$0xff] %vm1851_vm4, %v4048_v48  ;;  %v4061_v41 = vadd.f32 %v7683_v25, %v8821_v61  ;;  %v8823_v34 = vld [vmem:[#allocation16_spill] sm:$0xff]  ;;  %v4067_v24 = vadd.f32 %v7683_v25, %v8825_v38  ;;  %v4068_v36 = vadd.f32 %v7685_v21, %v8826_v33  ;;  %v8830_v4 = vld [vmem:[#allocation23_spill] sm:$0xff] }
 0x379   :  { %4177 = vst [vmem:[#allocation2 + $0x60] sm:$0xff] %v4049_v32  ;;  %4178 = vst.msk [vmem:[#allocation2 + $0x68] sm:$0xff] %vm1851_vm4, %v4050_v16  ;;  %v8822_v16 = vld [vmem:[#allocation15_spill] sm:$0xff]  ;;  %v4065_v48 = vadd.f32 %v7683_v25, %v8823_v34  ;;  %v8824_v32 = vld [vmem:[#allocation17_spill] sm:$0xff] }
 0x37a   :  { %4179 = vst [vmem:[#allocation2 + $0x70] sm:$0xff] %v4051_v5  ;;  %4180 = vst.msk [vmem:[#allocation2 + $0x78] sm:$0xff] %vm1851_vm4, %v4052_v9  ;;  %v4064_v5 = vadd.f32 %v7685_v21, %v8822_v16  ;;  %v4066_v40 = vadd.f32 %v7685_v21, %v8824_v32  ;;  %v4069_v9 = vadd.f32 %v7683_v25, %v7681_v60  ;;  %v8835_v16 = vld [vmem:[#allocation30_spill] sm:$0xff]  ;;  %v8837_v32 = vld [vmem:[#allocation32_spill] sm:$0xff] }
 0x37b   :  { %4181 = vst [vmem:[#allocation2 + $0x80] sm:$0xff] %v4053_v12  ;;  %4182 = vst.msk [vmem:[#allocation2 + $0x88] sm:$0xff] %vm1851_vm4, %v4054_v6  ;;  %v8827_v12 = vld [vmem:[#allocation20_spill] sm:$0xff]  ;;  %v8828_v6 = vld [vmem:[#allocation21_spill] sm:$0xff]  ;;  %v4074_v60 = vadd.f32 %v7685_v21, %v8831_v58  ;;  %v4079_v34 = vadd.f32 %v7683_v25, %v8835_v16 }
 0x37c   :  { %4183 = vst [vmem:[#allocation2 + $0x90] sm:$0xff] %v4055_v28  ;;  %4184 = vst.msk [vmem:[#allocation2 + $0x98] sm:$0xff] %vm1851_vm4, %v4056_v15  ;;  %v4070_v45 = vadd.f32 %v7685_v21, %v8827_v12  ;;  %v4071_v28 = vadd.f32 %v7683_v25, %v8828_v6  ;;  %v8829_v15 = vld [vmem:[#allocation22_spill] sm:$0xff]  ;;  %v8838_v38 = vld [vmem:[#allocation33_spill] sm:$0xff] }
 0x37d   :  { %4185 = vst [vmem:[#allocation2 + $0xa0] sm:$0xff] %v4057_v31  ;;  %4186 = vst.msk [vmem:[#allocation2 + $0xa8] sm:$0xff] %vm1851_vm4, %v4058_v7  ;;  %v4072_v31 = vadd.f32 %v7685_v21, %v8829_v15  ;;  %v4073_v7 = vadd.f32 %v7683_v25, %v8830_v4  ;;  %v8841_v12 = vld [vmem:[#allocation36_spill] sm:$0xff]  ;;  %v8842_v6 = vld [vmem:[#allocation37_spill] sm:$0xff] }
 0x37e   :  { %4187 = vst [vmem:[#allocation2 + $0xb0] sm:$0xff] %v4059_v19  ;;  %4188 = vst.msk [vmem:[#allocation2 + $0xb8] sm:$0xff] %vm1851_vm4, %v4060_v62  ;;  %v8832_v19 = vld [vmem:[#allocation26_spill] sm:$0xff]  ;;  %v8833_v62 = vld [vmem:[#allocation28_spill] sm:$0xff] }
 0x37f   :  { %4189 = vst [vmem:[#allocation2 + $0xc0] sm:$0xff] %v4061_v41  ;;  %4190 = vst.msk [vmem:[#allocation2 + $0xc8] sm:$0xff] %vm1851_vm4, %v4062_v8  ;;  %v4075_v54 = vadd.f32 %v7683_v25, %v8832_v19  ;;  %v4076_v61 = vadd.f32 %v7685_v21, %v8833_v62  ;;  %v4077_v41 = vadd.f32 %v7683_v25, %v7718_v56  ;;  %v8834_v8 = vld [vmem:[#allocation29_spill] sm:$0xff]  ;;  %v8843_v15 = vld [vmem:[#allocation38_spill] sm:$0xff] }
 0x380   :  { %4191 = vst [vmem:[#allocation2 + $0xd0] sm:$0xff] %v4063_v20  ;;  %4192 = vst.msk [vmem:[#allocation2 + $0xd8] sm:$0xff] %vm1851_vm4, %v4064_v5  ;;  %v4078_v20 = vadd.f32 %v7685_v21, %v8834_v8  ;;  %v8836_v5 = vld [vmem:[#allocation31_spill] sm:$0xff]  ;;  %v4082_v56 = vadd.f32 %v7685_v21, %v8838_v38  ;;  %v4087_v4 = vadd.f32 %v7683_v25, %v8843_v15  ;;  %v8845_v58 = vld [vmem:[#allocation40_spill] sm:$0xff] }
 0x381   :  { %4193 = vst [vmem:[#allocation2 + $0xe0] sm:$0xff] %v4065_v48  ;;  %4194 = vst.msk [vmem:[#allocation2 + $0xe8] sm:$0xff] %vm1851_vm4, %v4066_v40  ;;  %v4080_v48 = vadd.f32 %v7685_v21, %v8836_v5  ;;  %v4081_v40 = vadd.f32 %v7683_v25, %v8837_v32  ;;  %v8846_v19 = vld [vmem:[#allocation41_spill] sm:$0xff]  ;;  %v8847_v62 = vld [vmem:[#allocation42_spill] sm:$0xff] }
 0x382   :  { %4195 = vst [vmem:[#allocation2 + $0xf0] sm:$0xff] %v4067_v24  ;;  %4196 = vst.msk [vmem:[#allocation2 + $0xf8] sm:$0xff] %vm1851_vm4, %v4068_v36  ;;  %v8839_v24 = vld [vmem:[#allocation34_spill] sm:$0xff]  ;;  %v8840_v36 = vld [vmem:[#allocation35_spill] sm:$0xff]  ;;  %v4091_v8 = vadd.f32 %v7683_v25, %v8847_v62 }
 0x383   :  { %4197 = vst [vmem:[#allocation2 + $0x100] sm:$0xff] %v4069_v9  ;;  %4198 = vst.msk [vmem:[#allocation2 + $0x108] sm:$0xff] %vm1851_vm4, %v4070_v45  ;;  %v4083_v33 = vadd.f32 %v7683_v25, %v8839_v24  ;;  %v4084_v9 = vadd.f32 %v7685_v21, %v8840_v36  ;;  %v4085_v45 = vadd.f32 %v7683_v25, %v8841_v12  ;;  %v8851_v32 = vld [vmem:[#allocation46_spill] sm:$0xff]  ;;  %v8853_v24 = vld [vmem:[#allocation48_spill] sm:$0xff] }
 0x384   :  { %4199 = vst [vmem:[#allocation2 + $0x110] sm:$0xff] %v4071_v28  ;;  %4200 = vst.msk [vmem:[#allocation2 + $0x118] sm:$0xff] %vm1851_vm4, %v4072_v31  ;;  %v4086_v28 = vadd.f32 %v7685_v21, %v8842_v6  ;;  %v8844_v31 = vld [vmem:[#allocation39_spill] sm:$0xff]  ;;  %v4095_v38 = vadd.f32 %v7683_v25, %v8851_v32  ;;  %v4099_v36 = vadd.f32 %v7683_v25, %v7807_v43  ;;  %v8854_v6 = vld [vmem:[#allocation49_spill] sm:$0xff] }
 0x385   :  { %4201 = vst [vmem:[#allocation2 + $0x120] sm:$0xff] %v4073_v7  ;;  %4202 = vst.msk [vmem:[#allocation2 + $0x128] sm:$0xff] %vm1851_vm4, %v4074_v60  ;;  %v4088_v7 = vadd.f32 %v7685_v21, %v8844_v31  ;;  %v4089_v60 = vadd.f32 %v7683_v25, %v8845_v58  ;;  %v4101_v12 = vadd.f32 %v7683_v25, %v7815_v26  ;;  %v8856_v15 = vld [vmem:[#allocation51_spill] sm:$0xff]  ;;  %v8858_v31 = vld [vmem:[#allocation53_spill] sm:$0xff] }
 0x386   :  { %4203 = vst [vmem:[#allocation2 + $0x130] sm:$0xff] %v4075_v54  ;;  %4204 = vst.msk [vmem:[#allocation2 + $0x138] sm:$0xff] %vm1851_vm4, %v4076_v61  ;;  %v4090_v54 = vadd.f32 %v7685_v21, %v8846_v19  ;;  %v8848_v61 = vld [vmem:[#allocation43_spill] sm:$0xff]  ;;  %v4104_v43 = vadd.f32 %v7685_v21, %v7827_v0  ;;  %v4109_v0 = vadd.f32 %v7683_v25, %v7847_v23 }
 0x387   :  { %4205 = vst [vmem:[#allocation2 + $0x140] sm:$0xff] %v4077_v41  ;;  %4206 = vst.msk [vmem:[#allocation2 + $0x148] sm:$0xff] %vm1851_vm4, %v4078_v20  ;;  %v4092_v41 = vadd.f32 %v7685_v21, %v8848_v61  ;;  %v8849_v20 = vld [vmem:[#allocation44_spill] sm:$0xff]  ;;  %v4111_v58 = vadd.f32 %v7683_v25, %v7855_v51  ;;  %v4113_v19 = vadd.f32 %v7683_v25, %v7863_v42  ;;  %v8860_v62 = vld [vmem:[#allocation55_spill] sm:$0xff] }
 0x388   :  { %4207 = vst [vmem:[#allocation2 + $0x150] sm:$0xff] %v4079_v34  ;;  %4208 = vst.msk [vmem:[#allocation2 + $0x158] sm:$0xff] %vm1851_vm4, %v4080_v48  ;;  %v4093_v16 = vadd.f32 %v7683_v25, %v8849_v20  ;;  %v8850_v34 = vld [vmem:[#allocation45_spill] sm:$0xff]  ;;  %v8852_v48 = vld [vmem:[#allocation47_spill] sm:$0xff]  ;;  %v4119_v20 = vadd.f32 %v7683_v25, %v7887_v46 }
 0x389   :  { %4209 = vst [vmem:[#allocation2 + $0x160] sm:$0xff] %v4081_v40  ;;  %4210 = vst.msk [vmem:[#allocation2 + $0x168] sm:$0xff] %vm1851_vm4, %v4082_v56  ;;  %v4094_v5 = vadd.f32 %v7685_v21, %v8850_v34  ;;  %v4096_v40 = vadd.f32 %v7685_v21, %v8852_v48  ;;  %v4097_v56 = vadd.f32 %v7683_v25, %v7799_v47  ;;  %v8861_v51 = vld [vmem:[#allocation56_spill] sm:$0xff]  ;;  %v8864_v32 = vld [vmem:[#allocation59_spill] sm:$0xff] }
 0x38a   :  { %4211 = vst [vmem:[#allocation2 + $0x170] sm:$0xff] %v4083_v33  ;;  %4212 = vst.msk [vmem:[#allocation2 + $0x178] sm:$0xff] %vm1851_vm4, %v4084_v9  ;;  %v4098_v33 = vadd.f32 %v7685_v21, %v8853_v24  ;;  %v4100_v9 = vadd.f32 %v7685_v21, %v7811_v2  ;;  %v4102_v47 = vadd.f32 %v7685_v21, %v7819_v30  ;;  %v8865_v46 = vld [vmem:[#allocation60_spill] sm:$0xff] }
 0x38b   :  { %4213 = vst [vmem:[#allocation2 + $0x180] sm:$0xff] %v4085_v45  ;;  %4214 = vst.msk [vmem:[#allocation2 + $0x188] sm:$0xff] %vm1851_vm4, %v4086_v28  ;;  %v4103_v45 = vadd.f32 %v7683_v25, %v7823_v1  ;;  %v4105_v2 = vadd.f32 %v7683_v25, %v8854_v6  ;;  %v8855_v28 = vld [vmem:[#allocation50_spill] sm:$0xff]  ;;  %v4107_v30 = vadd.f32 %v7683_v25, %v8856_v15  ;;  %v8857_v1 = vld [vmem:[#allocation52_spill] sm:$0xff] }
 0x38c   :  { %4215 = vst [vmem:[#allocation2 + $0x190] sm:$0xff] %v4087_v4  ;;  %4216 = vst.msk [vmem:[#allocation2 + $0x198] sm:$0xff] %vm1851_vm4, %v4088_v7  ;;  %v4106_v26 = vadd.f32 %v7685_v21, %v8855_v28  ;;  %v4108_v4 = vadd.f32 %v7685_v21, %v8857_v1  ;;  %v4110_v7 = vadd.f32 %v7685_v21, %v8858_v31  ;;  %v8870_v6 = vld [vmem:[#allocation65_spill] sm:$0xff]  ;;  %v8875_v31 = vld [vmem:[#allocation75_spill] sm:$0xff] }
 0x38d   :  { %4217 = vst [vmem:[#allocation2 + $0x1a0] sm:$0xff] %v4089_v60  ;;  %4218 = vst.msk [vmem:[#allocation2 + $0x1a8] sm:$0xff] %vm1851_vm4, %v4090_v54  ;;  %v4112_v60 = vadd.f32 %v7685_v21, %v7859_v59  ;;  %v8859_v54 = vld [vmem:[#allocation54_spill] sm:$0xff]  ;;  %v4116_v61 = vadd.f32 %v7685_v21, %v8861_v51  ;;  %v4117_v59 = vadd.f32 %v7683_v25, %v7879_v35  ;;  %v8881_v51 = vld [vmem:[#allocation79_spill] sm:$0xff] }
 0x38e   :  { %4219 = vst [vmem:[#allocation2 + $0x1b0] sm:$0xff] %v4091_v8  ;;  %4220 = vst.msk [vmem:[#allocation2 + $0x1b8] sm:$0xff] %vm1851_vm4, %v4092_v41  ;;  %v4114_v23 = vadd.f32 %v7685_v21, %v8859_v54  ;;  %v4115_v8 = vadd.f32 %v7683_v25, %v8860_v62  ;;  %v8862_v41 = vld [vmem:[#allocation57_spill] sm:$0xff]  ;;  %v4121_v34 = vadd.f32 %v7683_v25, %v7895_v57  ;;  %v8879_v54 = vld [vmem:[#allocation27_spill] sm:$0xff] }
 0x38f   :  { %4221 = vst [vmem:[#allocation2 + $0x1c0] sm:$0xff] %v4093_v16  ;;  %4222 = vst.msk [vmem:[#allocation2 + $0x1c8] sm:$0xff] %vm1851_vm4, %v4094_v5  ;;  %v4118_v42 = vadd.f32 %v7685_v21, %v8862_v41  ;;  %v4120_v16 = vadd.f32 %v7685_v21, %v7891_v27  ;;  %v8863_v5 = vld [vmem:[#allocation58_spill] sm:$0xff]  ;;  %v4124_v48 = vadd.f32 %v7685_v21, %v8865_v46 }
 0x390   :  { %4223 = vst [vmem:[#allocation2 + $0x1d0] sm:$0xff] %v4095_v38  ;;  %4224 = vst.msk [vmem:[#allocation2 + $0x1d8] sm:$0xff] %vm1851_vm4, %v4096_v40  ;;  %v4122_v35 = vadd.f32 %v7685_v21, %v8863_v5  ;;  %v4123_v38 = vadd.f32 %v7683_v25, %v8864_v32  ;;  %v8866_v40 = vld [vmem:[#allocation61_spill] sm:$0xff]  ;;  %v4127_v24 = vadd.f32 %v7683_v25, %v7919_v49  ;;  %v8880_v62 = vld [vmem:[#allocation78_spill] sm:$0xff] }
 0x391   :  { %4225 = vst [vmem:[#allocation2 + $0x1e0] sm:$0xff] %v4097_v56  ;;  %4226 = vst.msk [vmem:[#allocation2 + $0x1e8] sm:$0xff] %vm1851_vm4, %v4098_v33  ;;  %v4125_v27 = vadd.f32 %v7683_v25, %v8866_v40  ;;  %v8867_v56 = vld [vmem:[#allocation62_spill] sm:$0xff]  ;;  %v8868_v33 = vld [vmem:[#allocation63_spill] sm:$0xff]  ;;  %v4132_v49 = vadd.f32 %v7685_v21, %v7939_v44  ;;  %v4137_v44 = vadd.f32 %v7683_v25, %v7959_v39 }
 0x392   :  { %4227 = vst [vmem:[#allocation2 + $0x1f0] sm:$0xff] %v4099_v36  ;;  %4228 = vst.msk [vmem:[#allocation2 + $0x1f8] sm:$0xff] %vm1851_vm4, %v4100_v9  ;;  %v4126_v57 = vadd.f32 %v7685_v21, %v8867_v56  ;;  %v4128_v36 = vadd.f32 %v7685_v21, %v8868_v33  ;;  %v4129_v9 = vadd.f32 %v7683_v25, %v7927_v22 }
 0x393   :  { %4229 = vst [vmem:[#allocation2 + $0x200] sm:$0xff] %v4101_v12  ;;  %4230 = vst.msk [vmem:[#allocation2 + $0x208] sm:$0xff] %vm1851_vm4, %v4102_v47  ;;  %v4130_v12 = vadd.f32 %v7685_v21, %v7931_v3  ;;  %v4131_v47 = vadd.f32 %v7683_v25, %v7935_v29  ;;  %v4134_v22 = vadd.f32 %v7685_v21, %v8870_v6  ;;  %v8871_v29 = vld [vmem:[#allocation66_spill] sm:$0xff] }
 0x394   :  { %4231 = vst [vmem:[#allocation2 + $0x210] sm:$0xff] %v4103_v45  ;;  %4232 = vst.msk [vmem:[#allocation2 + $0x218] sm:$0xff] %vm1851_vm4, %v4104_v43  ;;  %v8869_v45 = vld [vmem:[#allocation64_spill] sm:$0xff]  ;;  %v4135_v3 = vadd.f32 %v7683_v25, %v7951_v53  ;;  %v4138_v28 = vadd.f32 %v7685_v21, %v7963_v50  ;;  %v4140_v53 = vadd.f32 %v7685_v21, %v7971_v18 }
 0x395   :  { %4233 = vst [vmem:[#allocation2 + $0x220] sm:$0xff] %v4105_v2  ;;  %4234 = vst.msk [vmem:[#allocation2 + $0x228] sm:$0xff] %vm1851_vm4, %v4106_v26  ;;  %v4133_v43 = vadd.f32 %v7683_v25, %v8869_v45  ;;  %v4136_v2 = vadd.f32 %v7685_v21, %v8871_v29  ;;  %v4139_v26 = vadd.f32 %v7683_v25, %v7967_v37  ;;  %v8873_v37 = vld [vmem:[#allocation73_spill] sm:$0xff] }
 0x396   :  { %4235 = vst [vmem:[#allocation2 + $0x230] sm:$0xff] %v4107_v30  ;;  %4236 = vst.msk [vmem:[#allocation2 + $0x238] sm:$0xff] %vm1851_vm4, %v4108_v4  ;;  %v4141_v15 = vadd.f32 %v7683_v25, %v7975_v52  ;;  %v4142_v39 = vadd.f32 %v7685_v21, %v7979_v63  ;;  %v8872_v30 = vld [vmem:[#allocation68_spill] sm:$0xff]  ;;  %v4144_v1 = vadd.f32 %v7685_v21, %v8873_v37  ;;  %v8874_v4 = vld [vmem:[#allocation74_spill] sm:$0xff] }
 0x397   :  { %4237 = vst [vmem:[#allocation2 + $0x240] sm:$0xff] %v4109_v0  ;;  %4238 = vst.msk [vmem:[#allocation2 + $0x248] sm:$0xff] %vm1851_vm4, %v4110_v7  ;;  %v4143_v50 = vadd.f32 %v7683_v25, %v8872_v30  ;;  %v4145_v18 = vadd.f32 %v7683_v25, %v7991_v11  ;;  %v4146_v52 = vadd.f32 %v7685_v21, %v8874_v4 }
 0x398   :  { %4239 = vst [vmem:[#allocation2 + $0x250] sm:$0xff] %v4111_v58  ;;  %4240 = vst.msk [vmem:[#allocation2 + $0x258] sm:$0xff] %vm1851_vm4, %v4112_v60  ;;  %v4147_v63 = vadd.f32 %v7683_v25, %v7999_v13  ;;  %v4148_v0 = vadd.f32 %v7685_v21, %v8003_v55  ;;  %v4149_v7 = vadd.f32 %v7683_v25, %v8875_v31  ;;  %v8876_v58 = vld [vmem:[#allocation76_spill] sm:$0xff]  ;;  %v8877_v60 = vld [vmem:[#allocation77_spill] sm:$0xff] }
 0x399   :  { %4241 = vst [vmem:[#allocation2 + $0x260] sm:$0xff] %v4113_v19  ;;  %4242 = vst.msk [vmem:[#allocation2 + $0x268] sm:$0xff] %vm1851_vm4, %v4114_v23  ;;  %v4150_v11 = vadd.f32 %v7685_v21, %v8876_v58  ;;  %v4151_v19 = vadd.f32 %v7683_v25, %v8877_v60  ;;  %v8878_v13 = vld [vmem:[#allocation24_spill] sm:$0xff]  ;;  %v4153_v23 = vadd.f32 %v7683_v25, %v8879_v54 }
 0x39a   :  { %4243 = vst [vmem:[#allocation2 + $0x270] sm:$0xff] %v4115_v8  ;;  %4244 = vst.msk [vmem:[#allocation2 + $0x278] sm:$0xff] %vm1851_vm4, %v4116_v61  ;;  %v4152_v55 = vadd.f32 %v7685_v21, %v8878_v13  ;;  %v4154_v8 = vadd.f32 %v7685_v21, %v8880_v62  ;;  %v4155_v61 = vadd.f32 %v7683_v25, %v8881_v51 }
 0x39b   :  { %4245 = vst [vmem:[#allocation2 + $0x280] sm:$0xff] %v4117_v59  ;;  %4246 = vst.msk [vmem:[#allocation2 + $0x288] sm:$0xff] %vm1851_vm4, %v4118_v42  ;;  %v8882_v59 = vld [vmem:[#allocation80_spill] sm:$0xff]  ;;  %v8883_v42 = vld [vmem:[#allocation81_spill] sm:$0xff]  ;;  %v4161_v32 = vadd.f32 %v7683_v25, %v8055_v17 }
 0x39c   :  { %4247 = vst [vmem:[#allocation2 + $0x290] sm:$0xff] %v4119_v20  ;;  %4248 = vst.msk [vmem:[#allocation2 + $0x298] sm:$0xff] %vm1851_vm4, %v4120_v16  ;;  %v4156_v41 = vadd.f32 %v7685_v21, %v8882_v59  ;;  %v4157_v20 = vadd.f32 %v7683_v25, %v8883_v42  ;;  %v4158_v16 = vadd.f32 %v7685_v21, %v8043_v14 }
 0x39d   :  { %4249 = vst [vmem:[#allocation2 + $0x2a0] sm:$0xff] %v4121_v34  ;;  %4250 = vst.msk [vmem:[#allocation2 + $0x2a8] sm:$0xff] %vm1851_vm4, %v4122_v35  ;;  %v8884_v34 = vld [vmem:[#allocation82_spill] sm:$0xff]  ;;  %v4160_v35 = vadd.f32 %v7685_v21, %v8051_v10 }
 0x39e   :  { %4251 = vst [vmem:[#allocation2 + $0x2b0] sm:$0xff] %v4123_v38  ;;  %4252 = vst.msk [vmem:[#allocation2 + $0x2b8] sm:$0xff] %vm1851_vm4, %v4124_v48  ;;  %v4159_v5 = vadd.f32 %v7683_v25, %v8884_v34  ;;  %v8885_v38 = vld [vmem:[#allocation83_spill] sm:$0xff]  ;;  %v8886_v48 = vld [vmem:[#allocation84_spill] sm:$0xff] }
 0x39f   :  { %4253 = vst [vmem:[#allocation2 + $0x2c0] sm:$0xff] %v4125_v27  ;;  %4254 = vst.msk [vmem:[#allocation2 + $0x2c8] sm:$0xff] %vm1851_vm4, %v4126_v57  ;;  %v4162_v46 = vadd.f32 %v7685_v21, %v8885_v38  ;;  %v4163_v14 = vadd.f32 %v7683_v25, %v8886_v48 }
 0x3a0   :  { %4255 = vst [vmem:[#allocation2 + $0x2d0] sm:$0xff] %v4127_v24  ;;  %4256 = vst.msk [vmem:[#allocation2 + $0x2d8] sm:$0xff] %vm1851_vm4, %v4128_v36 }
 0x3a1   :  { %4257 = vst [vmem:[#allocation2 + $0x2e0] sm:$0xff] %v4129_v9  ;;  %4258 = vst.msk [vmem:[#allocation2 + $0x2e8] sm:$0xff] %vm1851_vm4, %v4130_v12 }
 0x3a2   :  { %4259 = vst [vmem:[#allocation2 + $0x2f0] sm:$0xff] %v4131_v47  ;;  %4260 = vst.msk [vmem:[#allocation2 + $0x2f8] sm:$0xff] %vm1851_vm4, %v4132_v49 }
 0x3a3   :  { %4261 = vst [vmem:[#allocation2 + $0x300] sm:$0xff] %v4133_v43  ;;  %4262 = vst.msk [vmem:[#allocation2 + $0x308] sm:$0xff] %vm1851_vm4, %v4134_v22 }
 0x3a4   :  { %4263 = vst [vmem:[#allocation2 + $0x310] sm:$0xff] %v4135_v3  ;;  %4264 = vst.msk [vmem:[#allocation2 + $0x318] sm:$0xff] %vm1851_vm4, %v4136_v2 }
 0x3a5   :  { %4265 = vst [vmem:[#allocation2 + $0x320] sm:$0xff] %v4137_v44  ;;  %4266 = vst.msk [vmem:[#allocation2 + $0x328] sm:$0xff] %vm1851_vm4, %v4138_v28 }
 0x3a6   :  { %4267 = vst [vmem:[#allocation2 + $0x330] sm:$0xff] %v4139_v26  ;;  %4268 = vst.msk [vmem:[#allocation2 + $0x338] sm:$0xff] %vm1851_vm4, %v4140_v53 }
 0x3a7   :  { %4269 = vst [vmem:[#allocation2 + $0x340] sm:$0xff] %v4141_v15  ;;  %4270 = vst.msk [vmem:[#allocation2 + $0x348] sm:$0xff] %vm1851_vm4, %v4142_v39 }
 0x3a8   :  { %4271 = vst [vmem:[#allocation2 + $0x350] sm:$0xff] %v4143_v50  ;;  %4272 = vst.msk [vmem:[#allocation2 + $0x358] sm:$0xff] %vm1851_vm4, %v4144_v1 }
 0x3a9   :  { %4273 = vst [vmem:[#allocation2 + $0x360] sm:$0xff] %v4145_v18  ;;  %4274 = vst.msk [vmem:[#allocation2 + $0x368] sm:$0xff] %vm1851_vm4, %v4146_v52 }
 0x3aa   :  { %4275 = vst [vmem:[#allocation2 + $0x370] sm:$0xff] %v4147_v63  ;;  %4276 = vst.msk [vmem:[#allocation2 + $0x378] sm:$0xff] %vm1851_vm4, %v4148_v0 }
 0x3ab   :  { %4277 = vst [vmem:[#allocation2 + $0x380] sm:$0xff] %v4149_v7  ;;  %4278 = vst.msk [vmem:[#allocation2 + $0x388] sm:$0xff] %vm1851_vm4, %v4150_v11 }
 0x3ac   :  { %4279 = vst [vmem:[#allocation2 + $0x390] sm:$0xff] %v4151_v19  ;;  %4280 = vst.msk [vmem:[#allocation2 + $0x398] sm:$0xff] %vm1851_vm4, %v4152_v55 }
 0x3ad   :  { %4281 = vst [vmem:[#allocation2 + $0x3a0] sm:$0xff] %v4153_v23  ;;  %4282 = vst.msk [vmem:[#allocation2 + $0x3a8] sm:$0xff] %vm1851_vm4, %v4154_v8 }
 0x3ae   :  { %4283 = vst [vmem:[#allocation2 + $0x3b0] sm:$0xff] %v4155_v61  ;;  %4284 = vst.msk [vmem:[#allocation2 + $0x3b8] sm:$0xff] %vm1851_vm4, %v4156_v41 }
 0x3af   :  { %4285 = vst [vmem:[#allocation2 + $0x3c0] sm:$0xff] %v4157_v20  ;;  %4286 = vst.msk [vmem:[#allocation2 + $0x3c8] sm:$0xff] %vm1851_vm4, %v4158_v16 }
 0x3b0   :  { %4287 = vst [vmem:[#allocation2 + $0x3d0] sm:$0xff] %v4159_v5  ;;  %4288 = vst.msk [vmem:[#allocation2 + $0x3d8] sm:$0xff] %vm1851_vm4, %v4160_v35 }
 0x3b1   :  { %4289 = vst [vmem:[#allocation2 + $0x3e0] sm:$0xff] %v4161_v32  ;;  %4290 = vst.msk [vmem:[#allocation2 + $0x3e8] sm:$0xff] %vm1851_vm4, %v4162_v46 }
 0x3b2   :  { %4291 = vst [vmem:[#allocation2 + $0x3f0] sm:$0xff] %v4163_v14 }
 0x3b3   :  { %4701 = shalt.err (!%p4698_p4)
}
 0x3b4   :  { %s4702_s24 = scalar_lea.hbm %s8400_s5, 16384 }
 0x3b5   :  { %p4703_p5 = scmp.ne.s32.totalorder %s8400_s5, %s4702_s24  ;;  %p4706_p6 = scmp.lt.u32.totalorder %s4702_s24, %s8400_s5 }
 0x3b7   :  { %p4708_p7 = pnand %p4706_p6, %p4703_p5 }
 0x3b9   :  { %4711 = shalt.err (!%p4708_p7)
}
 0x3ba   :  { %s4723_s10 = smov 256  }
 0x3bb   :  { %4304 = dma.vmem_to_hbm [thread:$0]  %s4299_s12, 16384, %s8400_s5, [#allocation3], %s4723_s10, %s4723_s10, %s4715_s30  }
 0x3bc   :  { %4712 = dma.done.wait [#allocation3], 16384  }
 0x3bd   :  { %4713 = vsyncadd [#allocation3], 4294950912 }
 0x3be   :  { %4308 = vsyncpa [#allocation3], 1 }

</bundles_post_ra>
